<compile_context>
chip_gen: v6e
topology: v6e:2x2x1
jax: 0.10.0
libtpu: 0.0.40
codegen_flags: <defaults>
</compile_context>

<pallas_src>
import functools

import jax
import jax.numpy as jnp
from jax.experimental import pallas as pl
from jax.experimental.pallas import tpu as pltpu

AMB = 3        # D + 1 with D = 2 (ambient dimension, cross product needs 3)
SUB_R = 8      # sublane rows per inner chunk: one f32 vreg per live value
PPK = 16       # packed f32 scalars per mixture component (13 used, pad to 16)
# per-component packing:
#   [0:3]  beta_k * mu_k                (exp-factor weights)
#   [3]    beta_k                       (exp-factor offset)
#   [4:7]  alpha_k * mu_k               (dF coefficients)
#   [7:13] alpha_k*beta_k*mu_ki*mu_kj   (symmetric ddF coefficients, _SYM order)
_SYM = ((0, 0), (1, 1), (2, 2), (0, 1), (0, 2), (1, 2))


def _emsre_kernel(params_ref, x_ref, z_ref, ld_ref, *, n_layers, k_mix, tile_r):
    """params_ref: SMEM (n_layers, k_mix*PPK) f32 (scalar prefetch).
    x_ref/z_ref: VMEM (AMB, tile_r, 128).  ld_ref: VMEM (tile_r, 128)."""

    # Hoist every SMEM scalar load out of the per-chunk fori_loop body (JAX
    # does not CSE them, and the body re-executes per 8-row vreg chunk).
    # Scalar -> vreg broadcasts stay at point of use to bound vreg pressure.
    P = [[tuple(params_ref[l, k * PPK + c] for c in range(13))
          for k in range(k_mix)]
         for l in range(n_layers)]

    def chunk(r, carry):
        r0 = pl.multiple_of(r * SUB_R, SUB_R)
        rows = pl.ds(r0, SUB_R)
        x = [x_ref[i, rows, :] for i in range(AMB)]   # 3 x (8,128) vregs
        ldj = jnp.zeros((SUB_R, 128), jnp.float32)    # safe for n_layers == 0

        for l in range(n_layers):
            # ---- _compute_dF_ddF (sum-of-radial-potentials) ----------------
            # ef_k    = exp(beta_k*(x.mu_k - 1))
            # dF_i    = sum_k alpha_k          * ef_k * mu_ki
            # ddF_ij  = sum_k alpha_k * beta_k * ef_k * mu_ki * mu_kj (symmetric)
            dF = None
            H = None
            for k in range(k_mix):
                pk = P[l][k]
                ef = jnp.exp(x[0] * pk[0] + x[1] * pk[1] + x[2] * pk[2]
                             - pk[3])
                dfk = [pk[4 + i] * ef for i in range(AMB)]
                hk = [pk[7 + c] * ef for c in range(6)]
                if dF is None:
                    dF, H = dfk, hk
                else:
                    dF = [dF[i] + dfk[i] for i in range(AMB)]
                    H = [H[c] + hk[c] for c in range(6)]
            D = [[H[0], H[3], H[4]],
                 [H[3], H[1], H[5]],
                 [H[4], H[5], H[2]]]

            # ---- exponential map -------------------------------------------
            xdF = x[0] * dF[0] + x[1] * dF[1] + x[2] * dF[2]
            v = [dF[i] - x[i] * xdF for i in range(AMB)]           # (I-xx^T)dF
            nsq = v[0] * v[0] + v[1] * v[1] + v[2] * v[2]
            inv_norm = jax.lax.rsqrt(jnp.maximum(nsq, 1e-30))      # EUP, no div
            norm_v = nsq * inv_norm
            vu = [v[i] * inv_norm for i in range(AMB)]
            cos_nv = jnp.cos(norm_v)
            sin_nv = jnp.sin(norm_v)
            # guard v -> 0: sin|v|/|v| -> 1 (the PyTorch reference would NaN)
            # TODO(synk): when v -> 0 the log-det below still -> -inf (as in
            # the reference); a finite-limit formulation would need J = I + dv
            # with an arbitrary tangent basis.
            sdn = jnp.where(nsq > 1e-24, sin_nv * inv_norm, 1.0)
            z = [x[i] * cos_nv + vu[i] * sin_nv for i in range(AMB)]

            # dv[i][j] = ddF_ij - x_i*(x.ddF_:j + dF_j) - delta_ij*(x.dF)
            t = [x[0] * D[0][j] + x[1] * D[1][j] + x[2] * D[2][j] + dF[j]
                 for j in range(AMB)]
            dv = []
            for i in range(AMB):
                row = []
                for j in range(AMB):
                    val = D[i][j] - x[i] * t[j]
                    if i == j:
                        val = val - xdF
                    row.append(val)
                dv.append(row)

            # E = [v_unit, cross(x, v_unit)]
            e1 = [x[1] * vu[2] - x[2] * vu[1],
                  x[2] * vu[0] - x[0] * vu[2],
                  x[0] * vu[1] - x[1] * vu[0]]

            # J@w without materialising J:
            #   J = cos*I + sdn*dv + M@dv,  M = (cos-sdn)*vu vu^T - sdn*x v^T
            # and sdn*(v.De) == sin|v|*(vu.De), so one dot serves both terms.
            cms = cos_nv - sdn

            def j_apply(w):
                De = [dv[i][0] * w[0] + dv[i][1] * w[1] + dv[i][2] * w[2]
                      for i in range(AMB)]
                s = vu[0] * De[0] + vu[1] * De[1] + vu[2] * De[2]
                a = cms * s
                b = sin_nv * s
                return [cos_nv * w[i] + sdn * De[i] + a * vu[i] - b * x[i]
                        for i in range(AMB)]

            JE0 = j_apply(vu)
            JE1 = j_apply(e1)
            g00 = JE0[0] * JE0[0] + JE0[1] * JE0[1] + JE0[2] * JE0[2]
            g01 = JE0[0] * JE1[0] + JE0[1] * JE1[1] + JE0[2] * JE1[2]
            g11 = JE1[0] * JE1[0] + JE1[1] * JE1[1] + JE1[2] * JE1[2]
            # 0.5*slogdet(JE^T JE)[1]  (2x2 closed form; G is PSD)
            det = g00 * g11 - g01 * g01
            ldj = ldj + 0.5 * jnp.log(jnp.abs(det))
            x = z                                   # feed next layer in-register

        for i in range(AMB):
            z_ref[i, rows, :] = x[i]
        ld_ref[rows, :] = ldj
        return carry

    jax.lax.fori_loop(0, tile_r // SUB_R, chunk, 0)


def _cdiv(a, b):
    return (a + b - 1) // b


def _round_up(n, m):
    return ((n + m - 1) // m) * m


def _choose_tiling(rows):
    """Pick tile_r (multiple of SUB_R, <= 256) so the grid has >= 2 steps when
    possible, and avoid an odd step count (> 1) so v7x's two TensorCores both
    get work, without paying for a whole extra padded tile."""
    tile_r = min(256, max(SUB_R, _round_up(_cdiv(rows, 2), SUB_R)))
    steps = _cdiv(rows, tile_r)
    if steps > 2 and steps % 2 == 1:
        tile_r = max(SUB_R, _round_up(_cdiv(rows, steps + 1), SUB_R))
        steps = _cdiv(rows, tile_r)
    rows_p = _round_up(rows, tile_r)
    return tile_r, rows_p


@jax.jit
def emsre_forward(x, mus, betas, alphas):
    """EMSRE forward.  x: (Npts, 3) on S^2;  mus: (L,K,3);  betas, alphas: (L,K).
    Returns (z: (Npts,3), sum of 0.5*logdet Jacobians: (Npts,))."""
    x = jnp.atleast_2d(x)
    npts = x.shape[0]
    n_layers, k_mix = mus.shape[0], mus.shape[1]

    if n_layers == 0:
        return x.astype(jnp.float32), jnp.zeros((npts,), jnp.float32)

    # ---- per-layer scalar parameters (tiny K-sized math, plain JAX) --------
    mu = mus / jnp.linalg.norm(mus, axis=-1, keepdims=True)          # (L,K,3)
    beta = jax.nn.softplus(betas)                                    # (L,K)
    alpha = jax.nn.softplus(alphas)
    asum = jnp.sum(alpha, axis=-1, keepdims=True)
    alpha = jnp.where(asum > 1.0, alpha / asum, alpha)
    ab = alpha * beta
    params = jnp.zeros((n_layers, k_mix, PPK), jnp.float32)
    params = params.at[..., 0:3].set(beta[..., None] * mu)
    params = params.at[..., 3].set(beta)
    params = params.at[..., 4:7].set(alpha[..., None] * mu)
    for c, (i, j) in enumerate(_SYM):
        params = params.at[..., 7 + c].set(ab * mu[..., i] * mu[..., j])
    params = params.reshape(n_layers, k_mix * PPK)

    # ---- component-major (3, rows, 128) layout; one fused pad+transpose ----
    # TODO(synk): if EMSRE is called inside a larger pipeline, keep the data
    # component-major end-to-end and drop these wrapper transposes (they are
    # ~40% of the total HBM traffic for this op).
    rows = _cdiv(npts, 128)
    tile_r, rows_p = _choose_tiling(rows)
    npad = rows_p * 128
    xp = jnp.zeros((npad, AMB), jnp.float32).at[:npts].set(x.astype(jnp.float32))
    x_t = xp.reshape(rows_p, 128, AMB).transpose(2, 0, 1)     # (3, rows_p, 128)

    grid = (rows_p // tile_r,)
    kernel = functools.partial(_emsre_kernel, n_layers=n_layers,
                               k_mix=k_mix, tile_r=tile_r)
    cost = pl.CostEstimate(
        flops=int(npad) * n_layers * (250 + 24 * k_mix),
        transcendentals=int(npad) * n_layers * (k_mix + 4),
        bytes_accessed=28 * int(npad),
    )
    z_t, ld_t = pl.pallas_call(
        kernel,
        out_shape=(jax.ShapeDtypeStruct((AMB, rows_p, 128), jnp.float32),
                   jax.ShapeDtypeStruct((rows_p, 128), jnp.float32)),
        grid_spec=pltpu.PrefetchScalarGridSpec(
            num_scalar_prefetch=1,                    # params -> SMEM
            grid=grid,
            in_specs=[pl.BlockSpec((AMB, tile_r, 128), lambda g, prm: (0, g, 0))],
            out_specs=[pl.BlockSpec((AMB, tile_r, 128), lambda g, prm: (0, g, 0)),
                       pl.BlockSpec((tile_r, 128), lambda g, prm: (g, 0))],
        ),
        compiler_params=pltpu.CompilerParams(
            dimension_semantics=("parallel",)),
        cost_estimate=cost,
    )(params, x_t)

    z = z_t.transpose(1, 2, 0).reshape(npad, AMB)[:npts]
    ldjs = ld_t.reshape(npad)[:npts]
    return z, ldjs


def _reference_emsre(x, mus, betas, alphas):
    """Pure-JAX mirror of the PyTorch EMSRE forward, for validation."""
    Id = jnp.eye(AMB, dtype=jnp.float32)
    ldjs = jnp.zeros((x.shape[0],), jnp.float32)
    for l in range(mus.shape[0]):
        mu = mus[l] / jnp.linalg.norm(mus[l], axis=1, keepdims=True)
        beta = jax.nn.softplus(betas[l])
        alpha = jax.nn.softplus(alphas[l])
        alpha = jnp.where(jnp.sum(alpha) > 1.0, alpha / jnp.sum(alpha), alpha)
        ef = jnp.exp(beta * (x @ mu.T - 1.0))                        # (N,K)
        dF = (ef * alpha) @ mu                                       # (N,3)
        ddF = jnp.einsum('ndk,pk->npd',
                         jnp.einsum('nk,dk->ndk', ef, (alpha * beta) * mu.T),
                         mu.T)                                       # (N,3,3)
        proj = Id[None] - jnp.einsum('ni,nj->nij', x, x)
        v = jnp.einsum('nij,nj->ni', proj, dF)
        norm_v = jnp.linalg.norm(v, axis=1, keepdims=True)
        v_unit = v / norm_v
        cos_nv = jnp.cos(norm_v)
        sin_nv = jnp.sin(norm_v)
        z = x * cos_nv + v_unit * sin_nv
        dv = (jnp.einsum('nij,njk->nik', proj, ddF)
              - jnp.einsum('ni,nj->nij', x, dF)
              - jnp.sum(x * dF, axis=1)[:, None, None] * Id[None])
        sdn = sin_nv / norm_v
        vvT = jnp.einsum('ni,nj->nij', v_unit, v_unit)
        xvT = jnp.einsum('ni,nj->nij', x, v)
        J = (cos_nv[..., None] * Id[None]
             + sdn[..., None] * dv
             + jnp.einsum('nij,njk->nik',
                          cos_nv[..., None] * vvT - sdn[..., None] * vvT
                          - sdn[..., None] * xvT, dv))
        E = jnp.stack([v_unit, jnp.cross(x, v_unit)], axis=-1)
        JE = jnp.matmul(J, E)
        G = jnp.einsum('nij,nik->njk', JE, JE)
        _, lad = jnp.linalg.slogdet(G)
        ldjs = ldjs + 0.5 * lad
        x = z
    return x, ldjs


if __name__ == "__main__":
    key = jax.random.PRNGKey(0)
    D, n_layers, k_mix = 2, 3, 4
    npts = 3000   # not a lane multiple: exercises padding, a 2-step grid,
                  # and a multi-iteration inner vreg-chunk loop

    kx, km, kb, ka = jax.random.split(key, 4)
    x = jax.random.normal(kx, (npts, D + 1), jnp.float32)
    x = x / jnp.linalg.norm(x, axis=1, keepdims=True)        # points on S^2

    # TODO(synk): the PyTorch parameter init uses sd.sample_sd / softplus_inv
    # helpers; here the raw (pre-softplus) parameters are deterministic randoms.
    mus = jax.random.normal(km, (n_layers, k_mix, D + 1), jnp.float32)
    betas = jax.random.normal(kb, (n_layers, k_mix), jnp.float32)
    alphas = jax.random.normal(ka, (n_layers, k_mix), jnp.float32)

    z, ldjs = emsre_forward(x, mus, betas, alphas)
    jax.block_until_ready((z, ldjs))

    z_ref, ld_ref = _reference_emsre(x, mus, betas, alphas)
    assert z.shape == (npts, D + 1) and ldjs.shape == (npts,)
    assert jnp.allclose(z, z_ref, rtol=1e-4, atol=1e-4), \
        float(jnp.max(jnp.abs(z - z_ref)))
    assert jnp.allclose(ldjs, ld_ref, rtol=1e-3, atol=1e-3), \
        float(jnp.max(jnp.abs(ldjs - ld_ref)))
    print("KERNEL_OK")
</pallas_src>

<mosaic_0001>
module attributes {stable_mosaic.version = 11 : i64} {
  func.func @_emsre_kernel(%arg0: i32, %arg1: memref<3x64xf32, #tpu.memory_space<smem>>, %arg2: memref<3x16x128xf32, #tpu.memory_space<vmem>>, %arg3: memref<3x16x128xf32, #tpu.memory_space<vmem>>, %arg4: memref<16x128xf32, #tpu.memory_space<vmem>>) attributes {dimension_semantics = [#tpu.dimension_semantics<parallel>], iteration_bounds = array<i64: 2>, scalar_prefetch = 1 : i64, scratch_operands = 0 : i64, tpu.core_type = #tpu.core_type<tc>, window_params = [{transform_indices = @transform_0, window_bounds = array<i64: 3, 16, 128>}, {transform_indices = @transform_1, window_bounds = array<i64: 3, 16, 128>}, {transform_indices = @transform_2, window_bounds = array<i64: 16, 128>}]} {
    %c0 = arith.constant 0 : index
    %c0_0 = arith.constant 0 : index
    %0 = memref.load %arg1[%c0, %c0_0] : memref<3x64xf32, #tpu.memory_space<smem>>
    %c0_1 = arith.constant 0 : index
    %c1 = arith.constant 1 : index
    %1 = memref.load %arg1[%c0_1, %c1] : memref<3x64xf32, #tpu.memory_space<smem>>
    %c0_2 = arith.constant 0 : index
    %c2 = arith.constant 2 : index
    %2 = memref.load %arg1[%c0_2, %c2] : memref<3x64xf32, #tpu.memory_space<smem>>
    %c0_3 = arith.constant 0 : index
    %c3 = arith.constant 3 : index
    %3 = memref.load %arg1[%c0_3, %c3] : memref<3x64xf32, #tpu.memory_space<smem>>
    %c0_4 = arith.constant 0 : index
    %c4 = arith.constant 4 : index
    %4 = memref.load %arg1[%c0_4, %c4] : memref<3x64xf32, #tpu.memory_space<smem>>
    %c0_5 = arith.constant 0 : index
    %c5 = arith.constant 5 : index
    %5 = memref.load %arg1[%c0_5, %c5] : memref<3x64xf32, #tpu.memory_space<smem>>
    %c0_6 = arith.constant 0 : index
    %c6 = arith.constant 6 : index
    %6 = memref.load %arg1[%c0_6, %c6] : memref<3x64xf32, #tpu.memory_space<smem>>
    %c0_7 = arith.constant 0 : index
    %c7 = arith.constant 7 : index
    %7 = memref.load %arg1[%c0_7, %c7] : memref<3x64xf32, #tpu.memory_space<smem>>
    %c0_8 = arith.constant 0 : index
    %c8 = arith.constant 8 : index
    %8 = memref.load %arg1[%c0_8, %c8] : memref<3x64xf32, #tpu.memory_space<smem>>
    %c0_9 = arith.constant 0 : index
    %c9 = arith.constant 9 : index
    %9 = memref.load %arg1[%c0_9, %c9] : memref<3x64xf32, #tpu.memory_space<smem>>
    %c0_10 = arith.constant 0 : index
    %c10 = arith.constant 10 : index
    %10 = memref.load %arg1[%c0_10, %c10] : memref<3x64xf32, #tpu.memory_space<smem>>
    %c0_11 = arith.constant 0 : index
    %c11 = arith.constant 11 : index
    %11 = memref.load %arg1[%c0_11, %c11] : memref<3x64xf32, #tpu.memory_space<smem>>
    %c0_12 = arith.constant 0 : index
    %c12 = arith.constant 12 : index
    %12 = memref.load %arg1[%c0_12, %c12] : memref<3x64xf32, #tpu.memory_space<smem>>
    %c0_13 = arith.constant 0 : index
    %c16 = arith.constant 16 : index
    %13 = memref.load %arg1[%c0_13, %c16] : memref<3x64xf32, #tpu.memory_space<smem>>
    %c0_14 = arith.constant 0 : index
    %c17 = arith.constant 17 : index
    %14 = memref.load %arg1[%c0_14, %c17] : memref<3x64xf32, #tpu.memory_space<smem>>
    %c0_15 = arith.constant 0 : index
    %c18 = arith.constant 18 : index
    %15 = memref.load %arg1[%c0_15, %c18] : memref<3x64xf32, #tpu.memory_space<smem>>
    %c0_16 = arith.constant 0 : index
    %c19 = arith.constant 19 : index
    %16 = memref.load %arg1[%c0_16, %c19] : memref<3x64xf32, #tpu.memory_space<smem>>
    %c0_17 = arith.constant 0 : index
    %c20 = arith.constant 20 : index
    %17 = memref.load %arg1[%c0_17, %c20] : memref<3x64xf32, #tpu.memory_space<smem>>
    %c0_18 = arith.constant 0 : index
    %c21 = arith.constant 21 : index
    %18 = memref.load %arg1[%c0_18, %c21] : memref<3x64xf32, #tpu.memory_space<smem>>
    %c0_19 = arith.constant 0 : index
    %c22 = arith.constant 22 : index
    %19 = memref.load %arg1[%c0_19, %c22] : memref<3x64xf32, #tpu.memory_space<smem>>
    %c0_20 = arith.constant 0 : index
    %c23 = arith.constant 23 : index
    %20 = memref.load %arg1[%c0_20, %c23] : memref<3x64xf32, #tpu.memory_space<smem>>
    %c0_21 = arith.constant 0 : index
    %c24 = arith.constant 24 : index
    %21 = memref.load %arg1[%c0_21, %c24] : memref<3x64xf32, #tpu.memory_space<smem>>
    %c0_22 = arith.constant 0 : index
    %c25 = arith.constant 25 : index
    %22 = memref.load %arg1[%c0_22, %c25] : memref<3x64xf32, #tpu.memory_space<smem>>
    %c0_23 = arith.constant 0 : index
    %c26 = arith.constant 26 : index
    %23 = memref.load %arg1[%c0_23, %c26] : memref<3x64xf32, #tpu.memory_space<smem>>
    %c0_24 = arith.constant 0 : index
    %c27 = arith.constant 27 : index
    %24 = memref.load %arg1[%c0_24, %c27] : memref<3x64xf32, #tpu.memory_space<smem>>
    %c0_25 = arith.constant 0 : index
    %c28 = arith.constant 28 : index
    %25 = memref.load %arg1[%c0_25, %c28] : memref<3x64xf32, #tpu.memory_space<smem>>
    %c0_26 = arith.constant 0 : index
    %c32 = arith.constant 32 : index
    %26 = memref.load %arg1[%c0_26, %c32] : memref<3x64xf32, #tpu.memory_space<smem>>
    %c0_27 = arith.constant 0 : index
    %c33 = arith.constant 33 : index
    %27 = memref.load %arg1[%c0_27, %c33] : memref<3x64xf32, #tpu.memory_space<smem>>
    %c0_28 = arith.constant 0 : index
    %c34 = arith.constant 34 : index
    %28 = memref.load %arg1[%c0_28, %c34] : memref<3x64xf32, #tpu.memory_space<smem>>
    %c0_29 = arith.constant 0 : index
    %c35 = arith.constant 35 : index
    %29 = memref.load %arg1[%c0_29, %c35] : memref<3x64xf32, #tpu.memory_space<smem>>
    %c0_30 = arith.constant 0 : index
    %c36 = arith.constant 36 : index
    %30 = memref.load %arg1[%c0_30, %c36] : memref<3x64xf32, #tpu.memory_space<smem>>
    %c0_31 = arith.constant 0 : index
    %c37 = arith.constant 37 : index
    %31 = memref.load %arg1[%c0_31, %c37] : memref<3x64xf32, #tpu.memory_space<smem>>
    %c0_32 = arith.constant 0 : index
    %c38 = arith.constant 38 : index
    %32 = memref.load %arg1[%c0_32, %c38] : memref<3x64xf32, #tpu.memory_space<smem>>
    %c0_33 = arith.constant 0 : index
    %c39 = arith.constant 39 : index
    %33 = memref.load %arg1[%c0_33, %c39] : memref<3x64xf32, #tpu.memory_space<smem>>
    %c0_34 = arith.constant 0 : index
    %c40 = arith.constant 40 : index
    %34 = memref.load %arg1[%c0_34, %c40] : memref<3x64xf32, #tpu.memory_space<smem>>
    %c0_35 = arith.constant 0 : index
    %c41 = arith.constant 41 : index
    %35 = memref.load %arg1[%c0_35, %c41] : memref<3x64xf32, #tpu.memory_space<smem>>
    %c0_36 = arith.constant 0 : index
    %c42 = arith.constant 42 : index
    %36 = memref.load %arg1[%c0_36, %c42] : memref<3x64xf32, #tpu.memory_space<smem>>
    %c0_37 = arith.constant 0 : index
    %c43 = arith.constant 43 : index
    %37 = memref.load %arg1[%c0_37, %c43] : memref<3x64xf32, #tpu.memory_space<smem>>
    %c0_38 = arith.constant 0 : index
    %c44 = arith.constant 44 : index
    %38 = memref.load %arg1[%c0_38, %c44] : memref<3x64xf32, #tpu.memory_space<smem>>
    %c0_39 = arith.constant 0 : index
    %c48 = arith.constant 48 : index
    %39 = memref.load %arg1[%c0_39, %c48] : memref<3x64xf32, #tpu.memory_space<smem>>
    %c0_40 = arith.constant 0 : index
    %c49 = arith.constant 49 : index
    %40 = memref.load %arg1[%c0_40, %c49] : memref<3x64xf32, #tpu.memory_space<smem>>
    %c0_41 = arith.constant 0 : index
    %c50 = arith.constant 50 : index
    %41 = memref.load %arg1[%c0_41, %c50] : memref<3x64xf32, #tpu.memory_space<smem>>
    %c0_42 = arith.constant 0 : index
    %c51 = arith.constant 51 : index
    %42 = memref.load %arg1[%c0_42, %c51] : memref<3x64xf32, #tpu.memory_space<smem>>
    %c0_43 = arith.constant 0 : index
    %c52 = arith.constant 52 : index
    %43 = memref.load %arg1[%c0_43, %c52] : memref<3x64xf32, #tpu.memory_space<smem>>
    %c0_44 = arith.constant 0 : index
    %c53 = arith.constant 53 : index
    %44 = memref.load %arg1[%c0_44, %c53] : memref<3x64xf32, #tpu.memory_space<smem>>
    %c0_45 = arith.constant 0 : index
    %c54 = arith.constant 54 : index
    %45 = memref.load %arg1[%c0_45, %c54] : memref<3x64xf32, #tpu.memory_space<smem>>
    %c0_46 = arith.constant 0 : index
    %c55 = arith.constant 55 : index
    %46 = memref.load %arg1[%c0_46, %c55] : memref<3x64xf32, #tpu.memory_space<smem>>
    %c0_47 = arith.constant 0 : index
    %c56 = arith.constant 56 : index
    %47 = memref.load %arg1[%c0_47, %c56] : memref<3x64xf32, #tpu.memory_space<smem>>
    %c0_48 = arith.constant 0 : index
    %c57 = arith.constant 57 : index
    %48 = memref.load %arg1[%c0_48, %c57] : memref<3x64xf32, #tpu.memory_space<smem>>
    %c0_49 = arith.constant 0 : index
    %c58 = arith.constant 58 : index
    %49 = memref.load %arg1[%c0_49, %c58] : memref<3x64xf32, #tpu.memory_space<smem>>
    %c0_50 = arith.constant 0 : index
    %c59 = arith.constant 59 : index
    %50 = memref.load %arg1[%c0_50, %c59] : memref<3x64xf32, #tpu.memory_space<smem>>
    %c0_51 = arith.constant 0 : index
    %c60 = arith.constant 60 : index
    %51 = memref.load %arg1[%c0_51, %c60] : memref<3x64xf32, #tpu.memory_space<smem>>
    %c1_52 = arith.constant 1 : index
    %c0_53 = arith.constant 0 : index
    %52 = memref.load %arg1[%c1_52, %c0_53] : memref<3x64xf32, #tpu.memory_space<smem>>
    %c1_54 = arith.constant 1 : index
    %c1_55 = arith.constant 1 : index
    %53 = memref.load %arg1[%c1_54, %c1_55] : memref<3x64xf32, #tpu.memory_space<smem>>
    %c1_56 = arith.constant 1 : index
    %c2_57 = arith.constant 2 : index
    %54 = memref.load %arg1[%c1_56, %c2_57] : memref<3x64xf32, #tpu.memory_space<smem>>
    %c1_58 = arith.constant 1 : index
    %c3_59 = arith.constant 3 : index
    %55 = memref.load %arg1[%c1_58, %c3_59] : memref<3x64xf32, #tpu.memory_space<smem>>
    %c1_60 = arith.constant 1 : index
    %c4_61 = arith.constant 4 : index
    %56 = memref.load %arg1[%c1_60, %c4_61] : memref<3x64xf32, #tpu.memory_space<smem>>
    %c1_62 = arith.constant 1 : index
    %c5_63 = arith.constant 5 : index
    %57 = memref.load %arg1[%c1_62, %c5_63] : memref<3x64xf32, #tpu.memory_space<smem>>
    %c1_64 = arith.constant 1 : index
    %c6_65 = arith.constant 6 : index
    %58 = memref.load %arg1[%c1_64, %c6_65] : memref<3x64xf32, #tpu.memory_space<smem>>
    %c1_66 = arith.constant 1 : index
    %c7_67 = arith.constant 7 : index
    %59 = memref.load %arg1[%c1_66, %c7_67] : memref<3x64xf32, #tpu.memory_space<smem>>
    %c1_68 = arith.constant 1 : index
    %c8_69 = arith.constant 8 : index
    %60 = memref.load %arg1[%c1_68, %c8_69] : memref<3x64xf32, #tpu.memory_space<smem>>
    %c1_70 = arith.constant 1 : index
    %c9_71 = arith.constant 9 : index
    %61 = memref.load %arg1[%c1_70, %c9_71] : memref<3x64xf32, #tpu.memory_space<smem>>
    %c1_72 = arith.constant 1 : index
    %c10_73 = arith.constant 10 : index
    %62 = memref.load %arg1[%c1_72, %c10_73] : memref<3x64xf32, #tpu.memory_space<smem>>
    %c1_74 = arith.constant 1 : index
    %c11_75 = arith.constant 11 : index
    %63 = memref.load %arg1[%c1_74, %c11_75] : memref<3x64xf32, #tpu.memory_space<smem>>
    %c1_76 = arith.constant 1 : index
    %c12_77 = arith.constant 12 : index
    %64 = memref.load %arg1[%c1_76, %c12_77] : memref<3x64xf32, #tpu.memory_space<smem>>
    %c1_78 = arith.constant 1 : index
    %c16_79 = arith.constant 16 : index
    %65 = memref.load %arg1[%c1_78, %c16_79] : memref<3x64xf32, #tpu.memory_space<smem>>
    %c1_80 = arith.constant 1 : index
    %c17_81 = arith.constant 17 : index
    %66 = memref.load %arg1[%c1_80, %c17_81] : memref<3x64xf32, #tpu.memory_space<smem>>
    %c1_82 = arith.constant 1 : index
    %c18_83 = arith.constant 18 : index
    %67 = memref.load %arg1[%c1_82, %c18_83] : memref<3x64xf32, #tpu.memory_space<smem>>
    %c1_84 = arith.constant 1 : index
    %c19_85 = arith.constant 19 : index
    %68 = memref.load %arg1[%c1_84, %c19_85] : memref<3x64xf32, #tpu.memory_space<smem>>
    %c1_86 = arith.constant 1 : index
    %c20_87 = arith.constant 20 : index
    %69 = memref.load %arg1[%c1_86, %c20_87] : memref<3x64xf32, #tpu.memory_space<smem>>
    %c1_88 = arith.constant 1 : index
    %c21_89 = arith.constant 21 : index
    %70 = memref.load %arg1[%c1_88, %c21_89] : memref<3x64xf32, #tpu.memory_space<smem>>
    %c1_90 = arith.constant 1 : index
    %c22_91 = arith.constant 22 : index
    %71 = memref.load %arg1[%c1_90, %c22_91] : memref<3x64xf32, #tpu.memory_space<smem>>
    %c1_92 = arith.constant 1 : index
    %c23_93 = arith.constant 23 : index
    %72 = memref.load %arg1[%c1_92, %c23_93] : memref<3x64xf32, #tpu.memory_space<smem>>
    %c1_94 = arith.constant 1 : index
    %c24_95 = arith.constant 24 : index
    %73 = memref.load %arg1[%c1_94, %c24_95] : memref<3x64xf32, #tpu.memory_space<smem>>
    %c1_96 = arith.constant 1 : index
    %c25_97 = arith.constant 25 : index
    %74 = memref.load %arg1[%c1_96, %c25_97] : memref<3x64xf32, #tpu.memory_space<smem>>
    %c1_98 = arith.constant 1 : index
    %c26_99 = arith.constant 26 : index
    %75 = memref.load %arg1[%c1_98, %c26_99] : memref<3x64xf32, #tpu.memory_space<smem>>
    %c1_100 = arith.constant 1 : index
    %c27_101 = arith.constant 27 : index
    %76 = memref.load %arg1[%c1_100, %c27_101] : memref<3x64xf32, #tpu.memory_space<smem>>
    %c1_102 = arith.constant 1 : index
    %c28_103 = arith.constant 28 : index
    %77 = memref.load %arg1[%c1_102, %c28_103] : memref<3x64xf32, #tpu.memory_space<smem>>
    %c1_104 = arith.constant 1 : index
    %c32_105 = arith.constant 32 : index
    %78 = memref.load %arg1[%c1_104, %c32_105] : memref<3x64xf32, #tpu.memory_space<smem>>
    %c1_106 = arith.constant 1 : index
    %c33_107 = arith.constant 33 : index
    %79 = memref.load %arg1[%c1_106, %c33_107] : memref<3x64xf32, #tpu.memory_space<smem>>
    %c1_108 = arith.constant 1 : index
    %c34_109 = arith.constant 34 : index
    %80 = memref.load %arg1[%c1_108, %c34_109] : memref<3x64xf32, #tpu.memory_space<smem>>
    %c1_110 = arith.constant 1 : index
    %c35_111 = arith.constant 35 : index
    %81 = memref.load %arg1[%c1_110, %c35_111] : memref<3x64xf32, #tpu.memory_space<smem>>
    %c1_112 = arith.constant 1 : index
    %c36_113 = arith.constant 36 : index
    %82 = memref.load %arg1[%c1_112, %c36_113] : memref<3x64xf32, #tpu.memory_space<smem>>
    %c1_114 = arith.constant 1 : index
    %c37_115 = arith.constant 37 : index
    %83 = memref.load %arg1[%c1_114, %c37_115] : memref<3x64xf32, #tpu.memory_space<smem>>
    %c1_116 = arith.constant 1 : index
    %c38_117 = arith.constant 38 : index
    %84 = memref.load %arg1[%c1_116, %c38_117] : memref<3x64xf32, #tpu.memory_space<smem>>
    %c1_118 = arith.constant 1 : index
    %c39_119 = arith.constant 39 : index
    %85 = memref.load %arg1[%c1_118, %c39_119] : memref<3x64xf32, #tpu.memory_space<smem>>
    %c1_120 = arith.constant 1 : index
    %c40_121 = arith.constant 40 : index
    %86 = memref.load %arg1[%c1_120, %c40_121] : memref<3x64xf32, #tpu.memory_space<smem>>
    %c1_122 = arith.constant 1 : index
    %c41_123 = arith.constant 41 : index
    %87 = memref.load %arg1[%c1_122, %c41_123] : memref<3x64xf32, #tpu.memory_space<smem>>
    %c1_124 = arith.constant 1 : index
    %c42_125 = arith.constant 42 : index
    %88 = memref.load %arg1[%c1_124, %c42_125] : memref<3x64xf32, #tpu.memory_space<smem>>
    %c1_126 = arith.constant 1 : index
    %c43_127 = arith.constant 43 : index
    %89 = memref.load %arg1[%c1_126, %c43_127] : memref<3x64xf32, #tpu.memory_space<smem>>
    %c1_128 = arith.constant 1 : index
    %c44_129 = arith.constant 44 : index
    %90 = memref.load %arg1[%c1_128, %c44_129] : memref<3x64xf32, #tpu.memory_space<smem>>
    %c1_130 = arith.constant 1 : index
    %c48_131 = arith.constant 48 : index
    %91 = memref.load %arg1[%c1_130, %c48_131] : memref<3x64xf32, #tpu.memory_space<smem>>
    %c1_132 = arith.constant 1 : index
    %c49_133 = arith.constant 49 : index
    %92 = memref.load %arg1[%c1_132, %c49_133] : memref<3x64xf32, #tpu.memory_space<smem>>
    %c1_134 = arith.constant 1 : index
    %c50_135 = arith.constant 50 : index
    %93 = memref.load %arg1[%c1_134, %c50_135] : memref<3x64xf32, #tpu.memory_space<smem>>
    %c1_136 = arith.constant 1 : index
    %c51_137 = arith.constant 51 : index
    %94 = memref.load %arg1[%c1_136, %c51_137] : memref<3x64xf32, #tpu.memory_space<smem>>
    %c1_138 = arith.constant 1 : index
    %c52_139 = arith.constant 52 : index
    %95 = memref.load %arg1[%c1_138, %c52_139] : memref<3x64xf32, #tpu.memory_space<smem>>
    %c1_140 = arith.constant 1 : index
    %c53_141 = arith.constant 53 : index
    %96 = memref.load %arg1[%c1_140, %c53_141] : memref<3x64xf32, #tpu.memory_space<smem>>
    %c1_142 = arith.constant 1 : index
    %c54_143 = arith.constant 54 : index
    %97 = memref.load %arg1[%c1_142, %c54_143] : memref<3x64xf32, #tpu.memory_space<smem>>
    %c1_144 = arith.constant 1 : index
    %c55_145 = arith.constant 55 : index
    %98 = memref.load %arg1[%c1_144, %c55_145] : memref<3x64xf32, #tpu.memory_space<smem>>
    %c1_146 = arith.constant 1 : index
    %c56_147 = arith.constant 56 : index
    %99 = memref.load %arg1[%c1_146, %c56_147] : memref<3x64xf32, #tpu.memory_space<smem>>
    %c1_148 = arith.constant 1 : index
    %c57_149 = arith.constant 57 : index
    %100 = memref.load %arg1[%c1_148, %c57_149] : memref<3x64xf32, #tpu.memory_space<smem>>
    %c1_150 = arith.constant 1 : index
    %c58_151 = arith.constant 58 : index
    %101 = memref.load %arg1[%c1_150, %c58_151] : memref<3x64xf32, #tpu.memory_space<smem>>
    %c1_152 = arith.constant 1 : index
    %c59_153 = arith.constant 59 : index
    %102 = memref.load %arg1[%c1_152, %c59_153] : memref<3x64xf32, #tpu.memory_space<smem>>
    %c1_154 = arith.constant 1 : index
    %c60_155 = arith.constant 60 : index
    %103 = memref.load %arg1[%c1_154, %c60_155] : memref<3x64xf32, #tpu.memory_space<smem>>
    %c2_156 = arith.constant 2 : index
    %c0_157 = arith.constant 0 : index
    %104 = memref.load %arg1[%c2_156, %c0_157] : memref<3x64xf32, #tpu.memory_space<smem>>
    %c2_158 = arith.constant 2 : index
    %c1_159 = arith.constant 1 : index
    %105 = memref.load %arg1[%c2_158, %c1_159] : memref<3x64xf32, #tpu.memory_space<smem>>
    %c2_160 = arith.constant 2 : index
    %c2_161 = arith.constant 2 : index
    %106 = memref.load %arg1[%c2_160, %c2_161] : memref<3x64xf32, #tpu.memory_space<smem>>
    %c2_162 = arith.constant 2 : index
    %c3_163 = arith.constant 3 : index
    %107 = memref.load %arg1[%c2_162, %c3_163] : memref<3x64xf32, #tpu.memory_space<smem>>
    %c2_164 = arith.constant 2 : index
    %c4_165 = arith.constant 4 : index
    %108 = memref.load %arg1[%c2_164, %c4_165] : memref<3x64xf32, #tpu.memory_space<smem>>
    %c2_166 = arith.constant 2 : index
    %c5_167 = arith.constant 5 : index
    %109 = memref.load %arg1[%c2_166, %c5_167] : memref<3x64xf32, #tpu.memory_space<smem>>
    %c2_168 = arith.constant 2 : index
    %c6_169 = arith.constant 6 : index
    %110 = memref.load %arg1[%c2_168, %c6_169] : memref<3x64xf32, #tpu.memory_space<smem>>
    %c2_170 = arith.constant 2 : index
    %c7_171 = arith.constant 7 : index
    %111 = memref.load %arg1[%c2_170, %c7_171] : memref<3x64xf32, #tpu.memory_space<smem>>
    %c2_172 = arith.constant 2 : index
    %c8_173 = arith.constant 8 : index
    %112 = memref.load %arg1[%c2_172, %c8_173] : memref<3x64xf32, #tpu.memory_space<smem>>
    %c2_174 = arith.constant 2 : index
    %c9_175 = arith.constant 9 : index
    %113 = memref.load %arg1[%c2_174, %c9_175] : memref<3x64xf32, #tpu.memory_space<smem>>
    %c2_176 = arith.constant 2 : index
    %c10_177 = arith.constant 10 : index
    %114 = memref.load %arg1[%c2_176, %c10_177] : memref<3x64xf32, #tpu.memory_space<smem>>
    %c2_178 = arith.constant 2 : index
    %c11_179 = arith.constant 11 : index
    %115 = memref.load %arg1[%c2_178, %c11_179] : memref<3x64xf32, #tpu.memory_space<smem>>
    %c2_180 = arith.constant 2 : index
    %c12_181 = arith.constant 12 : index
    %116 = memref.load %arg1[%c2_180, %c12_181] : memref<3x64xf32, #tpu.memory_space<smem>>
    %c2_182 = arith.constant 2 : index
    %c16_183 = arith.constant 16 : index
    %117 = memref.load %arg1[%c2_182, %c16_183] : memref<3x64xf32, #tpu.memory_space<smem>>
    %c2_184 = arith.constant 2 : index
    %c17_185 = arith.constant 17 : index
    %118 = memref.load %arg1[%c2_184, %c17_185] : memref<3x64xf32, #tpu.memory_space<smem>>
    %c2_186 = arith.constant 2 : index
    %c18_187 = arith.constant 18 : index
    %119 = memref.load %arg1[%c2_186, %c18_187] : memref<3x64xf32, #tpu.memory_space<smem>>
    %c2_188 = arith.constant 2 : index
    %c19_189 = arith.constant 19 : index
    %120 = memref.load %arg1[%c2_188, %c19_189] : memref<3x64xf32, #tpu.memory_space<smem>>
    %c2_190 = arith.constant 2 : index
    %c20_191 = arith.constant 20 : index
    %121 = memref.load %arg1[%c2_190, %c20_191] : memref<3x64xf32, #tpu.memory_space<smem>>
    %c2_192 = arith.constant 2 : index
    %c21_193 = arith.constant 21 : index
    %122 = memref.load %arg1[%c2_192, %c21_193] : memref<3x64xf32, #tpu.memory_space<smem>>
    %c2_194 = arith.constant 2 : index
    %c22_195 = arith.constant 22 : index
    %123 = memref.load %arg1[%c2_194, %c22_195] : memref<3x64xf32, #tpu.memory_space<smem>>
    %c2_196 = arith.constant 2 : index
    %c23_197 = arith.constant 23 : index
    %124 = memref.load %arg1[%c2_196, %c23_197] : memref<3x64xf32, #tpu.memory_space<smem>>
    %c2_198 = arith.constant 2 : index
    %c24_199 = arith.constant 24 : index
    %125 = memref.load %arg1[%c2_198, %c24_199] : memref<3x64xf32, #tpu.memory_space<smem>>
    %c2_200 = arith.constant 2 : index
    %c25_201 = arith.constant 25 : index
    %126 = memref.load %arg1[%c2_200, %c25_201] : memref<3x64xf32, #tpu.memory_space<smem>>
    %c2_202 = arith.constant 2 : index
    %c26_203 = arith.constant 26 : index
    %127 = memref.load %arg1[%c2_202, %c26_203] : memref<3x64xf32, #tpu.memory_space<smem>>
    %c2_204 = arith.constant 2 : index
    %c27_205 = arith.constant 27 : index
    %128 = memref.load %arg1[%c2_204, %c27_205] : memref<3x64xf32, #tpu.memory_space<smem>>
    %c2_206 = arith.constant 2 : index
    %c28_207 = arith.constant 28 : index
    %129 = memref.load %arg1[%c2_206, %c28_207] : memref<3x64xf32, #tpu.memory_space<smem>>
    %c2_208 = arith.constant 2 : index
    %c32_209 = arith.constant 32 : index
    %130 = memref.load %arg1[%c2_208, %c32_209] : memref<3x64xf32, #tpu.memory_space<smem>>
    %c2_210 = arith.constant 2 : index
    %c33_211 = arith.constant 33 : index
    %131 = memref.load %arg1[%c2_210, %c33_211] : memref<3x64xf32, #tpu.memory_space<smem>>
    %c2_212 = arith.constant 2 : index
    %c34_213 = arith.constant 34 : index
    %132 = memref.load %arg1[%c2_212, %c34_213] : memref<3x64xf32, #tpu.memory_space<smem>>
    %c2_214 = arith.constant 2 : index
    %c35_215 = arith.constant 35 : index
    %133 = memref.load %arg1[%c2_214, %c35_215] : memref<3x64xf32, #tpu.memory_space<smem>>
    %c2_216 = arith.constant 2 : index
    %c36_217 = arith.constant 36 : index
    %134 = memref.load %arg1[%c2_216, %c36_217] : memref<3x64xf32, #tpu.memory_space<smem>>
    %c2_218 = arith.constant 2 : index
    %c37_219 = arith.constant 37 : index
    %135 = memref.load %arg1[%c2_218, %c37_219] : memref<3x64xf32, #tpu.memory_space<smem>>
    %c2_220 = arith.constant 2 : index
    %c38_221 = arith.constant 38 : index
    %136 = memref.load %arg1[%c2_220, %c38_221] : memref<3x64xf32, #tpu.memory_space<smem>>
    %c2_222 = arith.constant 2 : index
    %c39_223 = arith.constant 39 : index
    %137 = memref.load %arg1[%c2_222, %c39_223] : memref<3x64xf32, #tpu.memory_space<smem>>
    %c2_224 = arith.constant 2 : index
    %c40_225 = arith.constant 40 : index
    %138 = memref.load %arg1[%c2_224, %c40_225] : memref<3x64xf32, #tpu.memory_space<smem>>
    %c2_226 = arith.constant 2 : index
    %c41_227 = arith.constant 41 : index
    %139 = memref.load %arg1[%c2_226, %c41_227] : memref<3x64xf32, #tpu.memory_space<smem>>
    %c2_228 = arith.constant 2 : index
    %c42_229 = arith.constant 42 : index
    %140 = memref.load %arg1[%c2_228, %c42_229] : memref<3x64xf32, #tpu.memory_space<smem>>
    %c2_230 = arith.constant 2 : index
    %c43_231 = arith.constant 43 : index
    %141 = memref.load %arg1[%c2_230, %c43_231] : memref<3x64xf32, #tpu.memory_space<smem>>
    %c2_232 = arith.constant 2 : index
    %c44_233 = arith.constant 44 : index
    %142 = memref.load %arg1[%c2_232, %c44_233] : memref<3x64xf32, #tpu.memory_space<smem>>
    %c2_234 = arith.constant 2 : index
    %c48_235 = arith.constant 48 : index
    %143 = memref.load %arg1[%c2_234, %c48_235] : memref<3x64xf32, #tpu.memory_space<smem>>
    %c2_236 = arith.constant 2 : index
    %c49_237 = arith.constant 49 : index
    %144 = memref.load %arg1[%c2_236, %c49_237] : memref<3x64xf32, #tpu.memory_space<smem>>
    %c2_238 = arith.constant 2 : index
    %c50_239 = arith.constant 50 : index
    %145 = memref.load %arg1[%c2_238, %c50_239] : memref<3x64xf32, #tpu.memory_space<smem>>
    %c2_240 = arith.constant 2 : index
    %c51_241 = arith.constant 51 : index
    %146 = memref.load %arg1[%c2_240, %c51_241] : memref<3x64xf32, #tpu.memory_space<smem>>
    %c2_242 = arith.constant 2 : index
    %c52_243 = arith.constant 52 : index
    %147 = memref.load %arg1[%c2_242, %c52_243] : memref<3x64xf32, #tpu.memory_space<smem>>
    %c2_244 = arith.constant 2 : index
    %c53_245 = arith.constant 53 : index
    %148 = memref.load %arg1[%c2_244, %c53_245] : memref<3x64xf32, #tpu.memory_space<smem>>
    %c2_246 = arith.constant 2 : index
    %c54_247 = arith.constant 54 : index
    %149 = memref.load %arg1[%c2_246, %c54_247] : memref<3x64xf32, #tpu.memory_space<smem>>
    %c2_248 = arith.constant 2 : index
    %c55_249 = arith.constant 55 : index
    %150 = memref.load %arg1[%c2_248, %c55_249] : memref<3x64xf32, #tpu.memory_space<smem>>
    %c2_250 = arith.constant 2 : index
    %c56_251 = arith.constant 56 : index
    %151 = memref.load %arg1[%c2_250, %c56_251] : memref<3x64xf32, #tpu.memory_space<smem>>
    %c2_252 = arith.constant 2 : index
    %c57_253 = arith.constant 57 : index
    %152 = memref.load %arg1[%c2_252, %c57_253] : memref<3x64xf32, #tpu.memory_space<smem>>
    %c2_254 = arith.constant 2 : index
    %c58_255 = arith.constant 58 : index
    %153 = memref.load %arg1[%c2_254, %c58_255] : memref<3x64xf32, #tpu.memory_space<smem>>
    %c2_256 = arith.constant 2 : index
    %c59_257 = arith.constant 59 : index
    %154 = memref.load %arg1[%c2_256, %c59_257] : memref<3x64xf32, #tpu.memory_space<smem>>
    %c2_258 = arith.constant 2 : index
    %c60_259 = arith.constant 60 : index
    %155 = memref.load %arg1[%c2_258, %c60_259] : memref<3x64xf32, #tpu.memory_space<smem>>
    %c0_i32 = arith.constant 0 : i32
    %c2_i32 = arith.constant 2 : i32
    %156 = arith.addi %c0_i32, %c2_i32 : i32
    %c1_i32 = arith.constant 1 : i32
    scf.for %arg5 = %c0_i32 to %156 step %c1_i32  : i32 {
      %c8_i32 = arith.constant 8 : i32
      %157 = arith.muli %arg5, %c8_i32 : i32
      %158 = tpu.assume_multiple %157, 8 : i32
      %c0_261 = arith.constant 0 : index
      %159 = arith.index_cast %158 : i32 to index
      %c0_262 = arith.constant 0 : index
      %160 = vector.load %arg2[%c0_261, %159, %c0_262] : memref<3x16x128xf32, #tpu.memory_space<vmem>>, vector<1x8x128xf32>
      %161 = vector.shape_cast %160 : vector<1x8x128xf32> to vector<8x128xf32>
      %c1_263 = arith.constant 1 : index
      %162 = arith.index_cast %158 : i32 to index
      %c0_264 = arith.constant 0 : index
      %163 = vector.load %arg2[%c1_263, %162, %c0_264] : memref<3x16x128xf32, #tpu.memory_space<vmem>>, vector<1x8x128xf32>
      %164 = vector.shape_cast %163 : vector<1x8x128xf32> to vector<8x128xf32>
      %c2_265 = arith.constant 2 : index
      %165 = arith.index_cast %158 : i32 to index
      %c0_266 = arith.constant 0 : index
      %166 = vector.load %arg2[%c2_265, %165, %c0_266] : memref<3x16x128xf32, #tpu.memory_space<vmem>>, vector<1x8x128xf32>
      %167 = vector.shape_cast %166 : vector<1x8x128xf32> to vector<8x128xf32>
      %cst = arith.constant 0.000000e+00 : f32
      %168 = vector.broadcast %cst : f32 to vector<8x128xf32>
      %169 = vector.broadcast %0 : f32 to vector<8x128xf32>
      %170 = arith.mulf %161, %169 : vector<8x128xf32>
      %171 = vector.broadcast %1 : f32 to vector<8x128xf32>
      %172 = arith.mulf %164, %171 : vector<8x128xf32>
      %173 = arith.addf %170, %172 : vector<8x128xf32>
      %174 = vector.broadcast %2 : f32 to vector<8x128xf32>
      %175 = arith.mulf %167, %174 : vector<8x128xf32>
      %176 = arith.addf %173, %175 : vector<8x128xf32>
      %177 = vector.broadcast %3 : f32 to vector<8x128xf32>
      %178 = arith.subf %176, %177 : vector<8x128xf32>
      %179 = math.exp %178 : vector<8x128xf32>
      %180 = vector.broadcast %4 : f32 to vector<8x128xf32>
      %181 = arith.mulf %180, %179 : vector<8x128xf32>
      %182 = vector.broadcast %5 : f32 to vector<8x128xf32>
      %183 = arith.mulf %182, %179 : vector<8x128xf32>
      %184 = vector.broadcast %6 : f32 to vector<8x128xf32>
      %185 = arith.mulf %184, %179 : vector<8x128xf32>
      %186 = vector.broadcast %7 : f32 to vector<8x128xf32>
      %187 = arith.mulf %186, %179 : vector<8x128xf32>
      %188 = vector.broadcast %8 : f32 to vector<8x128xf32>
      %189 = arith.mulf %188, %179 : vector<8x128xf32>
      %190 = vector.broadcast %9 : f32 to vector<8x128xf32>
      %191 = arith.mulf %190, %179 : vector<8x128xf32>
      %192 = vector.broadcast %10 : f32 to vector<8x128xf32>
      %193 = arith.mulf %192, %179 : vector<8x128xf32>
      %194 = vector.broadcast %11 : f32 to vector<8x128xf32>
      %195 = arith.mulf %194, %179 : vector<8x128xf32>
      %196 = vector.broadcast %12 : f32 to vector<8x128xf32>
      %197 = arith.mulf %196, %179 : vector<8x128xf32>
      %198 = vector.broadcast %13 : f32 to vector<8x128xf32>
      %199 = arith.mulf %161, %198 : vector<8x128xf32>
      %200 = vector.broadcast %14 : f32 to vector<8x128xf32>
      %201 = arith.mulf %164, %200 : vector<8x128xf32>
      %202 = arith.addf %199, %201 : vector<8x128xf32>
      %203 = vector.broadcast %15 : f32 to vector<8x128xf32>
      %204 = arith.mulf %167, %203 : vector<8x128xf32>
      %205 = arith.addf %202, %204 : vector<8x128xf32>
      %206 = vector.broadcast %16 : f32 to vector<8x128xf32>
      %207 = arith.subf %205, %206 : vector<8x128xf32>
      %208 = math.exp %207 : vector<8x128xf32>
      %209 = vector.broadcast %17 : f32 to vector<8x128xf32>
      %210 = arith.mulf %209, %208 : vector<8x128xf32>
      %211 = vector.broadcast %18 : f32 to vector<8x128xf32>
      %212 = arith.mulf %211, %208 : vector<8x128xf32>
      %213 = vector.broadcast %19 : f32 to vector<8x128xf32>
      %214 = arith.mulf %213, %208 : vector<8x128xf32>
      %215 = vector.broadcast %20 : f32 to vector<8x128xf32>
      %216 = arith.mulf %215, %208 : vector<8x128xf32>
      %217 = vector.broadcast %21 : f32 to vector<8x128xf32>
      %218 = arith.mulf %217, %208 : vector<8x128xf32>
      %219 = vector.broadcast %22 : f32 to vector<8x128xf32>
      %220 = arith.mulf %219, %208 : vector<8x128xf32>
      %221 = vector.broadcast %23 : f32 to vector<8x128xf32>
      %222 = arith.mulf %221, %208 : vector<8x128xf32>
      %223 = vector.broadcast %24 : f32 to vector<8x128xf32>
      %224 = arith.mulf %223, %208 : vector<8x128xf32>
      %225 = vector.broadcast %25 : f32 to vector<8x128xf32>
      %226 = arith.mulf %225, %208 : vector<8x128xf32>
      %227 = arith.addf %181, %210 : vector<8x128xf32>
      %228 = arith.addf %183, %212 : vector<8x128xf32>
      %229 = arith.addf %185, %214 : vector<8x128xf32>
      %230 = arith.addf %187, %216 : vector<8x128xf32>
      %231 = arith.addf %189, %218 : vector<8x128xf32>
      %232 = arith.addf %191, %220 : vector<8x128xf32>
      %233 = arith.addf %193, %222 : vector<8x128xf32>
      %234 = arith.addf %195, %224 : vector<8x128xf32>
      %235 = arith.addf %197, %226 : vector<8x128xf32>
      %236 = vector.broadcast %26 : f32 to vector<8x128xf32>
      %237 = arith.mulf %161, %236 : vector<8x128xf32>
      %238 = vector.broadcast %27 : f32 to vector<8x128xf32>
      %239 = arith.mulf %164, %238 : vector<8x128xf32>
      %240 = arith.addf %237, %239 : vector<8x128xf32>
      %241 = vector.broadcast %28 : f32 to vector<8x128xf32>
      %242 = arith.mulf %167, %241 : vector<8x128xf32>
      %243 = arith.addf %240, %242 : vector<8x128xf32>
      %244 = vector.broadcast %29 : f32 to vector<8x128xf32>
      %245 = arith.subf %243, %244 : vector<8x128xf32>
      %246 = math.exp %245 : vector<8x128xf32>
      %247 = vector.broadcast %30 : f32 to vector<8x128xf32>
      %248 = arith.mulf %247, %246 : vector<8x128xf32>
      %249 = vector.broadcast %31 : f32 to vector<8x128xf32>
      %250 = arith.mulf %249, %246 : vector<8x128xf32>
      %251 = vector.broadcast %32 : f32 to vector<8x128xf32>
      %252 = arith.mulf %251, %246 : vector<8x128xf32>
      %253 = vector.broadcast %33 : f32 to vector<8x128xf32>
      %254 = arith.mulf %253, %246 : vector<8x128xf32>
      %255 = vector.broadcast %34 : f32 to vector<8x128xf32>
      %256 = arith.mulf %255, %246 : vector<8x128xf32>
      %257 = vector.broadcast %35 : f32 to vector<8x128xf32>
      %258 = arith.mulf %257, %246 : vector<8x128xf32>
      %259 = vector.broadcast %36 : f32 to vector<8x128xf32>
      %260 = arith.mulf %259, %246 : vector<8x128xf32>
      %261 = vector.broadcast %37 : f32 to vector<8x128xf32>
      %262 = arith.mulf %261, %246 : vector<8x128xf32>
      %263 = vector.broadcast %38 : f32 to vector<8x128xf32>
      %264 = arith.mulf %263, %246 : vector<8x128xf32>
      %265 = arith.addf %227, %248 : vector<8x128xf32>
      %266 = arith.addf %228, %250 : vector<8x128xf32>
      %267 = arith.addf %229, %252 : vector<8x128xf32>
      %268 = arith.addf %230, %254 : vector<8x128xf32>
      %269 = arith.addf %231, %256 : vector<8x128xf32>
      %270 = arith.addf %232, %258 : vector<8x128xf32>
      %271 = arith.addf %233, %260 : vector<8x128xf32>
      %272 = arith.addf %234, %262 : vector<8x128xf32>
      %273 = arith.addf %235, %264 : vector<8x128xf32>
      %274 = vector.broadcast %39 : f32 to vector<8x128xf32>
      %275 = arith.mulf %161, %274 : vector<8x128xf32>
      %276 = vector.broadcast %40 : f32 to vector<8x128xf32>
      %277 = arith.mulf %164, %276 : vector<8x128xf32>
      %278 = arith.addf %275, %277 : vector<8x128xf32>
      %279 = vector.broadcast %41 : f32 to vector<8x128xf32>
      %280 = arith.mulf %167, %279 : vector<8x128xf32>
      %281 = arith.addf %278, %280 : vector<8x128xf32>
      %282 = vector.broadcast %42 : f32 to vector<8x128xf32>
      %283 = arith.subf %281, %282 : vector<8x128xf32>
      %284 = math.exp %283 : vector<8x128xf32>
      %285 = vector.broadcast %43 : f32 to vector<8x128xf32>
      %286 = arith.mulf %285, %284 : vector<8x128xf32>
      %287 = vector.broadcast %44 : f32 to vector<8x128xf32>
      %288 = arith.mulf %287, %284 : vector<8x128xf32>
      %289 = vector.broadcast %45 : f32 to vector<8x128xf32>
      %290 = arith.mulf %289, %284 : vector<8x128xf32>
      %291 = vector.broadcast %46 : f32 to vector<8x128xf32>
      %292 = arith.mulf %291, %284 : vector<8x128xf32>
      %293 = vector.broadcast %47 : f32 to vector<8x128xf32>
      %294 = arith.mulf %293, %284 : vector<8x128xf32>
      %295 = vector.broadcast %48 : f32 to vector<8x128xf32>
      %296 = arith.mulf %295, %284 : vector<8x128xf32>
      %297 = vector.broadcast %49 : f32 to vector<8x128xf32>
      %298 = arith.mulf %297, %284 : vector<8x128xf32>
      %299 = vector.broadcast %50 : f32 to vector<8x128xf32>
      %300 = arith.mulf %299, %284 : vector<8x128xf32>
      %301 = vector.broadcast %51 : f32 to vector<8x128xf32>
      %302 = arith.mulf %301, %284 : vector<8x128xf32>
      %303 = arith.addf %265, %286 : vector<8x128xf32>
      %304 = arith.addf %266, %288 : vector<8x128xf32>
      %305 = arith.addf %267, %290 : vector<8x128xf32>
      %306 = arith.addf %268, %292 : vector<8x128xf32>
      %307 = arith.addf %269, %294 : vector<8x128xf32>
      %308 = arith.addf %270, %296 : vector<8x128xf32>
      %309 = arith.addf %271, %298 : vector<8x128xf32>
      %310 = arith.addf %272, %300 : vector<8x128xf32>
      %311 = arith.addf %273, %302 : vector<8x128xf32>
      %312 = arith.mulf %161, %303 : vector<8x128xf32>
      %313 = arith.mulf %164, %304 : vector<8x128xf32>
      %314 = arith.addf %312, %313 : vector<8x128xf32>
      %315 = arith.mulf %167, %305 : vector<8x128xf32>
      %316 = arith.addf %314, %315 : vector<8x128xf32>
      %317 = arith.mulf %161, %316 : vector<8x128xf32>
      %318 = arith.subf %303, %317 : vector<8x128xf32>
      %319 = arith.mulf %164, %316 : vector<8x128xf32>
      %320 = arith.subf %304, %319 : vector<8x128xf32>
      %321 = arith.mulf %167, %316 : vector<8x128xf32>
      %322 = arith.subf %305, %321 : vector<8x128xf32>
      %323 = arith.mulf %318, %318 : vector<8x128xf32>
      %324 = arith.mulf %320, %320 : vector<8x128xf32>
      %325 = arith.addf %323, %324 : vector<8x128xf32>
      %326 = arith.mulf %322, %322 : vector<8x128xf32>
      %327 = arith.addf %325, %326 : vector<8x128xf32>
      %cst_267 = arith.constant 1.000000e-30 : f32
      %328 = vector.broadcast %cst_267 : f32 to vector<8x128xf32>
      %329 = arith.maximumf %327, %328 : vector<8x128xf32>
      %330 = math.rsqrt %329 : vector<8x128xf32>
      %331 = arith.mulf %327, %330 : vector<8x128xf32>
      %332 = arith.mulf %318, %330 : vector<8x128xf32>
      %333 = arith.mulf %320, %330 : vector<8x128xf32>
      %334 = arith.mulf %322, %330 : vector<8x128xf32>
      %335 = math.cos %331 : vector<8x128xf32>
      %336 = math.sin %331 : vector<8x128xf32>
      %cst_268 = arith.constant 1.000000e-24 : f32
      %337 = vector.broadcast %cst_268 : f32 to vector<8x128xf32>
      %338 = arith.cmpf ogt, %327, %337 : vector<8x128xf32>
      %339 = arith.mulf %336, %330 : vector<8x128xf32>
      %cst_269 = arith.constant 1.000000e+00 : f32
      %340 = vector.broadcast %cst_269 : f32 to vector<8x128xf32>
      %341 = arith.select %338, %339, %340 : vector<8x128xi1>, vector<8x128xf32>
      %342 = arith.mulf %161, %335 : vector<8x128xf32>
      %343 = arith.mulf %332, %336 : vector<8x128xf32>
      %344 = arith.addf %342, %343 : vector<8x128xf32>
      %345 = arith.mulf %164, %335 : vector<8x128xf32>
      %346 = arith.mulf %333, %336 : vector<8x128xf32>
      %347 = arith.addf %345, %346 : vector<8x128xf32>
      %348 = arith.mulf %167, %335 : vector<8x128xf32>
      %349 = arith.mulf %334, %336 : vector<8x128xf32>
      %350 = arith.addf %348, %349 : vector<8x128xf32>
      %351 = arith.mulf %161, %306 : vector<8x128xf32>
      %352 = arith.mulf %164, %309 : vector<8x128xf32>
      %353 = arith.addf %351, %352 : vector<8x128xf32>
      %354 = arith.mulf %167, %310 : vector<8x128xf32>
      %355 = arith.addf %353, %354 : vector<8x128xf32>
      %356 = arith.addf %355, %303 : vector<8x128xf32>
      %357 = arith.mulf %161, %309 : vector<8x128xf32>
      %358 = arith.mulf %164, %307 : vector<8x128xf32>
      %359 = arith.addf %357, %358 : vector<8x128xf32>
      %360 = arith.mulf %167, %311 : vector<8x128xf32>
      %361 = arith.addf %359, %360 : vector<8x128xf32>
      %362 = arith.addf %361, %304 : vector<8x128xf32>
      %363 = arith.mulf %161, %310 : vector<8x128xf32>
      %364 = arith.mulf %164, %311 : vector<8x128xf32>
      %365 = arith.addf %363, %364 : vector<8x128xf32>
      %366 = arith.mulf %167, %308 : vector<8x128xf32>
      %367 = arith.addf %365, %366 : vector<8x128xf32>
      %368 = arith.addf %367, %305 : vector<8x128xf32>
      %369 = arith.mulf %161, %356 : vector<8x128xf32>
      %370 = arith.subf %306, %369 : vector<8x128xf32>
      %371 = arith.subf %370, %316 : vector<8x128xf32>
      %372 = arith.mulf %161, %362 : vector<8x128xf32>
      %373 = arith.subf %309, %372 : vector<8x128xf32>
      %374 = arith.mulf %161, %368 : vector<8x128xf32>
      %375 = arith.subf %310, %374 : vector<8x128xf32>
      %376 = arith.mulf %164, %356 : vector<8x128xf32>
      %377 = arith.subf %309, %376 : vector<8x128xf32>
      %378 = arith.mulf %164, %362 : vector<8x128xf32>
      %379 = arith.subf %307, %378 : vector<8x128xf32>
      %380 = arith.subf %379, %316 : vector<8x128xf32>
      %381 = arith.mulf %164, %368 : vector<8x128xf32>
      %382 = arith.subf %311, %381 : vector<8x128xf32>
      %383 = arith.mulf %167, %356 : vector<8x128xf32>
      %384 = arith.subf %310, %383 : vector<8x128xf32>
      %385 = arith.mulf %167, %362 : vector<8x128xf32>
      %386 = arith.subf %311, %385 : vector<8x128xf32>
      %387 = arith.mulf %167, %368 : vector<8x128xf32>
      %388 = arith.subf %308, %387 : vector<8x128xf32>
      %389 = arith.subf %388, %316 : vector<8x128xf32>
      %390 = arith.mulf %164, %334 : vector<8x128xf32>
      %391 = arith.mulf %167, %333 : vector<8x128xf32>
      %392 = arith.subf %390, %391 : vector<8x128xf32>
      %393 = arith.mulf %167, %332 : vector<8x128xf32>
      %394 = arith.mulf %161, %334 : vector<8x128xf32>
      %395 = arith.subf %393, %394 : vector<8x128xf32>
      %396 = arith.mulf %161, %333 : vector<8x128xf32>
      %397 = arith.mulf %164, %332 : vector<8x128xf32>
      %398 = arith.subf %396, %397 : vector<8x128xf32>
      %399 = arith.subf %335, %341 : vector<8x128xf32>
      %400 = arith.mulf %371, %332 : vector<8x128xf32>
      %401 = arith.mulf %373, %333 : vector<8x128xf32>
      %402 = arith.addf %400, %401 : vector<8x128xf32>
      %403 = arith.mulf %375, %334 : vector<8x128xf32>
      %404 = arith.addf %402, %403 : vector<8x128xf32>
      %405 = arith.mulf %377, %332 : vector<8x128xf32>
      %406 = arith.mulf %380, %333 : vector<8x128xf32>
      %407 = arith.addf %405, %406 : vector<8x128xf32>
      %408 = arith.mulf %382, %334 : vector<8x128xf32>
      %409 = arith.addf %407, %408 : vector<8x128xf32>
      %410 = arith.mulf %384, %332 : vector<8x128xf32>
      %411 = arith.mulf %386, %333 : vector<8x128xf32>
      %412 = arith.addf %410, %411 : vector<8x128xf32>
      %413 = arith.mulf %389, %334 : vector<8x128xf32>
      %414 = arith.addf %412, %413 : vector<8x128xf32>
      %415 = arith.mulf %332, %404 : vector<8x128xf32>
      %416 = arith.mulf %333, %409 : vector<8x128xf32>
      %417 = arith.addf %415, %416 : vector<8x128xf32>
      %418 = arith.mulf %334, %414 : vector<8x128xf32>
      %419 = arith.addf %417, %418 : vector<8x128xf32>
      %420 = arith.mulf %399, %419 : vector<8x128xf32>
      %421 = arith.mulf %336, %419 : vector<8x128xf32>
      %422 = arith.mulf %335, %332 : vector<8x128xf32>
      %423 = arith.mulf %341, %404 : vector<8x128xf32>
      %424 = arith.addf %422, %423 : vector<8x128xf32>
      %425 = arith.mulf %420, %332 : vector<8x128xf32>
      %426 = arith.addf %424, %425 : vector<8x128xf32>
      %427 = arith.mulf %421, %161 : vector<8x128xf32>
      %428 = arith.subf %426, %427 : vector<8x128xf32>
      %429 = arith.mulf %335, %333 : vector<8x128xf32>
      %430 = arith.mulf %341, %409 : vector<8x128xf32>
      %431 = arith.addf %429, %430 : vector<8x128xf32>
      %432 = arith.mulf %420, %333 : vector<8x128xf32>
      %433 = arith.addf %431, %432 : vector<8x128xf32>
      %434 = arith.mulf %421, %164 : vector<8x128xf32>
      %435 = arith.subf %433, %434 : vector<8x128xf32>
      %436 = arith.mulf %335, %334 : vector<8x128xf32>
      %437 = arith.mulf %341, %414 : vector<8x128xf32>
      %438 = arith.addf %436, %437 : vector<8x128xf32>
      %439 = arith.mulf %420, %334 : vector<8x128xf32>
      %440 = arith.addf %438, %439 : vector<8x128xf32>
      %441 = arith.mulf %421, %167 : vector<8x128xf32>
      %442 = arith.subf %440, %441 : vector<8x128xf32>
      %443 = arith.mulf %371, %392 : vector<8x128xf32>
      %444 = arith.mulf %373, %395 : vector<8x128xf32>
      %445 = arith.addf %443, %444 : vector<8x128xf32>
      %446 = arith.mulf %375, %398 : vector<8x128xf32>
      %447 = arith.addf %445, %446 : vector<8x128xf32>
      %448 = arith.mulf %377, %392 : vector<8x128xf32>
      %449 = arith.mulf %380, %395 : vector<8x128xf32>
      %450 = arith.addf %448, %449 : vector<8x128xf32>
      %451 = arith.mulf %382, %398 : vector<8x128xf32>
      %452 = arith.addf %450, %451 : vector<8x128xf32>
      %453 = arith.mulf %384, %392 : vector<8x128xf32>
      %454 = arith.mulf %386, %395 : vector<8x128xf32>
      %455 = arith.addf %453, %454 : vector<8x128xf32>
      %456 = arith.mulf %389, %398 : vector<8x128xf32>
      %457 = arith.addf %455, %456 : vector<8x128xf32>
      %458 = arith.mulf %332, %447 : vector<8x128xf32>
      %459 = arith.mulf %333, %452 : vector<8x128xf32>
      %460 = arith.addf %458, %459 : vector<8x128xf32>
      %461 = arith.mulf %334, %457 : vector<8x128xf32>
      %462 = arith.addf %460, %461 : vector<8x128xf32>
      %463 = arith.mulf %399, %462 : vector<8x128xf32>
      %464 = arith.mulf %336, %462 : vector<8x128xf32>
      %465 = arith.mulf %335, %392 : vector<8x128xf32>
      %466 = arith.mulf %341, %447 : vector<8x128xf32>
      %467 = arith.addf %465, %466 : vector<8x128xf32>
      %468 = arith.mulf %463, %332 : vector<8x128xf32>
      %469 = arith.addf %467, %468 : vector<8x128xf32>
      %470 = arith.mulf %464, %161 : vector<8x128xf32>
      %471 = arith.subf %469, %470 : vector<8x128xf32>
      %472 = arith.mulf %335, %395 : vector<8x128xf32>
      %473 = arith.mulf %341, %452 : vector<8x128xf32>
      %474 = arith.addf %472, %473 : vector<8x128xf32>
      %475 = arith.mulf %463, %333 : vector<8x128xf32>
      %476 = arith.addf %474, %475 : vector<8x128xf32>
      %477 = arith.mulf %464, %164 : vector<8x128xf32>
      %478 = arith.subf %476, %477 : vector<8x128xf32>
      %479 = arith.mulf %335, %398 : vector<8x128xf32>
      %480 = arith.mulf %341, %457 : vector<8x128xf32>
      %481 = arith.addf %479, %480 : vector<8x128xf32>
      %482 = arith.mulf %463, %334 : vector<8x128xf32>
      %483 = arith.addf %481, %482 : vector<8x128xf32>
      %484 = arith.mulf %464, %167 : vector<8x128xf32>
      %485 = arith.subf %483, %484 : vector<8x128xf32>
      %486 = arith.mulf %428, %428 : vector<8x128xf32>
      %487 = arith.mulf %435, %435 : vector<8x128xf32>
      %488 = arith.addf %486, %487 : vector<8x128xf32>
      %489 = arith.mulf %442, %442 : vector<8x128xf32>
      %490 = arith.addf %488, %489 : vector<8x128xf32>
      %491 = arith.mulf %428, %471 : vector<8x128xf32>
      %492 = arith.mulf %435, %478 : vector<8x128xf32>
      %493 = arith.addf %491, %492 : vector<8x128xf32>
      %494 = arith.mulf %442, %485 : vector<8x128xf32>
      %495 = arith.addf %493, %494 : vector<8x128xf32>
      %496 = arith.mulf %471, %471 : vector<8x128xf32>
      %497 = arith.mulf %478, %478 : vector<8x128xf32>
      %498 = arith.addf %496, %497 : vector<8x128xf32>
      %499 = arith.mulf %485, %485 : vector<8x128xf32>
      %500 = arith.addf %498, %499 : vector<8x128xf32>
      %501 = arith.mulf %490, %500 : vector<8x128xf32>
      %502 = arith.mulf %495, %495 : vector<8x128xf32>
      %503 = arith.subf %501, %502 : vector<8x128xf32>
      %504 = math.absf %503 : vector<8x128xf32>
      %505 = math.log %504 : vector<8x128xf32>
      %cst_270 = arith.constant 5.000000e-01 : f32
      %506 = vector.broadcast %cst_270 : f32 to vector<8x128xf32>
      %507 = arith.mulf %506, %505 : vector<8x128xf32>
      %508 = arith.addf %168, %507 : vector<8x128xf32>
      %509 = vector.broadcast %52 : f32 to vector<8x128xf32>
      %510 = arith.mulf %344, %509 : vector<8x128xf32>
      %511 = vector.broadcast %53 : f32 to vector<8x128xf32>
      %512 = arith.mulf %347, %511 : vector<8x128xf32>
      %513 = arith.addf %510, %512 : vector<8x128xf32>
      %514 = vector.broadcast %54 : f32 to vector<8x128xf32>
      %515 = arith.mulf %350, %514 : vector<8x128xf32>
      %516 = arith.addf %513, %515 : vector<8x128xf32>
      %517 = vector.broadcast %55 : f32 to vector<8x128xf32>
      %518 = arith.subf %516, %517 : vector<8x128xf32>
      %519 = math.exp %518 : vector<8x128xf32>
      %520 = vector.broadcast %56 : f32 to vector<8x128xf32>
      %521 = arith.mulf %520, %519 : vector<8x128xf32>
      %522 = vector.broadcast %57 : f32 to vector<8x128xf32>
      %523 = arith.mulf %522, %519 : vector<8x128xf32>
      %524 = vector.broadcast %58 : f32 to vector<8x128xf32>
      %525 = arith.mulf %524, %519 : vector<8x128xf32>
      %526 = vector.broadcast %59 : f32 to vector<8x128xf32>
      %527 = arith.mulf %526, %519 : vector<8x128xf32>
      %528 = vector.broadcast %60 : f32 to vector<8x128xf32>
      %529 = arith.mulf %528, %519 : vector<8x128xf32>
      %530 = vector.broadcast %61 : f32 to vector<8x128xf32>
      %531 = arith.mulf %530, %519 : vector<8x128xf32>
      %532 = vector.broadcast %62 : f32 to vector<8x128xf32>
      %533 = arith.mulf %532, %519 : vector<8x128xf32>
      %534 = vector.broadcast %63 : f32 to vector<8x128xf32>
      %535 = arith.mulf %534, %519 : vector<8x128xf32>
      %536 = vector.broadcast %64 : f32 to vector<8x128xf32>
      %537 = arith.mulf %536, %519 : vector<8x128xf32>
      %538 = vector.broadcast %65 : f32 to vector<8x128xf32>
      %539 = arith.mulf %344, %538 : vector<8x128xf32>
      %540 = vector.broadcast %66 : f32 to vector<8x128xf32>
      %541 = arith.mulf %347, %540 : vector<8x128xf32>
      %542 = arith.addf %539, %541 : vector<8x128xf32>
      %543 = vector.broadcast %67 : f32 to vector<8x128xf32>
      %544 = arith.mulf %350, %543 : vector<8x128xf32>
      %545 = arith.addf %542, %544 : vector<8x128xf32>
      %546 = vector.broadcast %68 : f32 to vector<8x128xf32>
      %547 = arith.subf %545, %546 : vector<8x128xf32>
      %548 = math.exp %547 : vector<8x128xf32>
      %549 = vector.broadcast %69 : f32 to vector<8x128xf32>
      %550 = arith.mulf %549, %548 : vector<8x128xf32>
      %551 = vector.broadcast %70 : f32 to vector<8x128xf32>
      %552 = arith.mulf %551, %548 : vector<8x128xf32>
      %553 = vector.broadcast %71 : f32 to vector<8x128xf32>
      %554 = arith.mulf %553, %548 : vector<8x128xf32>
      %555 = vector.broadcast %72 : f32 to vector<8x128xf32>
      %556 = arith.mulf %555, %548 : vector<8x128xf32>
      %557 = vector.broadcast %73 : f32 to vector<8x128xf32>
      %558 = arith.mulf %557, %548 : vector<8x128xf32>
      %559 = vector.broadcast %74 : f32 to vector<8x128xf32>
      %560 = arith.mulf %559, %548 : vector<8x128xf32>
      %561 = vector.broadcast %75 : f32 to vector<8x128xf32>
      %562 = arith.mulf %561, %548 : vector<8x128xf32>
      %563 = vector.broadcast %76 : f32 to vector<8x128xf32>
      %564 = arith.mulf %563, %548 : vector<8x128xf32>
      %565 = vector.broadcast %77 : f32 to vector<8x128xf32>
      %566 = arith.mulf %565, %548 : vector<8x128xf32>
      %567 = arith.addf %521, %550 : vector<8x128xf32>
      %568 = arith.addf %523, %552 : vector<8x128xf32>
      %569 = arith.addf %525, %554 : vector<8x128xf32>
      %570 = arith.addf %527, %556 : vector<8x128xf32>
      %571 = arith.addf %529, %558 : vector<8x128xf32>
      %572 = arith.addf %531, %560 : vector<8x128xf32>
      %573 = arith.addf %533, %562 : vector<8x128xf32>
      %574 = arith.addf %535, %564 : vector<8x128xf32>
      %575 = arith.addf %537, %566 : vector<8x128xf32>
      %576 = vector.broadcast %78 : f32 to vector<8x128xf32>
      %577 = arith.mulf %344, %576 : vector<8x128xf32>
      %578 = vector.broadcast %79 : f32 to vector<8x128xf32>
      %579 = arith.mulf %347, %578 : vector<8x128xf32>
      %580 = arith.addf %577, %579 : vector<8x128xf32>
      %581 = vector.broadcast %80 : f32 to vector<8x128xf32>
      %582 = arith.mulf %350, %581 : vector<8x128xf32>
      %583 = arith.addf %580, %582 : vector<8x128xf32>
      %584 = vector.broadcast %81 : f32 to vector<8x128xf32>
      %585 = arith.subf %583, %584 : vector<8x128xf32>
      %586 = math.exp %585 : vector<8x128xf32>
      %587 = vector.broadcast %82 : f32 to vector<8x128xf32>
      %588 = arith.mulf %587, %586 : vector<8x128xf32>
      %589 = vector.broadcast %83 : f32 to vector<8x128xf32>
      %590 = arith.mulf %589, %586 : vector<8x128xf32>
      %591 = vector.broadcast %84 : f32 to vector<8x128xf32>
      %592 = arith.mulf %591, %586 : vector<8x128xf32>
      %593 = vector.broadcast %85 : f32 to vector<8x128xf32>
      %594 = arith.mulf %593, %586 : vector<8x128xf32>
      %595 = vector.broadcast %86 : f32 to vector<8x128xf32>
      %596 = arith.mulf %595, %586 : vector<8x128xf32>
      %597 = vector.broadcast %87 : f32 to vector<8x128xf32>
      %598 = arith.mulf %597, %586 : vector<8x128xf32>
      %599 = vector.broadcast %88 : f32 to vector<8x128xf32>
      %600 = arith.mulf %599, %586 : vector<8x128xf32>
      %601 = vector.broadcast %89 : f32 to vector<8x128xf32>
      %602 = arith.mulf %601, %586 : vector<8x128xf32>
      %603 = vector.broadcast %90 : f32 to vector<8x128xf32>
      %604 = arith.mulf %603, %586 : vector<8x128xf32>
      %605 = arith.addf %567, %588 : vector<8x128xf32>
      %606 = arith.addf %568, %590 : vector<8x128xf32>
      %607 = arith.addf %569, %592 : vector<8x128xf32>
      %608 = arith.addf %570, %594 : vector<8x128xf32>
      %609 = arith.addf %571, %596 : vector<8x128xf32>
      %610 = arith.addf %572, %598 : vector<8x128xf32>
      %611 = arith.addf %573, %600 : vector<8x128xf32>
      %612 = arith.addf %574, %602 : vector<8x128xf32>
      %613 = arith.addf %575, %604 : vector<8x128xf32>
      %614 = vector.broadcast %91 : f32 to vector<8x128xf32>
      %615 = arith.mulf %344, %614 : vector<8x128xf32>
      %616 = vector.broadcast %92 : f32 to vector<8x128xf32>
      %617 = arith.mulf %347, %616 : vector<8x128xf32>
      %618 = arith.addf %615, %617 : vector<8x128xf32>
      %619 = vector.broadcast %93 : f32 to vector<8x128xf32>
      %620 = arith.mulf %350, %619 : vector<8x128xf32>
      %621 = arith.addf %618, %620 : vector<8x128xf32>
      %622 = vector.broadcast %94 : f32 to vector<8x128xf32>
      %623 = arith.subf %621, %622 : vector<8x128xf32>
      %624 = math.exp %623 : vector<8x128xf32>
      %625 = vector.broadcast %95 : f32 to vector<8x128xf32>
      %626 = arith.mulf %625, %624 : vector<8x128xf32>
      %627 = vector.broadcast %96 : f32 to vector<8x128xf32>
      %628 = arith.mulf %627, %624 : vector<8x128xf32>
      %629 = vector.broadcast %97 : f32 to vector<8x128xf32>
      %630 = arith.mulf %629, %624 : vector<8x128xf32>
      %631 = vector.broadcast %98 : f32 to vector<8x128xf32>
      %632 = arith.mulf %631, %624 : vector<8x128xf32>
      %633 = vector.broadcast %99 : f32 to vector<8x128xf32>
      %634 = arith.mulf %633, %624 : vector<8x128xf32>
      %635 = vector.broadcast %100 : f32 to vector<8x128xf32>
      %636 = arith.mulf %635, %624 : vector<8x128xf32>
      %637 = vector.broadcast %101 : f32 to vector<8x128xf32>
      %638 = arith.mulf %637, %624 : vector<8x128xf32>
      %639 = vector.broadcast %102 : f32 to vector<8x128xf32>
      %640 = arith.mulf %639, %624 : vector<8x128xf32>
      %641 = vector.broadcast %103 : f32 to vector<8x128xf32>
      %642 = arith.mulf %641, %624 : vector<8x128xf32>
      %643 = arith.addf %605, %626 : vector<8x128xf32>
      %644 = arith.addf %606, %628 : vector<8x128xf32>
      %645 = arith.addf %607, %630 : vector<8x128xf32>
      %646 = arith.addf %608, %632 : vector<8x128xf32>
      %647 = arith.addf %609, %634 : vector<8x128xf32>
      %648 = arith.addf %610, %636 : vector<8x128xf32>
      %649 = arith.addf %611, %638 : vector<8x128xf32>
      %650 = arith.addf %612, %640 : vector<8x128xf32>
      %651 = arith.addf %613, %642 : vector<8x128xf32>
      %652 = arith.mulf %344, %643 : vector<8x128xf32>
      %653 = arith.mulf %347, %644 : vector<8x128xf32>
      %654 = arith.addf %652, %653 : vector<8x128xf32>
      %655 = arith.mulf %350, %645 : vector<8x128xf32>
      %656 = arith.addf %654, %655 : vector<8x128xf32>
      %657 = arith.mulf %344, %656 : vector<8x128xf32>
      %658 = arith.subf %643, %657 : vector<8x128xf32>
      %659 = arith.mulf %347, %656 : vector<8x128xf32>
      %660 = arith.subf %644, %659 : vector<8x128xf32>
      %661 = arith.mulf %350, %656 : vector<8x128xf32>
      %662 = arith.subf %645, %661 : vector<8x128xf32>
      %663 = arith.mulf %658, %658 : vector<8x128xf32>
      %664 = arith.mulf %660, %660 : vector<8x128xf32>
      %665 = arith.addf %663, %664 : vector<8x128xf32>
      %666 = arith.mulf %662, %662 : vector<8x128xf32>
      %667 = arith.addf %665, %666 : vector<8x128xf32>
      %cst_271 = arith.constant 1.000000e-30 : f32
      %668 = vector.broadcast %cst_271 : f32 to vector<8x128xf32>
      %669 = arith.maximumf %667, %668 : vector<8x128xf32>
      %670 = math.rsqrt %669 : vector<8x128xf32>
      %671 = arith.mulf %667, %670 : vector<8x128xf32>
      %672 = arith.mulf %658, %670 : vector<8x128xf32>
      %673 = arith.mulf %660, %670 : vector<8x128xf32>
      %674 = arith.mulf %662, %670 : vector<8x128xf32>
      %675 = math.cos %671 : vector<8x128xf32>
      %676 = math.sin %671 : vector<8x128xf32>
      %cst_272 = arith.constant 1.000000e-24 : f32
      %677 = vector.broadcast %cst_272 : f32 to vector<8x128xf32>
      %678 = arith.cmpf ogt, %667, %677 : vector<8x128xf32>
      %679 = arith.mulf %676, %670 : vector<8x128xf32>
      %cst_273 = arith.constant 1.000000e+00 : f32
      %680 = vector.broadcast %cst_273 : f32 to vector<8x128xf32>
      %681 = arith.select %678, %679, %680 : vector<8x128xi1>, vector<8x128xf32>
      %682 = arith.mulf %344, %675 : vector<8x128xf32>
      %683 = arith.mulf %672, %676 : vector<8x128xf32>
      %684 = arith.addf %682, %683 : vector<8x128xf32>
      %685 = arith.mulf %347, %675 : vector<8x128xf32>
      %686 = arith.mulf %673, %676 : vector<8x128xf32>
      %687 = arith.addf %685, %686 : vector<8x128xf32>
      %688 = arith.mulf %350, %675 : vector<8x128xf32>
      %689 = arith.mulf %674, %676 : vector<8x128xf32>
      %690 = arith.addf %688, %689 : vector<8x128xf32>
      %691 = arith.mulf %344, %646 : vector<8x128xf32>
      %692 = arith.mulf %347, %649 : vector<8x128xf32>
      %693 = arith.addf %691, %692 : vector<8x128xf32>
      %694 = arith.mulf %350, %650 : vector<8x128xf32>
      %695 = arith.addf %693, %694 : vector<8x128xf32>
      %696 = arith.addf %695, %643 : vector<8x128xf32>
      %697 = arith.mulf %344, %649 : vector<8x128xf32>
      %698 = arith.mulf %347, %647 : vector<8x128xf32>
      %699 = arith.addf %697, %698 : vector<8x128xf32>
      %700 = arith.mulf %350, %651 : vector<8x128xf32>
      %701 = arith.addf %699, %700 : vector<8x128xf32>
      %702 = arith.addf %701, %644 : vector<8x128xf32>
      %703 = arith.mulf %344, %650 : vector<8x128xf32>
      %704 = arith.mulf %347, %651 : vector<8x128xf32>
      %705 = arith.addf %703, %704 : vector<8x128xf32>
      %706 = arith.mulf %350, %648 : vector<8x128xf32>
      %707 = arith.addf %705, %706 : vector<8x128xf32>
      %708 = arith.addf %707, %645 : vector<8x128xf32>
      %709 = arith.mulf %344, %696 : vector<8x128xf32>
      %710 = arith.subf %646, %709 : vector<8x128xf32>
      %711 = arith.subf %710, %656 : vector<8x128xf32>
      %712 = arith.mulf %344, %702 : vector<8x128xf32>
      %713 = arith.subf %649, %712 : vector<8x128xf32>
      %714 = arith.mulf %344, %708 : vector<8x128xf32>
      %715 = arith.subf %650, %714 : vector<8x128xf32>
      %716 = arith.mulf %347, %696 : vector<8x128xf32>
      %717 = arith.subf %649, %716 : vector<8x128xf32>
      %718 = arith.mulf %347, %702 : vector<8x128xf32>
      %719 = arith.subf %647, %718 : vector<8x128xf32>
      %720 = arith.subf %719, %656 : vector<8x128xf32>
      %721 = arith.mulf %347, %708 : vector<8x128xf32>
      %722 = arith.subf %651, %721 : vector<8x128xf32>
      %723 = arith.mulf %350, %696 : vector<8x128xf32>
      %724 = arith.subf %650, %723 : vector<8x128xf32>
      %725 = arith.mulf %350, %702 : vector<8x128xf32>
      %726 = arith.subf %651, %725 : vector<8x128xf32>
      %727 = arith.mulf %350, %708 : vector<8x128xf32>
      %728 = arith.subf %648, %727 : vector<8x128xf32>
      %729 = arith.subf %728, %656 : vector<8x128xf32>
      %730 = arith.mulf %347, %674 : vector<8x128xf32>
      %731 = arith.mulf %350, %673 : vector<8x128xf32>
      %732 = arith.subf %730, %731 : vector<8x128xf32>
      %733 = arith.mulf %350, %672 : vector<8x128xf32>
      %734 = arith.mulf %344, %674 : vector<8x128xf32>
      %735 = arith.subf %733, %734 : vector<8x128xf32>
      %736 = arith.mulf %344, %673 : vector<8x128xf32>
      %737 = arith.mulf %347, %672 : vector<8x128xf32>
      %738 = arith.subf %736, %737 : vector<8x128xf32>
      %739 = arith.subf %675, %681 : vector<8x128xf32>
      %740 = arith.mulf %711, %672 : vector<8x128xf32>
      %741 = arith.mulf %713, %673 : vector<8x128xf32>
      %742 = arith.addf %740, %741 : vector<8x128xf32>
      %743 = arith.mulf %715, %674 : vector<8x128xf32>
      %744 = arith.addf %742, %743 : vector<8x128xf32>
      %745 = arith.mulf %717, %672 : vector<8x128xf32>
      %746 = arith.mulf %720, %673 : vector<8x128xf32>
      %747 = arith.addf %745, %746 : vector<8x128xf32>
      %748 = arith.mulf %722, %674 : vector<8x128xf32>
      %749 = arith.addf %747, %748 : vector<8x128xf32>
      %750 = arith.mulf %724, %672 : vector<8x128xf32>
      %751 = arith.mulf %726, %673 : vector<8x128xf32>
      %752 = arith.addf %750, %751 : vector<8x128xf32>
      %753 = arith.mulf %729, %674 : vector<8x128xf32>
      %754 = arith.addf %752, %753 : vector<8x128xf32>
      %755 = arith.mulf %672, %744 : vector<8x128xf32>
      %756 = arith.mulf %673, %749 : vector<8x128xf32>
      %757 = arith.addf %755, %756 : vector<8x128xf32>
      %758 = arith.mulf %674, %754 : vector<8x128xf32>
      %759 = arith.addf %757, %758 : vector<8x128xf32>
      %760 = arith.mulf %739, %759 : vector<8x128xf32>
      %761 = arith.mulf %676, %759 : vector<8x128xf32>
      %762 = arith.mulf %675, %672 : vector<8x128xf32>
      %763 = arith.mulf %681, %744 : vector<8x128xf32>
      %764 = arith.addf %762, %763 : vector<8x128xf32>
      %765 = arith.mulf %760, %672 : vector<8x128xf32>
      %766 = arith.addf %764, %765 : vector<8x128xf32>
      %767 = arith.mulf %761, %344 : vector<8x128xf32>
      %768 = arith.subf %766, %767 : vector<8x128xf32>
      %769 = arith.mulf %675, %673 : vector<8x128xf32>
      %770 = arith.mulf %681, %749 : vector<8x128xf32>
      %771 = arith.addf %769, %770 : vector<8x128xf32>
      %772 = arith.mulf %760, %673 : vector<8x128xf32>
      %773 = arith.addf %771, %772 : vector<8x128xf32>
      %774 = arith.mulf %761, %347 : vector<8x128xf32>
      %775 = arith.subf %773, %774 : vector<8x128xf32>
      %776 = arith.mulf %675, %674 : vector<8x128xf32>
      %777 = arith.mulf %681, %754 : vector<8x128xf32>
      %778 = arith.addf %776, %777 : vector<8x128xf32>
      %779 = arith.mulf %760, %674 : vector<8x128xf32>
      %780 = arith.addf %778, %779 : vector<8x128xf32>
      %781 = arith.mulf %761, %350 : vector<8x128xf32>
      %782 = arith.subf %780, %781 : vector<8x128xf32>
      %783 = arith.mulf %711, %732 : vector<8x128xf32>
      %784 = arith.mulf %713, %735 : vector<8x128xf32>
      %785 = arith.addf %783, %784 : vector<8x128xf32>
      %786 = arith.mulf %715, %738 : vector<8x128xf32>
      %787 = arith.addf %785, %786 : vector<8x128xf32>
      %788 = arith.mulf %717, %732 : vector<8x128xf32>
      %789 = arith.mulf %720, %735 : vector<8x128xf32>
      %790 = arith.addf %788, %789 : vector<8x128xf32>
      %791 = arith.mulf %722, %738 : vector<8x128xf32>
      %792 = arith.addf %790, %791 : vector<8x128xf32>
      %793 = arith.mulf %724, %732 : vector<8x128xf32>
      %794 = arith.mulf %726, %735 : vector<8x128xf32>
      %795 = arith.addf %793, %794 : vector<8x128xf32>
      %796 = arith.mulf %729, %738 : vector<8x128xf32>
      %797 = arith.addf %795, %796 : vector<8x128xf32>
      %798 = arith.mulf %672, %787 : vector<8x128xf32>
      %799 = arith.mulf %673, %792 : vector<8x128xf32>
      %800 = arith.addf %798, %799 : vector<8x128xf32>
      %801 = arith.mulf %674, %797 : vector<8x128xf32>
      %802 = arith.addf %800, %801 : vector<8x128xf32>
      %803 = arith.mulf %739, %802 : vector<8x128xf32>
      %804 = arith.mulf %676, %802 : vector<8x128xf32>
      %805 = arith.mulf %675, %732 : vector<8x128xf32>
      %806 = arith.mulf %681, %787 : vector<8x128xf32>
      %807 = arith.addf %805, %806 : vector<8x128xf32>
      %808 = arith.mulf %803, %672 : vector<8x128xf32>
      %809 = arith.addf %807, %808 : vector<8x128xf32>
      %810 = arith.mulf %804, %344 : vector<8x128xf32>
      %811 = arith.subf %809, %810 : vector<8x128xf32>
      %812 = arith.mulf %675, %735 : vector<8x128xf32>
      %813 = arith.mulf %681, %792 : vector<8x128xf32>
      %814 = arith.addf %812, %813 : vector<8x128xf32>
      %815 = arith.mulf %803, %673 : vector<8x128xf32>
      %816 = arith.addf %814, %815 : vector<8x128xf32>
      %817 = arith.mulf %804, %347 : vector<8x128xf32>
      %818 = arith.subf %816, %817 : vector<8x128xf32>
      %819 = arith.mulf %675, %738 : vector<8x128xf32>
      %820 = arith.mulf %681, %797 : vector<8x128xf32>
      %821 = arith.addf %819, %820 : vector<8x128xf32>
      %822 = arith.mulf %803, %674 : vector<8x128xf32>
      %823 = arith.addf %821, %822 : vector<8x128xf32>
      %824 = arith.mulf %804, %350 : vector<8x128xf32>
      %825 = arith.subf %823, %824 : vector<8x128xf32>
      %826 = arith.mulf %768, %768 : vector<8x128xf32>
      %827 = arith.mulf %775, %775 : vector<8x128xf32>
      %828 = arith.addf %826, %827 : vector<8x128xf32>
      %829 = arith.mulf %782, %782 : vector<8x128xf32>
      %830 = arith.addf %828, %829 : vector<8x128xf32>
      %831 = arith.mulf %768, %811 : vector<8x128xf32>
      %832 = arith.mulf %775, %818 : vector<8x128xf32>
      %833 = arith.addf %831, %832 : vector<8x128xf32>
      %834 = arith.mulf %782, %825 : vector<8x128xf32>
      %835 = arith.addf %833, %834 : vector<8x128xf32>
      %836 = arith.mulf %811, %811 : vector<8x128xf32>
      %837 = arith.mulf %818, %818 : vector<8x128xf32>
      %838 = arith.addf %836, %837 : vector<8x128xf32>
      %839 = arith.mulf %825, %825 : vector<8x128xf32>
      %840 = arith.addf %838, %839 : vector<8x128xf32>
      %841 = arith.mulf %830, %840 : vector<8x128xf32>
      %842 = arith.mulf %835, %835 : vector<8x128xf32>
      %843 = arith.subf %841, %842 : vector<8x128xf32>
      %844 = math.absf %843 : vector<8x128xf32>
      %845 = math.log %844 : vector<8x128xf32>
      %cst_274 = arith.constant 5.000000e-01 : f32
      %846 = vector.broadcast %cst_274 : f32 to vector<8x128xf32>
      %847 = arith.mulf %846, %845 : vector<8x128xf32>
      %848 = arith.addf %508, %847 : vector<8x128xf32>
      %849 = vector.broadcast %104 : f32 to vector<8x128xf32>
      %850 = arith.mulf %684, %849 : vector<8x128xf32>
      %851 = vector.broadcast %105 : f32 to vector<8x128xf32>
      %852 = arith.mulf %687, %851 : vector<8x128xf32>
      %853 = arith.addf %850, %852 : vector<8x128xf32>
      %854 = vector.broadcast %106 : f32 to vector<8x128xf32>
      %855 = arith.mulf %690, %854 : vector<8x128xf32>
      %856 = arith.addf %853, %855 : vector<8x128xf32>
      %857 = vector.broadcast %107 : f32 to vector<8x128xf32>
      %858 = arith.subf %856, %857 : vector<8x128xf32>
      %859 = math.exp %858 : vector<8x128xf32>
      %860 = vector.broadcast %108 : f32 to vector<8x128xf32>
      %861 = arith.mulf %860, %859 : vector<8x128xf32>
      %862 = vector.broadcast %109 : f32 to vector<8x128xf32>
      %863 = arith.mulf %862, %859 : vector<8x128xf32>
      %864 = vector.broadcast %110 : f32 to vector<8x128xf32>
      %865 = arith.mulf %864, %859 : vector<8x128xf32>
      %866 = vector.broadcast %111 : f32 to vector<8x128xf32>
      %867 = arith.mulf %866, %859 : vector<8x128xf32>
      %868 = vector.broadcast %112 : f32 to vector<8x128xf32>
      %869 = arith.mulf %868, %859 : vector<8x128xf32>
      %870 = vector.broadcast %113 : f32 to vector<8x128xf32>
      %871 = arith.mulf %870, %859 : vector<8x128xf32>
      %872 = vector.broadcast %114 : f32 to vector<8x128xf32>
      %873 = arith.mulf %872, %859 : vector<8x128xf32>
      %874 = vector.broadcast %115 : f32 to vector<8x128xf32>
      %875 = arith.mulf %874, %859 : vector<8x128xf32>
      %876 = vector.broadcast %116 : f32 to vector<8x128xf32>
      %877 = arith.mulf %876, %859 : vector<8x128xf32>
      %878 = vector.broadcast %117 : f32 to vector<8x128xf32>
      %879 = arith.mulf %684, %878 : vector<8x128xf32>
      %880 = vector.broadcast %118 : f32 to vector<8x128xf32>
      %881 = arith.mulf %687, %880 : vector<8x128xf32>
      %882 = arith.addf %879, %881 : vector<8x128xf32>
      %883 = vector.broadcast %119 : f32 to vector<8x128xf32>
      %884 = arith.mulf %690, %883 : vector<8x128xf32>
      %885 = arith.addf %882, %884 : vector<8x128xf32>
      %886 = vector.broadcast %120 : f32 to vector<8x128xf32>
      %887 = arith.subf %885, %886 : vector<8x128xf32>
      %888 = math.exp %887 : vector<8x128xf32>
      %889 = vector.broadcast %121 : f32 to vector<8x128xf32>
      %890 = arith.mulf %889, %888 : vector<8x128xf32>
      %891 = vector.broadcast %122 : f32 to vector<8x128xf32>
      %892 = arith.mulf %891, %888 : vector<8x128xf32>
      %893 = vector.broadcast %123 : f32 to vector<8x128xf32>
      %894 = arith.mulf %893, %888 : vector<8x128xf32>
      %895 = vector.broadcast %124 : f32 to vector<8x128xf32>
      %896 = arith.mulf %895, %888 : vector<8x128xf32>
      %897 = vector.broadcast %125 : f32 to vector<8x128xf32>
      %898 = arith.mulf %897, %888 : vector<8x128xf32>
      %899 = vector.broadcast %126 : f32 to vector<8x128xf32>
      %900 = arith.mulf %899, %888 : vector<8x128xf32>
      %901 = vector.broadcast %127 : f32 to vector<8x128xf32>
      %902 = arith.mulf %901, %888 : vector<8x128xf32>
      %903 = vector.broadcast %128 : f32 to vector<8x128xf32>
      %904 = arith.mulf %903, %888 : vector<8x128xf32>
      %905 = vector.broadcast %129 : f32 to vector<8x128xf32>
      %906 = arith.mulf %905, %888 : vector<8x128xf32>
      %907 = arith.addf %861, %890 : vector<8x128xf32>
      %908 = arith.addf %863, %892 : vector<8x128xf32>
      %909 = arith.addf %865, %894 : vector<8x128xf32>
      %910 = arith.addf %867, %896 : vector<8x128xf32>
      %911 = arith.addf %869, %898 : vector<8x128xf32>
      %912 = arith.addf %871, %900 : vector<8x128xf32>
      %913 = arith.addf %873, %902 : vector<8x128xf32>
      %914 = arith.addf %875, %904 : vector<8x128xf32>
      %915 = arith.addf %877, %906 : vector<8x128xf32>
      %916 = vector.broadcast %130 : f32 to vector<8x128xf32>
      %917 = arith.mulf %684, %916 : vector<8x128xf32>
      %918 = vector.broadcast %131 : f32 to vector<8x128xf32>
      %919 = arith.mulf %687, %918 : vector<8x128xf32>
      %920 = arith.addf %917, %919 : vector<8x128xf32>
      %921 = vector.broadcast %132 : f32 to vector<8x128xf32>
      %922 = arith.mulf %690, %921 : vector<8x128xf32>
      %923 = arith.addf %920, %922 : vector<8x128xf32>
      %924 = vector.broadcast %133 : f32 to vector<8x128xf32>
      %925 = arith.subf %923, %924 : vector<8x128xf32>
      %926 = math.exp %925 : vector<8x128xf32>
      %927 = vector.broadcast %134 : f32 to vector<8x128xf32>
      %928 = arith.mulf %927, %926 : vector<8x128xf32>
      %929 = vector.broadcast %135 : f32 to vector<8x128xf32>
      %930 = arith.mulf %929, %926 : vector<8x128xf32>
      %931 = vector.broadcast %136 : f32 to vector<8x128xf32>
      %932 = arith.mulf %931, %926 : vector<8x128xf32>
      %933 = vector.broadcast %137 : f32 to vector<8x128xf32>
      %934 = arith.mulf %933, %926 : vector<8x128xf32>
      %935 = vector.broadcast %138 : f32 to vector<8x128xf32>
      %936 = arith.mulf %935, %926 : vector<8x128xf32>
      %937 = vector.broadcast %139 : f32 to vector<8x128xf32>
      %938 = arith.mulf %937, %926 : vector<8x128xf32>
      %939 = vector.broadcast %140 : f32 to vector<8x128xf32>
      %940 = arith.mulf %939, %926 : vector<8x128xf32>
      %941 = vector.broadcast %141 : f32 to vector<8x128xf32>
      %942 = arith.mulf %941, %926 : vector<8x128xf32>
      %943 = vector.broadcast %142 : f32 to vector<8x128xf32>
      %944 = arith.mulf %943, %926 : vector<8x128xf32>
      %945 = arith.addf %907, %928 : vector<8x128xf32>
      %946 = arith.addf %908, %930 : vector<8x128xf32>
      %947 = arith.addf %909, %932 : vector<8x128xf32>
      %948 = arith.addf %910, %934 : vector<8x128xf32>
      %949 = arith.addf %911, %936 : vector<8x128xf32>
      %950 = arith.addf %912, %938 : vector<8x128xf32>
      %951 = arith.addf %913, %940 : vector<8x128xf32>
      %952 = arith.addf %914, %942 : vector<8x128xf32>
      %953 = arith.addf %915, %944 : vector<8x128xf32>
      %954 = vector.broadcast %143 : f32 to vector<8x128xf32>
      %955 = arith.mulf %684, %954 : vector<8x128xf32>
      %956 = vector.broadcast %144 : f32 to vector<8x128xf32>
      %957 = arith.mulf %687, %956 : vector<8x128xf32>
      %958 = arith.addf %955, %957 : vector<8x128xf32>
      %959 = vector.broadcast %145 : f32 to vector<8x128xf32>
      %960 = arith.mulf %690, %959 : vector<8x128xf32>
      %961 = arith.addf %958, %960 : vector<8x128xf32>
      %962 = vector.broadcast %146 : f32 to vector<8x128xf32>
      %963 = arith.subf %961, %962 : vector<8x128xf32>
      %964 = math.exp %963 : vector<8x128xf32>
      %965 = vector.broadcast %147 : f32 to vector<8x128xf32>
      %966 = arith.mulf %965, %964 : vector<8x128xf32>
      %967 = vector.broadcast %148 : f32 to vector<8x128xf32>
      %968 = arith.mulf %967, %964 : vector<8x128xf32>
      %969 = vector.broadcast %149 : f32 to vector<8x128xf32>
      %970 = arith.mulf %969, %964 : vector<8x128xf32>
      %971 = vector.broadcast %150 : f32 to vector<8x128xf32>
      %972 = arith.mulf %971, %964 : vector<8x128xf32>
      %973 = vector.broadcast %151 : f32 to vector<8x128xf32>
      %974 = arith.mulf %973, %964 : vector<8x128xf32>
      %975 = vector.broadcast %152 : f32 to vector<8x128xf32>
      %976 = arith.mulf %975, %964 : vector<8x128xf32>
      %977 = vector.broadcast %153 : f32 to vector<8x128xf32>
      %978 = arith.mulf %977, %964 : vector<8x128xf32>
      %979 = vector.broadcast %154 : f32 to vector<8x128xf32>
      %980 = arith.mulf %979, %964 : vector<8x128xf32>
      %981 = vector.broadcast %155 : f32 to vector<8x128xf32>
      %982 = arith.mulf %981, %964 : vector<8x128xf32>
      %983 = arith.addf %945, %966 : vector<8x128xf32>
      %984 = arith.addf %946, %968 : vector<8x128xf32>
      %985 = arith.addf %947, %970 : vector<8x128xf32>
      %986 = arith.addf %948, %972 : vector<8x128xf32>
      %987 = arith.addf %949, %974 : vector<8x128xf32>
      %988 = arith.addf %950, %976 : vector<8x128xf32>
      %989 = arith.addf %951, %978 : vector<8x128xf32>
      %990 = arith.addf %952, %980 : vector<8x128xf32>
      %991 = arith.addf %953, %982 : vector<8x128xf32>
      %992 = arith.mulf %684, %983 : vector<8x128xf32>
      %993 = arith.mulf %687, %984 : vector<8x128xf32>
      %994 = arith.addf %992, %993 : vector<8x128xf32>
      %995 = arith.mulf %690, %985 : vector<8x128xf32>
      %996 = arith.addf %994, %995 : vector<8x128xf32>
      %997 = arith.mulf %684, %996 : vector<8x128xf32>
      %998 = arith.subf %983, %997 : vector<8x128xf32>
      %999 = arith.mulf %687, %996 : vector<8x128xf32>
      %1000 = arith.subf %984, %999 : vector<8x128xf32>
      %1001 = arith.mulf %690, %996 : vector<8x128xf32>
      %1002 = arith.subf %985, %1001 : vector<8x128xf32>
      %1003 = arith.mulf %998, %998 : vector<8x128xf32>
      %1004 = arith.mulf %1000, %1000 : vector<8x128xf32>
      %1005 = arith.addf %1003, %1004 : vector<8x128xf32>
      %1006 = arith.mulf %1002, %1002 : vector<8x128xf32>
      %1007 = arith.addf %1005, %1006 : vector<8x128xf32>
      %cst_275 = arith.constant 1.000000e-30 : f32
      %1008 = vector.broadcast %cst_275 : f32 to vector<8x128xf32>
      %1009 = arith.maximumf %1007, %1008 : vector<8x128xf32>
      %1010 = math.rsqrt %1009 : vector<8x128xf32>
      %1011 = arith.mulf %1007, %1010 : vector<8x128xf32>
      %1012 = arith.mulf %998, %1010 : vector<8x128xf32>
      %1013 = arith.mulf %1000, %1010 : vector<8x128xf32>
      %1014 = arith.mulf %1002, %1010 : vector<8x128xf32>
      %1015 = math.cos %1011 : vector<8x128xf32>
      %1016 = math.sin %1011 : vector<8x128xf32>
      %cst_276 = arith.constant 1.000000e-24 : f32
      %1017 = vector.broadcast %cst_276 : f32 to vector<8x128xf32>
      %1018 = arith.cmpf ogt, %1007, %1017 : vector<8x128xf32>
      %1019 = arith.mulf %1016, %1010 : vector<8x128xf32>
      %cst_277 = arith.constant 1.000000e+00 : f32
      %1020 = vector.broadcast %cst_277 : f32 to vector<8x128xf32>
      %1021 = arith.select %1018, %1019, %1020 : vector<8x128xi1>, vector<8x128xf32>
      %1022 = arith.mulf %684, %1015 : vector<8x128xf32>
      %1023 = arith.mulf %1012, %1016 : vector<8x128xf32>
      %1024 = arith.addf %1022, %1023 : vector<8x128xf32>
      %1025 = arith.mulf %687, %1015 : vector<8x128xf32>
      %1026 = arith.mulf %1013, %1016 : vector<8x128xf32>
      %1027 = arith.addf %1025, %1026 : vector<8x128xf32>
      %1028 = arith.mulf %690, %1015 : vector<8x128xf32>
      %1029 = arith.mulf %1014, %1016 : vector<8x128xf32>
      %1030 = arith.addf %1028, %1029 : vector<8x128xf32>
      %1031 = arith.mulf %684, %986 : vector<8x128xf32>
      %1032 = arith.mulf %687, %989 : vector<8x128xf32>
      %1033 = arith.addf %1031, %1032 : vector<8x128xf32>
      %1034 = arith.mulf %690, %990 : vector<8x128xf32>
      %1035 = arith.addf %1033, %1034 : vector<8x128xf32>
      %1036 = arith.addf %1035, %983 : vector<8x128xf32>
      %1037 = arith.mulf %684, %989 : vector<8x128xf32>
      %1038 = arith.mulf %687, %987 : vector<8x128xf32>
      %1039 = arith.addf %1037, %1038 : vector<8x128xf32>
      %1040 = arith.mulf %690, %991 : vector<8x128xf32>
      %1041 = arith.addf %1039, %1040 : vector<8x128xf32>
      %1042 = arith.addf %1041, %984 : vector<8x128xf32>
      %1043 = arith.mulf %684, %990 : vector<8x128xf32>
      %1044 = arith.mulf %687, %991 : vector<8x128xf32>
      %1045 = arith.addf %1043, %1044 : vector<8x128xf32>
      %1046 = arith.mulf %690, %988 : vector<8x128xf32>
      %1047 = arith.addf %1045, %1046 : vector<8x128xf32>
      %1048 = arith.addf %1047, %985 : vector<8x128xf32>
      %1049 = arith.mulf %684, %1036 : vector<8x128xf32>
      %1050 = arith.subf %986, %1049 : vector<8x128xf32>
      %1051 = arith.subf %1050, %996 : vector<8x128xf32>
      %1052 = arith.mulf %684, %1042 : vector<8x128xf32>
      %1053 = arith.subf %989, %1052 : vector<8x128xf32>
      %1054 = arith.mulf %684, %1048 : vector<8x128xf32>
      %1055 = arith.subf %990, %1054 : vector<8x128xf32>
      %1056 = arith.mulf %687, %1036 : vector<8x128xf32>
      %1057 = arith.subf %989, %1056 : vector<8x128xf32>
      %1058 = arith.mulf %687, %1042 : vector<8x128xf32>
      %1059 = arith.subf %987, %1058 : vector<8x128xf32>
      %1060 = arith.subf %1059, %996 : vector<8x128xf32>
      %1061 = arith.mulf %687, %1048 : vector<8x128xf32>
      %1062 = arith.subf %991, %1061 : vector<8x128xf32>
      %1063 = arith.mulf %690, %1036 : vector<8x128xf32>
      %1064 = arith.subf %990, %1063 : vector<8x128xf32>
      %1065 = arith.mulf %690, %1042 : vector<8x128xf32>
      %1066 = arith.subf %991, %1065 : vector<8x128xf32>
      %1067 = arith.mulf %690, %1048 : vector<8x128xf32>
      %1068 = arith.subf %988, %1067 : vector<8x128xf32>
      %1069 = arith.subf %1068, %996 : vector<8x128xf32>
      %1070 = arith.mulf %687, %1014 : vector<8x128xf32>
      %1071 = arith.mulf %690, %1013 : vector<8x128xf32>
      %1072 = arith.subf %1070, %1071 : vector<8x128xf32>
      %1073 = arith.mulf %690, %1012 : vector<8x128xf32>
      %1074 = arith.mulf %684, %1014 : vector<8x128xf32>
      %1075 = arith.subf %1073, %1074 : vector<8x128xf32>
      %1076 = arith.mulf %684, %1013 : vector<8x128xf32>
      %1077 = arith.mulf %687, %1012 : vector<8x128xf32>
      %1078 = arith.subf %1076, %1077 : vector<8x128xf32>
      %1079 = arith.subf %1015, %1021 : vector<8x128xf32>
      %1080 = arith.mulf %1051, %1012 : vector<8x128xf32>
      %1081 = arith.mulf %1053, %1013 : vector<8x128xf32>
      %1082 = arith.addf %1080, %1081 : vector<8x128xf32>
      %1083 = arith.mulf %1055, %1014 : vector<8x128xf32>
      %1084 = arith.addf %1082, %1083 : vector<8x128xf32>
      %1085 = arith.mulf %1057, %1012 : vector<8x128xf32>
      %1086 = arith.mulf %1060, %1013 : vector<8x128xf32>
      %1087 = arith.addf %1085, %1086 : vector<8x128xf32>
      %1088 = arith.mulf %1062, %1014 : vector<8x128xf32>
      %1089 = arith.addf %1087, %1088 : vector<8x128xf32>
      %1090 = arith.mulf %1064, %1012 : vector<8x128xf32>
      %1091 = arith.mulf %1066, %1013 : vector<8x128xf32>
      %1092 = arith.addf %1090, %1091 : vector<8x128xf32>
      %1093 = arith.mulf %1069, %1014 : vector<8x128xf32>
      %1094 = arith.addf %1092, %1093 : vector<8x128xf32>
      %1095 = arith.mulf %1012, %1084 : vector<8x128xf32>
      %1096 = arith.mulf %1013, %1089 : vector<8x128xf32>
      %1097 = arith.addf %1095, %1096 : vector<8x128xf32>
      %1098 = arith.mulf %1014, %1094 : vector<8x128xf32>
      %1099 = arith.addf %1097, %1098 : vector<8x128xf32>
      %1100 = arith.mulf %1079, %1099 : vector<8x128xf32>
      %1101 = arith.mulf %1016, %1099 : vector<8x128xf32>
      %1102 = arith.mulf %1015, %1012 : vector<8x128xf32>
      %1103 = arith.mulf %1021, %1084 : vector<8x128xf32>
      %1104 = arith.addf %1102, %1103 : vector<8x128xf32>
      %1105 = arith.mulf %1100, %1012 : vector<8x128xf32>
      %1106 = arith.addf %1104, %1105 : vector<8x128xf32>
      %1107 = arith.mulf %1101, %684 : vector<8x128xf32>
      %1108 = arith.subf %1106, %1107 : vector<8x128xf32>
      %1109 = arith.mulf %1015, %1013 : vector<8x128xf32>
      %1110 = arith.mulf %1021, %1089 : vector<8x128xf32>
      %1111 = arith.addf %1109, %1110 : vector<8x128xf32>
      %1112 = arith.mulf %1100, %1013 : vector<8x128xf32>
      %1113 = arith.addf %1111, %1112 : vector<8x128xf32>
      %1114 = arith.mulf %1101, %687 : vector<8x128xf32>
      %1115 = arith.subf %1113, %1114 : vector<8x128xf32>
      %1116 = arith.mulf %1015, %1014 : vector<8x128xf32>
      %1117 = arith.mulf %1021, %1094 : vector<8x128xf32>
      %1118 = arith.addf %1116, %1117 : vector<8x128xf32>
      %1119 = arith.mulf %1100, %1014 : vector<8x128xf32>
      %1120 = arith.addf %1118, %1119 : vector<8x128xf32>
      %1121 = arith.mulf %1101, %690 : vector<8x128xf32>
      %1122 = arith.subf %1120, %1121 : vector<8x128xf32>
      %1123 = arith.mulf %1051, %1072 : vector<8x128xf32>
      %1124 = arith.mulf %1053, %1075 : vector<8x128xf32>
      %1125 = arith.addf %1123, %1124 : vector<8x128xf32>
      %1126 = arith.mulf %1055, %1078 : vector<8x128xf32>
      %1127 = arith.addf %1125, %1126 : vector<8x128xf32>
      %1128 = arith.mulf %1057, %1072 : vector<8x128xf32>
      %1129 = arith.mulf %1060, %1075 : vector<8x128xf32>
      %1130 = arith.addf %1128, %1129 : vector<8x128xf32>
      %1131 = arith.mulf %1062, %1078 : vector<8x128xf32>
      %1132 = arith.addf %1130, %1131 : vector<8x128xf32>
      %1133 = arith.mulf %1064, %1072 : vector<8x128xf32>
      %1134 = arith.mulf %1066, %1075 : vector<8x128xf32>
      %1135 = arith.addf %1133, %1134 : vector<8x128xf32>
      %1136 = arith.mulf %1069, %1078 : vector<8x128xf32>
      %1137 = arith.addf %1135, %1136 : vector<8x128xf32>
      %1138 = arith.mulf %1012, %1127 : vector<8x128xf32>
      %1139 = arith.mulf %1013, %1132 : vector<8x128xf32>
      %1140 = arith.addf %1138, %1139 : vector<8x128xf32>
      %1141 = arith.mulf %1014, %1137 : vector<8x128xf32>
      %1142 = arith.addf %1140, %1141 : vector<8x128xf32>
      %1143 = arith.mulf %1079, %1142 : vector<8x128xf32>
      %1144 = arith.mulf %1016, %1142 : vector<8x128xf32>
      %1145 = arith.mulf %1015, %1072 : vector<8x128xf32>
      %1146 = arith.mulf %1021, %1127 : vector<8x128xf32>
      %1147 = arith.addf %1145, %1146 : vector<8x128xf32>
      %1148 = arith.mulf %1143, %1012 : vector<8x128xf32>
      %1149 = arith.addf %1147, %1148 : vector<8x128xf32>
      %1150 = arith.mulf %1144, %684 : vector<8x128xf32>
      %1151 = arith.subf %1149, %1150 : vector<8x128xf32>
      %1152 = arith.mulf %1015, %1075 : vector<8x128xf32>
      %1153 = arith.mulf %1021, %1132 : vector<8x128xf32>
      %1154 = arith.addf %1152, %1153 : vector<8x128xf32>
      %1155 = arith.mulf %1143, %1013 : vector<8x128xf32>
      %1156 = arith.addf %1154, %1155 : vector<8x128xf32>
      %1157 = arith.mulf %1144, %687 : vector<8x128xf32>
      %1158 = arith.subf %1156, %1157 : vector<8x128xf32>
      %1159 = arith.mulf %1015, %1078 : vector<8x128xf32>
      %1160 = arith.mulf %1021, %1137 : vector<8x128xf32>
      %1161 = arith.addf %1159, %1160 : vector<8x128xf32>
      %1162 = arith.mulf %1143, %1014 : vector<8x128xf32>
      %1163 = arith.addf %1161, %1162 : vector<8x128xf32>
      %1164 = arith.mulf %1144, %690 : vector<8x128xf32>
      %1165 = arith.subf %1163, %1164 : vector<8x128xf32>
      %1166 = arith.mulf %1108, %1108 : vector<8x128xf32>
      %1167 = arith.mulf %1115, %1115 : vector<8x128xf32>
      %1168 = arith.addf %1166, %1167 : vector<8x128xf32>
      %1169 = arith.mulf %1122, %1122 : vector<8x128xf32>
      %1170 = arith.addf %1168, %1169 : vector<8x128xf32>
      %1171 = arith.mulf %1108, %1151 : vector<8x128xf32>
      %1172 = arith.mulf %1115, %1158 : vector<8x128xf32>
      %1173 = arith.addf %1171, %1172 : vector<8x128xf32>
      %1174 = arith.mulf %1122, %1165 : vector<8x128xf32>
      %1175 = arith.addf %1173, %1174 : vector<8x128xf32>
      %1176 = arith.mulf %1151, %1151 : vector<8x128xf32>
      %1177 = arith.mulf %1158, %1158 : vector<8x128xf32>
      %1178 = arith.addf %1176, %1177 : vector<8x128xf32>
      %1179 = arith.mulf %1165, %1165 : vector<8x128xf32>
      %1180 = arith.addf %1178, %1179 : vector<8x128xf32>
      %1181 = arith.mulf %1170, %1180 : vector<8x128xf32>
      %1182 = arith.mulf %1175, %1175 : vector<8x128xf32>
      %1183 = arith.subf %1181, %1182 : vector<8x128xf32>
      %1184 = math.absf %1183 : vector<8x128xf32>
      %1185 = math.log %1184 : vector<8x128xf32>
      %cst_278 = arith.constant 5.000000e-01 : f32
      %1186 = vector.broadcast %cst_278 : f32 to vector<8x128xf32>
      %1187 = arith.mulf %1186, %1185 : vector<8x128xf32>
      %1188 = arith.addf %848, %1187 : vector<8x128xf32>
      %c0_279 = arith.constant 0 : index
      %1189 = arith.index_cast %158 : i32 to index
      %c0_280 = arith.constant 0 : index
      %1190 = vector.load %arg3[%c0_279, %1189, %c0_280] : memref<3x16x128xf32, #tpu.memory_space<vmem>>, vector<1x8x128xf32>
      %1191 = vector.shape_cast %1190 : vector<1x8x128xf32> to vector<8x128xf32>
      %1192 = vector.shape_cast %1024 : vector<8x128xf32> to vector<1x8x128xf32>
      tpu.vector_store %arg3[%c0_279, %1189, %c0_280], %1192 {strides = array<i32>} : memref<3x16x128xf32, #tpu.memory_space<vmem>>, vector<1x8x128xf32>,
      %c1_281 = arith.constant 1 : index
      %1193 = arith.index_cast %158 : i32 to index
      %c0_282 = arith.constant 0 : index
      %1194 = vector.load %arg3[%c1_281, %1193, %c0_282] : memref<3x16x128xf32, #tpu.memory_space<vmem>>, vector<1x8x128xf32>
      %1195 = vector.shape_cast %1194 : vector<1x8x128xf32> to vector<8x128xf32>
      %1196 = vector.shape_cast %1027 : vector<8x128xf32> to vector<1x8x128xf32>
      tpu.vector_store %arg3[%c1_281, %1193, %c0_282], %1196 {strides = array<i32>} : memref<3x16x128xf32, #tpu.memory_space<vmem>>, vector<1x8x128xf32>,
      %c2_283 = arith.constant 2 : index
      %1197 = arith.index_cast %158 : i32 to index
      %c0_284 = arith.constant 0 : index
      %1198 = vector.load %arg3[%c2_283, %1197, %c0_284] : memref<3x16x128xf32, #tpu.memory_space<vmem>>, vector<1x8x128xf32>
      %1199 = vector.shape_cast %1198 : vector<1x8x128xf32> to vector<8x128xf32>
      %1200 = vector.shape_cast %1030 : vector<8x128xf32> to vector<1x8x128xf32>
      tpu.vector_store %arg3[%c2_283, %1197, %c0_284], %1200 {strides = array<i32>} : memref<3x16x128xf32, #tpu.memory_space<vmem>>, vector<1x8x128xf32>,
      %1201 = arith.index_cast %158 : i32 to index
      %c0_285 = arith.constant 0 : index
      %1202 = vector.load %arg4[%1201, %c0_285] : memref<16x128xf32, #tpu.memory_space<vmem>>, vector<8x128xf32>
      tpu.vector_store %arg4[%1201, %c0_285], %1188 {strides = array<i32>} : memref<16x128xf32, #tpu.memory_space<vmem>>, vector<8x128xf32>,
    }
    %c2_i32_260 = arith.constant 2 : i32
    return
  }
  func.func @transform_0(%arg0: i32, %arg1: memref<3x64xf32, #tpu.memory_space<smem>>) -> (i32, i32, i32) {
    %c0_i32 = arith.constant 0 : i32
    %c0_i32_0 = arith.constant 0 : i32
    %c0_i32_1 = arith.constant 0 : i32
    return %c0_i32, %arg0, %c0_i32_0 : i32, i32, i32
  }
  func.func @transform_1(%arg0: i32, %arg1: memref<3x64xf32, #tpu.memory_space<smem>>) -> (i32, i32, i32) {
    %c0_i32 = arith.constant 0 : i32
    %c0_i32_0 = arith.constant 0 : i32
    %c0_i32_1 = arith.constant 0 : i32
    return %c0_i32, %arg0, %c0_i32_0 : i32, i32, i32
  }
  func.func @transform_2(%arg0: i32, %arg1: memref<3x64xf32, #tpu.memory_space<smem>>) -> (i32, i32) {
    %c0_i32 = arith.constant 0 : i32
    %c0_i32_0 = arith.constant 0 : i32
    return %arg0, %c0_i32 : i32, i32
  }
}

</mosaic_0001>

<bundles_post_ra>
// kernel: emsre_forward.1
= control target key start
LH: loop header
LB: loop body
LE: loop exit
PB: predicated region body
PF: predicated region fallthrough
CT: control target
= control target key end

     0   :  { %s3884_s0 = inlined_call_operand.vmem [shape: f32[3,64], index: 0, kind: input, shape index: {}]   ;;  %s3885_s1 = inlined_call_operand.vmem [shape: f32[3,32,128], index: 1, kind: input, shape index: {}]   ;;  %s3886_s2 = inlined_call_operand.vmem [shape: f32[3,32,128], index: 2, kind: output, shape index: {0}]   ;;  %s3887_s3 = inlined_call_operand.vmem [shape: f32[32,128], index: 3, kind: output, shape index: {1}]  }
   0x1   :  { %3971 = sst [smem:[#allocation166_spill]] %s3885_s1  ;;  %s9_s14 = sshll.u32 %s3884_s0, 4  ;;  %s10_s14 = int_to_ptr.vmem [resolvable:$true] %s9_s14 }
   0x2   :  { %3972 = sst [smem:[#allocation167_spill]] %s3886_s2  ;;  %s2514_s15 = scalar_lea.vmem %s10_s14, 64 }
   0x3   :  { %3973 = sst [smem:[#allocation168_spill]] %s3887_s3  ;;  %p2515_p0 = scmp.ne.s32.totalorder %s10_s14, %s2514_s15 }
   0x4   :  { %p2519_p1 = scmp.lt.s32.totalorder %s10_s14, %s10_s14  ;;  %p2520_p2 = scmp.lt.s32.totalorder %s2514_s15, %s2514_s15 }
   0x6   :  { %p2521_p3 = por %p2520_p2, %p2519_p1 }
   0x8   :  { %p2522_p4 = pnand %p2521_p3, %p2515_p0 }
   0xa   :  { %2525 = shalt.err (!%p2522_p4)  }
   0xb   :  { %s2560_s16 = smov [#allocation3]  }
   0xc   :  { %12 = dma.vmem_to_smem %s10_s14, 64, %s2560_s16, [#allocation2] }
   0xd   :  { %2542 = dma.done.wait [#allocation2], 64 }
   0xe   :  { %2543 = vsyncadd [#allocation2], 4294967232 }
   0xf   :  { %14 = sfence }
  0x10   :  { %s2590_s17 = smov 0   ;;  %s2592_s18 = smov 0  }
  0x11   :  { %s2594_s19 = smov 0  }
  0x12 LB: > { %3974 = sst [smem:[#allocation7_spill]] %s2550_s18  ;;  %s2606_s0 = sadd.s32 4294967295, %s2554_s19   ;;  %s2554_s19 = sphi %s2594_s19, %s4305_s19   ;;  %s2550_s18 = sphi %s2592_s18, %s4307_s18   ;;  %s2546_s17 = sphi %s2590_s17, %s4306_s17  }
  0x13   : > { %3975 = sst [smem:[#allocation8_spill]] %s2606_s0  ;;  %s2609_s20 = sadd.s32 1, %s2554_s19  }
  0x14   : > { %3976 = sst [smem:[#allocation9_spill]] %s2609_s20  ;;  %s24_s21 = ssub.s32 %s2554_s19, %s2609_s20 }
  0x15   : > { %s27_s22 = sadd.s32 1, %s2550_s18  ;;  %p25_p5 = scmp.eq.s32.totalorder %s24_s21, 0 }
  0x16   : > { %p34_p6 = scmp.ne.s32.totalorder %s2550_s18, %s2546_s17  ;;  %p35_p7 = scmp.eq.s32.totalorder %s2554_s19, 0 }
  0x17   : > { %p64_p8 = scmp.eq.s32.totalorder %s2606_s0, 1  ;;  %p2213_p11 = scmp.ge.s32.totalorder %s2554_s19, 2 }
  0x18   : > { %s2619_s23 = scalar_select %p25_p5, %s2550_s18, %s27_s22  }
  0x19   : > { %p36_p9 = por %p35_p7, %p34_p6  ;;  %p2621_p10 = por %p64_p8, %p34_p6 }
  0x1a   : > { %3977 = sst [smem:[#allocation10_spill]] %s2619_s23  ;;  %112 = sbr.rel (%p2213_p11) target bundleno = 44 (0x2c), region = 16 }
  0x1b   : > { %s3978_s24 = scalar_select %p2621_p10, 1, 0 }
  0x1d   : > { %3979 = sst [smem:[#allocation11_spill]] %s3978_s24 }
  0x1f   : > { %115 = sbr.rel (!%p36_p9) target bundleno = 44 (0x2c), region = 20  ;;  %s117_s25 = sand.u32 (%p36_p9), 1, %s2550_s18  }
  0x20   : > { %s2411_s26 = sshll.u32 (%p36_p9), %s2554_s19, 4  ;;  %s2413_s27 = smul.u32 (%p36_p9), 48, %s117_s25 }
  0x21   : > { %s3980_s1 = sld [smem:[#allocation166_spill]] (%p36_p9) }
  0x22   : > { %s119_s4 = scalar_lea.vmem (%p36_p9), [#allocation4], %s2413_s27 }
  0x27   : > { %s122_s30 = scalar_lea.vmem %s3980_s1, %s2411_s26 }
  0x28   : > { %v161_v0 = vld [vmem:[%s122_s30] sm:$0xff]  ;;  %v163_v1 = vld [vmem:[%s122_s30 + $0x8] sm:$0xff] }
  0x29   : > { %v165_v2 = vld [vmem:[%s122_s30 + $0x20] sm:$0xff]  ;;  %v167_v3 = vld [vmem:[%s122_s30 + $0x28] sm:$0xff]  ;;  %162 = vst [vmem:[%s119_s4] sm:$0xff] %v161_v0  ;;  %164 = vst [vmem:[%s119_s4 + $0x8] sm:$0xff] %v163_v1 }
  0x2a   : > { %v169_v4 = vld [vmem:[%s122_s30 + $0x40] sm:$0xff]  ;;  %v171_v5 = vld [vmem:[%s122_s30 + $0x48] sm:$0xff]  ;;  %166 = vst [vmem:[%s119_s4 + $0x10] sm:$0xff] %v165_v2  ;;  %168 = vst [vmem:[%s119_s4 + $0x18] sm:$0xff] %v167_v3 }
  0x2b   : > { %170 = vst [vmem:[%s119_s4 + $0x20] sm:$0xff] %v169_v4  ;;  %172 = vst [vmem:[%s119_s4 + $0x28] sm:$0xff] %v171_v5 }
  0x2c PF: > { %p2216_p12 = scmp.ge.s32.totalorder %s2554_s19, 1  ;;  %p177_p13 = scmp.lt.s32.totalorder %s2554_s19, 3 }
  0x2e   : > { %p178_p0 = pnand %p2216_p12, %p177_p13 }
  0x30   : > { %181 = sbr.rel (%p178_p0) target bundleno = 951 (0x3b7), region = 58 }
  0x35   : > { %s184_s5 = sand.u32 1, %s2546_s17   ;;  %s2217_s6 = sshll.u32 %s2606_s0, 1 }
  0x36   : > { %s2635_s7 = smul.u32 48, %s184_s5  ;;  %p212_p1 = scmp.lt.s32.totalorder %s2217_s6, 3 }
  0x37   : > { %s2637_s8 = sld [smem:[#allocation3]] }
  0x38   : > { %3981 = sst [smem:[#allocation12_spill]] %s2635_s7  ;;  %s4309_s6 = smov (!%p212_p1, %s2217_s6), 3 }
  0x39   : > { %s2639_s9 = sld [smem:[#allocation3 + $0x1]]  ;;  %s2218_s10 = sshll.u32 %s4309_s6, 3 }
  0x3a   : > { %s2641_s11 = sld [smem:[#allocation3 + $0x2]] }
  0x3b   : > { %s3985_s3 = sld [smem:[#allocation168_spill]] }
  0x3c   : > { %s2648_s15 = sld [smem:[#allocation3 + $0x3]] }
  0x3d   : > { %3982 = sst [smem:[#allocation13_spill]] %s2637_s8 }
  0x3e   : > { %s2650_s16 = sld [smem:[#allocation3 + $0x4]] }
  0x3f   : > { %3983 = sst [smem:[#allocation14_spill]] %s2639_s9 }
  0x40   : > { %3984 = sst [smem:[#allocation15_spill]] %s2641_s11 }
  0x41   : > { %s2646_s14 = scalar_lea.vmem %s3985_s3, %s2218_s10  ;;  %s2652_s17 = sld [smem:[#allocation3 + $0x5]] }
  0x42   : > { %3986 = sst [smem:[#allocation16_spill]] %s2646_s14 }
  0x43   : > { %3987 = sst [smem:[#allocation17_spill]] %s2648_s15 }
  0x44   : > { %3988 = sst [smem:[#allocation18_spill]] %s2650_s16 }
  0x45   : > { %s2654_s19 = sld [smem:[#allocation3 + $0x6]] }
  0x46   : > { %s2656_s21 = sld [smem:[#allocation3 + $0x7]] }
  0x47   : > { %3989 = sst [smem:[#allocation19_spill]] %s2652_s17 }
  0x48   : > { %s2658_s22 = sld [smem:[#allocation3 + $0x8]] }
  0x49   : > { %s2660_s25 = sld [smem:[#allocation3 + $0x9]] }
  0x4a   : > { %s2662_s26 = sld [smem:[#allocation3 + $0xa]] }
  0x4b   : > { %3990 = sst [smem:[#allocation20_spill]] %s2654_s19 }
  0x4c   : > { %3991 = sst [smem:[#allocation21_spill]] %s2656_s21 }
  0x4d   : > { %s2664_s27 = sld [smem:[#allocation3 + $0xb]] }
  0x4e   : > { %3992 = sst [smem:[#allocation22_spill]] %s2658_s22 }
  0x4f   : > { %3993 = sst [smem:[#allocation23_spill]] %s2660_s25 }
  0x50   : > { %3994 = sst [smem:[#allocation24_spill]] %s2662_s26 }
  0x51   : > { %s2666_s28 = sld [smem:[#allocation3 + $0xc]] }
  0x52   : > { %s2668_s29 = sld [smem:[#allocation3 + $0x10]] }
  0x53   : > { %3995 = sst [smem:[#allocation25_spill]] %s2664_s27 }
  0x54   : > { %s2670_s30 = sld [smem:[#allocation3 + $0x11]] }
  0x55   : > { %s2672_s4 = sld [smem:[#allocation3 + $0x12]] }
  0x56   : > { %s2674_s5 = sld [smem:[#allocation3 + $0x13]] }
  0x57   : > { %3996 = sst [smem:[#allocation26_spill]] %s2666_s28 }
  0x58   : > { %3997 = sst [smem:[#allocation27_spill]] %s2668_s29 }
  0x59   : > { %s2676_s6 = sld [smem:[#allocation3 + $0x14]] }
  0x5a   : > { %3998 = sst [smem:[#allocation28_spill]] %s2670_s30 }
  0x5b   : > { %3999 = sst [smem:[#allocation29_spill]] %s2672_s4 }
  0x5c   : > { %4000 = sst [smem:[#allocation30_spill]] %s2674_s5 }
  0x5d   : > { %s2678_s10 = sld [smem:[#allocation3 + $0x15]] }
  0x5e   : > { %s2680_s12 = sld [smem:[#allocation3 + $0x16]] }
  0x5f   : > { %4001 = sst [smem:[#allocation31_spill]] %s2676_s6 }
  0x60   : > { %s2682_s13 = sld [smem:[#allocation3 + $0x17]] }
  0x61   : > { %s2684_s1 = sld [smem:[#allocation3 + $0x18]] }
  0x62   : > { %s2686_s3 = sld [smem:[#allocation3 + $0x19]] }
  0x63   : > { %4002 = sst [smem:[#allocation32_spill]] %s2678_s10 }
  0x64   : > { %4003 = sst [smem:[#allocation33_spill]] %s2680_s12 }
  0x65   : > { %s2688_s23 = sld [smem:[#allocation3 + $0x1a]] }
  0x66   : > { %4004 = sst [smem:[#allocation34_spill]] %s2682_s13 }
  0x67   : > { %4005 = sst [smem:[#allocation35_spill]] %s2684_s1 }
  0x68   : > { %4006 = sst [smem:[#allocation36_spill]] %s2686_s3 }
  0x69   : > { %s2690_s18 = sld [smem:[#allocation3 + $0x1b]] }
  0x6a   : > { %s2692_s20 = sld [smem:[#allocation3 + $0x1c]] }
  0x6b   : > { %4007 = sst [smem:[#allocation37_spill]] %s2688_s23 }
  0x6c   : > { %s2694_s2 = sld [smem:[#allocation3 + $0x20]] }
  0x6d   : > { %s2696_s0 = sld [smem:[#allocation3 + $0x21]] }
  0x6e   : > { %s2698_s24 = sld [smem:[#allocation3 + $0x22]] }
  0x6f   : > { %4008 = sst [smem:[#allocation38_spill]] %s2690_s18 }
  0x70   : > { %4009 = sst [smem:[#allocation39_spill]] %s2692_s20 }
  0x71   : > { %s2700_s14 = sld [smem:[#allocation3 + $0x23]] }
  0x72   : > { %4010 = sst [smem:[#allocation40_spill]] %s2694_s2 }
  0x73   : > { %4011 = sst [smem:[#allocation41_spill]] %s2696_s0 }
  0x74   : > { %4012 = sst [smem:[#allocation42_spill]] %s2698_s24 }
  0x75   : > { %s2702_s12 = sld [smem:[#allocation3 + $0x24]] }
  0x76   : > { %s2704_s13 = sld [smem:[#allocation3 + $0x25]] }
  0x77   : > { %4013 = sst [smem:[#allocation43_spill]] %s2700_s14 }
  0x78   : > { %s2706_s1 = sld [smem:[#allocation3 + $0x26]] }
  0x79   : > { %s2708_s3 = sld [smem:[#allocation3 + $0x27]] }
  0x7a   : > { %s2710_s23 = sld [smem:[#allocation3 + $0x28]] }
  0x7b   : > { %4014 = sst [smem:[#allocation44_spill]] %s2702_s12 }
  0x7c   : > { %4015 = sst [smem:[#allocation45_spill]] %s2704_s13 }
  0x7d   : > { %s2712_s18 = sld [smem:[#allocation3 + $0x29]] }
  0x7e   : > { %4016 = sst [smem:[#allocation46_spill]] %s2706_s1 }
  0x7f   : > { %4017 = sst [smem:[#allocation47_spill]] %s2708_s3 }
  0x80   : > { %4018 = sst [smem:[#allocation48_spill]] %s2710_s23 }
  0x81   : > { %s2714_s20 = sld [smem:[#allocation3 + $0x2a]] }
  0x82   : > { %s2716_s10 = sld [smem:[#allocation3 + $0x2b]] }
  0x83   : > { %4019 = sst [smem:[#allocation49_spill]] %s2712_s18 }
  0x84   : > { %s2718_s6 = sld [smem:[#allocation3 + $0x2c]] }
  0x85   : > { %s2720_s28 = sld [smem:[#allocation3 + $0x30]] }
  0x86   : > { %s2722_s27 = sld [smem:[#allocation3 + $0x31]] }
  0x87   : > { %4020 = sst [smem:[#allocation50_spill]] %s2714_s20 }
  0x88   : > { %4021 = sst [smem:[#allocation51_spill]] %s2716_s10 }
  0x89   : > { %s2724_s12 = sld [smem:[#allocation3 + $0x32]] }
  0x8a   : > { %4022 = sst [smem:[#allocation52_spill]] %s2718_s6 }
  0x8b   : > { %4023 = sst [smem:[#allocation53_spill]] %s2720_s28 }
  0x8c   : > { %4024 = sst [smem:[#allocation54_spill]] %s2722_s27 }
  0x8d   : > { %s2726_s13 = sld [smem:[#allocation3 + $0x33]] }
  0x8e   : > { %s2728_s1 = sld [smem:[#allocation3 + $0x34]] }
  0x8f   : > { %4025 = sst [smem:[#allocation55_spill]] %s2724_s12 }
  0x90   : > { %s2730_s3 = sld [smem:[#allocation3 + $0x35]] }
  0x91   : > { %s2732_s23 = sld [smem:[#allocation3 + $0x36]] }
  0x92   : > { %s2734_s18 = sld [smem:[#allocation3 + $0x37]] }
  0x93   : > { %4026 = sst [smem:[#allocation56_spill]] %s2726_s13 }
  0x94   : > { %4027 = sst [smem:[#allocation57_spill]] %s2728_s1 }
  0x95   : > { %s2736_s20 = sld [smem:[#allocation3 + $0x38]] }
  0x96   : > { %4028 = sst [smem:[#allocation58_spill]] %s2730_s3 }
  0x97   : > { %4029 = sst [smem:[#allocation59_spill]] %s2732_s23 }
  0x98   : > { %4030 = sst [smem:[#allocation60_spill]] %s2734_s18 }
  0x99   : > { %s2738_s10 = sld [smem:[#allocation3 + $0x39]] }
  0x9a   : > { %s2740_s6 = sld [smem:[#allocation3 + $0x3a]] }
  0x9b   : > { %4031 = sst [smem:[#allocation61_spill]] %s2736_s20 }
  0x9c   : > { %s2742_s26 = sld [smem:[#allocation3 + $0x3b]] }
  0x9d   : > { %s2744_s25 = sld [smem:[#allocation3 + $0x3c]] }
  0x9e   : > { %s2746_s22 = sld [smem:[#allocation3 + $0x80]] }
  0x9f   : > { %4032 = sst [smem:[#allocation62_spill]] %s2738_s10 }
  0xa0   : > { %4033 = sst [smem:[#allocation63_spill]] %s2740_s6 }
  0xa1   : > { %s2748_s13 = sld [smem:[#allocation3 + $0x81]] }
  0xa2   : > { %4034 = sst [smem:[#allocation64_spill]] %s2742_s26 }
  0xa3   : > { %4035 = sst [smem:[#allocation65_spill]] %s2744_s25 }
  0xa4   : > { %4036 = sst [smem:[#allocation66_spill]] %s2746_s22 }
  0xa5   : > { %s2750_s1 = sld [smem:[#allocation3 + $0x82]] }
  0xa6   : > { %s2752_s3 = sld [smem:[#allocation3 + $0x83]] }
  0xa7   : > { %4037 = sst [smem:[#allocation67_spill]] %s2748_s13 }
  0xa8   : > { %s2754_s23 = sld [smem:[#allocation3 + $0x84]] }
  0xa9   : > { %s2756_s18 = sld [smem:[#allocation3 + $0x85]] }
  0xaa   : > { %s2758_s20 = sld [smem:[#allocation3 + $0x86]] }
  0xab   : > { %4038 = sst [smem:[#allocation68_spill]] %s2750_s1 }
  0xac   : > { %4039 = sst [smem:[#allocation69_spill]] %s2752_s3 }
  0xad   : > { %s2760_s10 = sld [smem:[#allocation3 + $0x87]] }
  0xae   : > { %4040 = sst [smem:[#allocation70_spill]] %s2754_s23 }
  0xaf   : > { %4041 = sst [smem:[#allocation71_spill]] %s2756_s18 }
  0xb0   : > { %4042 = sst [smem:[#allocation72_spill]] %s2758_s20 }
  0xb1   : > { %s2762_s6 = sld [smem:[#allocation3 + $0x88]] }
  0xb2   : > { %s2764_s26 = sld [smem:[#allocation3 + $0x89]] }
  0xb3   : > { %4043 = sst [smem:[#allocation73_spill]] %s2760_s10 }
  0xb4   : > { %s2766_s25 = sld [smem:[#allocation3 + $0x8a]] }
  0xb5   : > { %s2768_s22 = sld [smem:[#allocation3 + $0x8b]] }
  0xb6   : > { %s2770_s13 = sld [smem:[#allocation3 + $0x8c]] }
  0xb7   : > { %4044 = sst [smem:[#allocation74_spill]] %s2762_s6 }
  0xb8   : > { %4045 = sst [smem:[#allocation75_spill]] %s2764_s26 }
  0xb9   : > { %s2772_s1 = sld [smem:[#allocation3 + $0x90]] }
  0xba   : > { %4046 = sst [smem:[#allocation76_spill]] %s2766_s25 }
  0xbb   : > { %4047 = sst [smem:[#allocation77_spill]] %s2768_s22 }
  0xbc   : > { %4048 = sst [smem:[#allocation78_spill]] %s2770_s13 }
  0xbd   : > { %s2774_s3 = sld [smem:[#allocation3 + $0x91]] }
  0xbe   : > { %s2776_s23 = sld [smem:[#allocation3 + $0x92]] }
  0xbf   : > { %4049 = sst [smem:[#allocation79_spill]] %s2772_s1 }
  0xc0   : > { %s2778_s18 = sld [smem:[#allocation3 + $0x93]] }
  0xc1   : > { %s2780_s20 = sld [smem:[#allocation3 + $0x94]] }
  0xc2   : > { %s2782_s10 = sld [smem:[#allocation3 + $0x95]] }
  0xc3   : > { %4050 = sst [smem:[#allocation80_spill]] %s2774_s3 }
  0xc4   : > { %4051 = sst [smem:[#allocation81_spill]] %s2776_s23 }
  0xc5   : > { %s2784_s6 = sld [smem:[#allocation3 + $0x96]] }
  0xc6   : > { %4052 = sst [smem:[#allocation82_spill]] %s2778_s18 }
  0xc7   : > { %4053 = sst [smem:[#allocation83_spill]] %s2780_s20 }
  0xc8   : > { %4054 = sst [smem:[#allocation84_spill]] %s2782_s10 }
  0xc9   : > { %s2786_s26 = sld [smem:[#allocation3 + $0x97]] }
  0xca   : > { %s2788_s25 = sld [smem:[#allocation3 + $0x98]] }
  0xcb   : > { %4055 = sst [smem:[#allocation85_spill]] %s2784_s6 }
  0xcc   : > { %s2790_s22 = sld [smem:[#allocation3 + $0x99]] }
  0xcd   : > { %s2792_s13 = sld [smem:[#allocation3 + $0x9a]] }
  0xce   : > { %s2794_s1 = sld [smem:[#allocation3 + $0x9b]] }
  0xcf   : > { %4056 = sst [smem:[#allocation86_spill]] %s2786_s26 }
  0xd0   : > { %4057 = sst [smem:[#allocation87_spill]] %s2788_s25 }
  0xd1   : > { %s2796_s3 = sld [smem:[#allocation3 + $0x9c]] }
  0xd2   : > { %4058 = sst [smem:[#allocation88_spill]] %s2790_s22 }
  0xd3   : > { %4059 = sst [smem:[#allocation89_spill]] %s2792_s13 }
  0xd4   : > { %4060 = sst [smem:[#allocation90_spill]] %s2794_s1 }
  0xd5   : > { %s2798_s23 = sld [smem:[#allocation3 + $0xa0]] }
  0xd6   : > { %s2800_s18 = sld [smem:[#allocation3 + $0xa1]] }
  0xd7   : > { %4061 = sst [smem:[#allocation91_spill]] %s2796_s3 }
  0xd8   : > { %s2802_s20 = sld [smem:[#allocation3 + $0xa2]] }
  0xd9   : > { %s2804_s10 = sld [smem:[#allocation3 + $0xa3]] }
  0xda   : > { %s2806_s6 = sld [smem:[#allocation3 + $0xa4]] }
  0xdb   : > { %4062 = sst [smem:[#allocation92_spill]] %s2798_s23 }
  0xdc   : > { %4063 = sst [smem:[#allocation93_spill]] %s2800_s18 }
  0xdd   : > { %s2808_s26 = sld [smem:[#allocation3 + $0xa5]] }
  0xde   : > { %4064 = sst [smem:[#allocation94_spill]] %s2802_s20 }
  0xdf   : > { %4065 = sst [smem:[#allocation95_spill]] %s2804_s10 }
  0xe0   : > { %4066 = sst [smem:[#allocation96_spill]] %s2806_s6 }
  0xe1   : > { %s2810_s25 = sld [smem:[#allocation3 + $0xa6]] }
  0xe2   : > { %s2812_s22 = sld [smem:[#allocation3 + $0xa7]] }
  0xe3   : > { %4067 = sst [smem:[#allocation97_spill]] %s2808_s26 }
  0xe4   : > { %s2814_s13 = sld [smem:[#allocation3 + $0xa8]] }
  0xe5   : > { %s2816_s1 = sld [smem:[#allocation3 + $0xa9]] }
  0xe6   : > { %s2818_s3 = sld [smem:[#allocation3 + $0xaa]] }
  0xe7   : > { %4068 = sst [smem:[#allocation98_spill]] %s2810_s25 }
  0xe8   : > { %4069 = sst [smem:[#allocation99_spill]] %s2812_s22 }
  0xe9   : > { %s2820_s23 = sld [smem:[#allocation3 + $0xab]] }
  0xea   : > { %4070 = sst [smem:[#allocation100_spill]] %s2814_s13 }
  0xeb   : > { %4071 = sst [smem:[#allocation101_spill]] %s2816_s1 }
  0xec   : > { %4072 = sst [smem:[#allocation102_spill]] %s2818_s3 }
  0xed   : > { %s2822_s18 = sld [smem:[#allocation3 + $0xac]] }
  0xee   : > { %s2824_s20 = sld [smem:[#allocation3 + $0xb0]] }
  0xef   : > { %4073 = sst [smem:[#allocation103_spill]] %s2820_s23 }
  0xf0   : > { %s2826_s10 = sld [smem:[#allocation3 + $0xb1]] }
  0xf1   : > { %s2828_s6 = sld [smem:[#allocation3 + $0xb2]] }
  0xf2   : > { %s2830_s26 = sld [smem:[#allocation3 + $0xb3]] }
  0xf3   : > { %4074 = sst [smem:[#allocation104_spill]] %s2822_s18 }
  0xf4   : > { %4075 = sst [smem:[#allocation105_spill]] %s2824_s20 }
  0xf5   : > { %s2832_s25 = sld [smem:[#allocation3 + $0xb4]] }
  0xf6   : > { %4076 = sst [smem:[#allocation106_spill]] %s2826_s10 }
  0xf7   : > { %4077 = sst [smem:[#allocation107_spill]] %s2828_s6 }
  0xf8   : > { %4078 = sst [smem:[#allocation108_spill]] %s2830_s26 }
  0xf9   : > { %s2834_s22 = sld [smem:[#allocation3 + $0xb5]] }
  0xfa   : > { %s2836_s13 = sld [smem:[#allocation3 + $0xb6]] }
  0xfb   : > { %4079 = sst [smem:[#allocation109_spill]] %s2832_s25 }
  0xfc   : > { %s2838_s1 = sld [smem:[#allocation3 + $0xb7]] }
  0xfd   : > { %s2840_s3 = sld [smem:[#allocation3 + $0xb8]] }
  0xfe   : > { %s2842_s23 = sld [smem:[#allocation3 + $0xb9]] }
  0xff   : > { %4080 = sst [smem:[#allocation110_spill]] %s2834_s22 }
 0x100   : > { %4081 = sst [smem:[#allocation111_spill]] %s2836_s13 }
 0x101   : > { %s2844_s18 = sld [smem:[#allocation3 + $0xba]] }
 0x102   : > { %4082 = sst [smem:[#allocation112_spill]] %s2838_s1 }
 0x103   : > { %4083 = sst [smem:[#allocation113_spill]] %s2840_s3 }
 0x104   : > { %4084 = sst [smem:[#allocation114_spill]] %s2842_s23 }
 0x105   : > { %s2846_s20 = sld [smem:[#allocation3 + $0xbb]] }
 0x106   : > { %s2848_s10 = sld [smem:[#allocation3 + $0xbc]] }
 0x107   : > { %4085 = sst [smem:[#allocation115_spill]] %s2844_s18 }
 0x108   : > { %s2850_s6 = sld [smem:[#allocation3 + $0x100]] }
 0x109   : > { %s2852_s26 = sld [smem:[#allocation3 + $0x101]] }
 0x10a   : > { %s2854_s25 = sld [smem:[#allocation3 + $0x102]] }
 0x10b   : > { %4086 = sst [smem:[#allocation116_spill]] %s2846_s20 }
 0x10c   : > { %4087 = sst [smem:[#allocation117_spill]] %s2848_s10 }
 0x10d   : > { %s2856_s22 = sld [smem:[#allocation3 + $0x103]] }
 0x10e   : > { %4088 = sst [smem:[#allocation118_spill]] %s2850_s6 }
 0x10f   : > { %4089 = sst [smem:[#allocation119_spill]] %s2852_s26 }
 0x110   : > { %4090 = sst [smem:[#allocation120_spill]] %s2854_s25 }
 0x111   : > { %s2858_s13 = sld [smem:[#allocation3 + $0x104]] }
 0x112   : > { %s2860_s1 = sld [smem:[#allocation3 + $0x105]] }
 0x113   : > { %4091 = sst [smem:[#allocation121_spill]] %s2856_s22 }
 0x114   : > { %s2862_s3 = sld [smem:[#allocation3 + $0x106]] }
 0x115   : > { %s2864_s23 = sld [smem:[#allocation3 + $0x107]] }
 0x116   : > { %s2866_s18 = sld [smem:[#allocation3 + $0x108]] }
 0x117   : > { %4092 = sst [smem:[#allocation122_spill]] %s2858_s13 }
 0x118   : > { %4093 = sst [smem:[#allocation123_spill]] %s2860_s1 }
 0x119   : > { %s2868_s20 = sld [smem:[#allocation3 + $0x109]] }
 0x11a   : > { %4094 = sst [smem:[#allocation124_spill]] %s2862_s3 }
 0x11b   : > { %4095 = sst [smem:[#allocation125_spill]] %s2864_s23 }
 0x11c   : > { %4096 = sst [smem:[#allocation126_spill]] %s2866_s18 }
 0x11d   : > { %s2870_s10 = sld [smem:[#allocation3 + $0x10a]] }
 0x11e   : > { %s2872_s6 = sld [smem:[#allocation3 + $0x10b]] }
 0x11f   : > { %4097 = sst [smem:[#allocation127_spill]] %s2868_s20 }
 0x120   : > { %s2874_s26 = sld [smem:[#allocation3 + $0x10c]] }
 0x121   : > { %s2876_s25 = sld [smem:[#allocation3 + $0x110]] }
 0x122   : > { %s2878_s22 = sld [smem:[#allocation3 + $0x111]] }
 0x123   : > { %4098 = sst [smem:[#allocation128_spill]] %s2870_s10 }
 0x124   : > { %4099 = sst [smem:[#allocation129_spill]] %s2872_s6 }
 0x125   : > { %s2880_s13 = sld [smem:[#allocation3 + $0x112]] }
 0x126   : > { %4100 = sst [smem:[#allocation130_spill]] %s2874_s26 }
 0x127   : > { %4101 = sst [smem:[#allocation131_spill]] %s2876_s25 }
 0x128   : > { %4102 = sst [smem:[#allocation132_spill]] %s2878_s22 }
 0x129   : > { %s2882_s1 = sld [smem:[#allocation3 + $0x113]] }
 0x12a   : > { %s2884_s3 = sld [smem:[#allocation3 + $0x114]] }
 0x12b   : > { %4103 = sst [smem:[#allocation133_spill]] %s2880_s13 }
 0x12c   : > { %s2886_s23 = sld [smem:[#allocation3 + $0x115]] }
 0x12d   : > { %s2888_s18 = sld [smem:[#allocation3 + $0x116]] }
 0x12e   : > { %s2890_s20 = sld [smem:[#allocation3 + $0x117]] }
 0x12f   : > { %4104 = sst [smem:[#allocation134_spill]] %s2882_s1 }
 0x130   : > { %4105 = sst [smem:[#allocation135_spill]] %s2884_s3 }
 0x131   : > { %s2892_s10 = sld [smem:[#allocation3 + $0x118]] }
 0x132   : > { %4106 = sst [smem:[#allocation136_spill]] %s2886_s23 }
 0x133   : > { %4107 = sst [smem:[#allocation137_spill]] %s2888_s18 }
 0x134   : > { %4108 = sst [smem:[#allocation138_spill]] %s2890_s20 }
 0x135   : > { %s2894_s6 = sld [smem:[#allocation3 + $0x119]] }
 0x136   : > { %s2896_s26 = sld [smem:[#allocation3 + $0x11a]] }
 0x137   : > { %4109 = sst [smem:[#allocation139_spill]] %s2892_s10 }
 0x138   : > { %s2898_s25 = sld [smem:[#allocation3 + $0x11b]] }
 0x139   : > { %s2900_s22 = sld [smem:[#allocation3 + $0x11c]] }
 0x13a   : > { %s2902_s13 = sld [smem:[#allocation3 + $0x120]] }
 0x13b   : > { %4110 = sst [smem:[#allocation140_spill]] %s2894_s6 }
 0x13c   : > { %4111 = sst [smem:[#allocation141_spill]] %s2896_s26 }
 0x13d   : > { %s2904_s1 = sld [smem:[#allocation3 + $0x121]] }
 0x13e   : > { %4112 = sst [smem:[#allocation142_spill]] %s2898_s25 }
 0x13f   : > { %4113 = sst [smem:[#allocation143_spill]] %s2900_s22 }
 0x140   : > { %4114 = sst [smem:[#allocation144_spill]] %s2902_s13 }
 0x141   : > { %s2906_s3 = sld [smem:[#allocation3 + $0x122]] }
 0x142   : > { %s2908_s23 = sld [smem:[#allocation3 + $0x123]] }
 0x143   : > { %4115 = sst [smem:[#allocation145_spill]] %s2904_s1 }
 0x144   : > { %s2910_s18 = sld [smem:[#allocation3 + $0x124]] }
 0x145   : > { %s2912_s20 = sld [smem:[#allocation3 + $0x125]] }
 0x146   : > { %s2914_s10 = sld [smem:[#allocation3 + $0x126]] }
 0x147   : > { %4116 = sst [smem:[#allocation146_spill]] %s2906_s3 }
 0x148   : > { %4117 = sst [smem:[#allocation147_spill]] %s2908_s23 }
 0x149   : > { %s2916_s6 = sld [smem:[#allocation3 + $0x127]] }
 0x14a   : > { %4118 = sst [smem:[#allocation148_spill]] %s2910_s18 }
 0x14b   : > { %4119 = sst [smem:[#allocation149_spill]] %s2912_s20 }
 0x14c   : > { %4120 = sst [smem:[#allocation150_spill]] %s2914_s10 }
 0x14d   : > { %s2918_s26 = sld [smem:[#allocation3 + $0x128]] }
 0x14e   : > { %s2920_s25 = sld [smem:[#allocation3 + $0x129]] }
 0x14f   : > { %4121 = sst [smem:[#allocation151_spill]] %s2916_s6 }
 0x150   : > { %s2922_s22 = sld [smem:[#allocation3 + $0x12a]] }
 0x151   : > { %s2924_s1 = sld [smem:[#allocation3 + $0x12b]] }
 0x152   : > { %s2926_s3 = sld [smem:[#allocation3 + $0x12c]] }
 0x153   : > { %4122 = sst [smem:[#allocation152_spill]] %s2918_s26 }
 0x154   : > { %4123 = sst [smem:[#allocation153_spill]] %s2920_s25 }
 0x155   : > { %s2928_s23 = sld [smem:[#allocation3 + $0x130]] }
 0x156   : > { %4124 = sst [smem:[#allocation154_spill]] %s2922_s22 }
 0x157   : > { %4125 = sst [smem:[#allocation155_spill]] %s2924_s1 }
 0x158   : > { %4126 = sst [smem:[#allocation156_spill]] %s2926_s3 }
 0x159   : > { %s2930_s18 = sld [smem:[#allocation3 + $0x131]] }
 0x15a   : > { %s2932_s20 = sld [smem:[#allocation3 + $0x132]] }
 0x15b   : > { %4127 = sst [smem:[#allocation157_spill]] %s2928_s23 }
 0x15c   : > { %s2934_s10 = sld [smem:[#allocation3 + $0x133]] }
 0x15d   : > { %s2936_s6 = sld [smem:[#allocation3 + $0x134]] }
 0x15e   : > { %s2938_s26 = sld [smem:[#allocation3 + $0x135]] }
 0x15f   : > { %4128 = sst [smem:[#allocation158_spill]] %s2930_s18 }
 0x160   : > { %4129 = sst [smem:[#allocation159_spill]] %s2932_s20 }
 0x161   : > { %s2940_s25 = sld [smem:[#allocation3 + $0x136]] }
 0x162   : > { %4130 = sst [smem:[#allocation160_spill]] %s2934_s10  ;;  %s2956_s10 = scalar_lea.vmem [#allocation5], %s2635_s7 }
 0x163   : > { %4131 = sst [smem:[#allocation161_spill]] %s2936_s6  ;;  %s2958_s6 = smov 0  }
 0x164   : > { %s2942_s22 = sld [smem:[#allocation3 + $0x137]] }
 0x165   : > { %s2944_s1 = sld [smem:[#allocation3 + $0x138]] }
 0x166   : > { %s2946_s13 = sld [smem:[#allocation3 + $0x139]] }
 0x167   : > { %s2948_s3 = sld [smem:[#allocation3 + $0x13a]] }
 0x168   : > { %s2950_s23 = sld [smem:[#allocation3 + $0x13b]] }
 0x169   : > { %s2952_s18 = sld [smem:[#allocation3 + $0x13c]] }
 0x16a   : > { %4133 = sst [smem:[#allocation163_spill]] %s2956_s10 }
 0x16e   : > { %4132 = sst [smem:[#allocation162_spill]] %s2950_s23 }
 0x16f LB: >> { %s4134_s8 = sld [smem:[#allocation13_spill]]  ;;  %s2964_s23 = sshll.u32 %s2558_s6, 3  ;;  %s2558_s6 = sphi %s2958_s6, %s378_s6  }
 0x170   : >> { %s4135_s9 = sld [smem:[#allocation14_spill]] }
 0x171   : >> { %s4136_s11 = sld [smem:[#allocation15_spill]] }
 0x172   : >> { %s4137_s7 = sld [smem:[#allocation12_spill]] }
 0x173   : >> { %s4138_s29 = sld [smem:[#allocation27_spill]] }
 0x174   : >> { %s4139_s30 = sld [smem:[#allocation28_spill]] }
 0x175   : >> { %s4140_s4 = sld [smem:[#allocation29_spill]]  ;;  %v388_v6 = vstv %s4134_s8 }
 0x176   : >> { %4141 = sst [smem:[#allocation164_spill]] %s2558_s6  ;;  %v390_v7 = vstv %s4135_s9 }
 0x177   : >> { %4142 = sst [smem:[#allocation165_spill]] %s2964_s23  ;;  %v393_v8 = vstv %s4136_s11 }
 0x178   : >> { %s4143_s15 = sld [smem:[#allocation17_spill]]  ;;  %s4144_s20 = scalar_lea.vmem [#allocation4], %s4137_s7 }
 0x179   : >> { %s380_s10 = scalar_lea.vmem %s4144_s20, %s2964_s23 [#allocation4]  ;;  %v418_v9 = vstv %s4138_s29  ;;  %s4145_s5 = sld [smem:[#allocation30_spill]] }
 0x17a   : >> { %v420_v10 = vstv %s4139_s30  ;;  %s4146_s2 = sld [smem:[#allocation40_spill]]  ;;  %v2975_v12 = vld [vmem:[%s380_s10] sm:$0xff]  ;;  %v2977_v13 = vld [vmem:[%s380_s10 + $0x10] sm:$0xff] }
 0x17b   : >> { %v423_v11 = vstv %s4140_s4  ;;  %s4147_s0 = sld [smem:[#allocation41_spill]]  ;;  %v2979_v14 = vld [vmem:[%s380_s10 + $0x20] sm:$0xff]  ;;  %v389_v15 = vmul.f32 %v388_v6, %v2975_v12  ;;  %v391_v16 = vmul.f32 %v2977_v13, %v390_v7  ;;  %v419_v18 = vmul.f32 %v418_v9, %v2975_v12 }
 0x17c   : >> { %s4148_s24 = sld [smem:[#allocation42_spill]]  ;;  %v394_v17 = vmul.f32 %v2979_v14, %v393_v8  ;;  %v421_v19 = vmul.f32 %v2977_v13, %v420_v10  ;;  %v424_v20 = vmul.f32 %v2979_v14, %v423_v11 }
 0x17d   : >> { %v392_v21 = vadd.f32 %v391_v16, %v389_v15  ;;  %s4149_s14 = sld [smem:[#allocation43_spill]] }
 0x17e   : >> { %v396_v22 = vstv %s4143_s15  ;;  %v422_v23 = vadd.f32 %v421_v19, %v419_v18  ;;  %s4150_s28 = sld [smem:[#allocation53_spill]] }
 0x17f   : >> { %v395_v24 = vadd.f32 %v394_v17, %v392_v21  ;;  %v426_v25 = vstv %s4145_s5  ;;  %s4151_s27 = sld [smem:[#allocation54_spill]] }
 0x180   : >> { %v457_v26 = vstv %s4146_s2  ;;  %v425_v28 = vadd.f32 %v424_v20, %v422_v23  ;;  %s4152_s16 = sld [smem:[#allocation18_spill]] }
 0x181   : >> { %v459_v27 = vstv %s4147_s0  ;;  %v458_v29 = vmul.f32 %v457_v26, %v2975_v12  ;;  %v397_v32 = vsub.f32 %v395_v24, %v396_v22  ;;  %s4153_s12 = sld [smem:[#allocation55_spill]] }
 0x182   : >> { %v460_v30 = vmul.f32 %v2977_v13, %v459_v27  ;;  %v462_v31 = vstv %s4148_s24  ;;  %s4154_s17 = sld [smem:[#allocation19_spill]]  ;;  %v427_v34 = vsub.f32 %v425_v28, %v426_v25 }
 0x183   : >> { %v463_v33 = vmul.f32 %v2979_v14, %v462_v31  ;;  %v398_v36 = vmul.f32 1.442695, %v397_v32  ;;  %v465_v37 = vstv %s4149_s14  ;;  %s4155_s19 = sld [smem:[#allocation20_spill]] }
 0x184   : >> { %v461_v35 = vadd.f32 %v460_v30, %v458_v29  ;;  %v428_v38 = vmul.f32 1.442695, %v427_v34  ;;  %s4156_s21 = sld [smem:[#allocation21_spill]]  ;;  %v496_v40 = vstv %s4150_s28 }
 0x185   : >> { %s4157_s10 = sld [smem:[#allocation22_spill]]  ;;  %2466 = vpow2.f32 %v398_v36  ;;  %v498_v41 = vstv %s4151_s27  ;;  %v497_v43 = vmul.f32 %v496_v40, %v2975_v12 }
 0x186   : >> { %v464_v39 = vadd.f32 %v463_v33, %v461_v35  ;;  %s4158_s20 = sld [smem:[#allocation56_spill]]  ;;  %2468 = vpow2.f32 %v428_v38  ;;  %v499_v44 = vmul.f32 %v2977_v13, %v498_v41  ;;  %v400_v45 = vstv %s4152_s16 }
 0x187   : >> { %s4159_s0 = sld [smem:[#allocation23_spill]]  ;;  %v501_v46 = vstv %s4153_s12 }
 0x188   : >> { %s4160_s2 = sld [smem:[#allocation24_spill]]  ;;  %v466_v42 = vsub.f32 %v464_v39, %v465_v37  ;;  %v402_v47 = vstv %s4154_s17  ;;  %v500_v49 = vadd.f32 %v499_v44, %v497_v43  ;;  %v502_v50 = vmul.f32 %v2979_v14, %v501_v46 }
 0x189   : >> { %s4161_s4 = sld [smem:[#allocation25_spill]]  ;;  %v404_v51 = vstv %s4155_s19 }
 0x18a   : >> { %s4162_s5 = sld [smem:[#allocation26_spill]]  ;;  %v467_v48 = vmul.f32 1.442695, %v466_v42  ;;  %v406_v52 = vstv %s4156_s21  ;;  %v503_v57 = vadd.f32 %v502_v50, %v500_v49 }
 0x18b   : >> { %s4163_s7 = sld [smem:[#allocation31_spill]]  ;;  %v408_v53 = vstv %s4157_s10 }
 0x18c   : >> { %s4164_s8 = sld [smem:[#allocation32_spill]]  ;;  %v504_v54 = vstv %s4158_s20  ;;  %2470 = vpow2.f32 %v467_v48 }
 0x18d   : >> { %s4165_s9 = sld [smem:[#allocation33_spill]]  ;;  %v410_v55 = vstv %s4159_s0  ;;  %v505_v1 = vsub.f32 %v503_v57, %v504_v54 }
 0x18e   : >> { %s4166_s11 = sld [smem:[#allocation34_spill]]  ;;  %v412_v56 = vstv %s4160_s2 }
 0x18f   : >> { %s4167_s14 = sld [smem:[#allocation35_spill]]  ;;  %v414_v58 = vstv %s4161_s4  ;;  %v506_v9 = vmul.f32 1.442695, %v505_v1 }
 0x190   : >> { %s4168_s15 = sld [smem:[#allocation36_spill]]  ;;  %v416_v59 = vstv %s4162_s5 }
 0x191   : >> { %s4169_s24 = sld [smem:[#allocation37_spill]]  ;;  %v430_v60 = vstv %s4163_s7  ;;  %2472 = vpow2.f32 %v506_v9 }
 0x192   : >> { %s4170_s27 = sld [smem:[#allocation38_spill]]  ;;  %v432_v61 = vstv %s4164_s8  ;;  %v2467_v24 = vpop.eup %2466 }
 0x193   : >> { %s4171_s28 = sld [smem:[#allocation39_spill]]  ;;  %v434_v62 = vstv %s4165_s9  ;;  %v2469_v29 = vpop.eup %2468  ;;  %v401_v30 = vmul.f32 %v2467_v24, %v400_v45  ;;  %v403_v31 = vmul.f32 %v2467_v24, %v402_v47  ;;  %v405_v32 = vmul.f32 %v2467_v24, %v404_v51 }
 0x194   : >> { %s4172_s16 = sld [smem:[#allocation44_spill]]  ;;  %v436_v63 = vstv %s4166_s11  ;;  %v407_v33 = vmul.f32 %v2467_v24, %v406_v52  ;;  %v409_v34 = vmul.f32 %v2467_v24, %v408_v53  ;;  %v411_v35 = vmul.f32 %v2467_v24, %v410_v55 }
 0x195   : >> { %s4173_s12 = sld [smem:[#allocation45_spill]]  ;;  %v438_v0 = vstv %s4167_s14  ;;  %v413_v36 = vmul.f32 %v2467_v24, %v412_v56  ;;  %v415_v37 = vmul.f32 %v2467_v24, %v414_v58  ;;  %v417_v38 = vmul.f32 %v2467_v24, %v416_v59 }
 0x196   : >> { %s4174_s17 = sld [smem:[#allocation46_spill]]  ;;  %v440_v2 = vstv %s4168_s15  ;;  %v431_v39 = vmul.f32 %v2469_v29, %v430_v60  ;;  %v433_v40 = vmul.f32 %v2469_v29, %v432_v61  ;;  %v435_v41 = vmul.f32 %v2469_v29, %v434_v62 }
 0x197   : >> { %s4175_s29 = sld [smem:[#allocation47_spill]]  ;;  %v442_v3 = vstv %s4169_s24  ;;  %v437_v42 = vmul.f32 %v2469_v29, %v436_v63  ;;  %v439_v43 = vmul.f32 %v2469_v29, %v438_v0  ;;  %v441_v44 = vmul.f32 %v2469_v29, %v440_v2 }
 0x198   : >> { %s4176_s30 = sld [smem:[#allocation48_spill]]  ;;  %v444_v4 = vstv %s4170_s27  ;;  %v443_v46 = vmul.f32 %v2469_v29, %v442_v3  ;;  %v448_v54 = vadd.f32 %v431_v39, %v401_v30  ;;  %v449_v45 = vadd.f32 %v433_v40, %v403_v31 }
 0x199   : >> { %s4177_s19 = sld [smem:[#allocation49_spill]]  ;;  %v446_v5 = vstv %s4171_s28  ;;  %v2471_v48 = vpop.eup %2470  ;;  %v445_v49 = vmul.f32 %v2469_v29, %v444_v4  ;;  %v450_v47 = vadd.f32 %v435_v41, %v405_v32  ;;  %v451_v51 = vadd.f32 %v437_v42, %v407_v33 }
 0x19a   : >> { %s4178_s21 = sld [smem:[#allocation50_spill]]  ;;  %v469_v6 = vstv %s4172_s16  ;;  %v447_v50 = vmul.f32 %v2469_v29, %v446_v5  ;;  %v452_v52 = vadd.f32 %v439_v43, %v409_v34  ;;  %v453_v53 = vadd.f32 %v441_v44, %v411_v35 }
 0x19b   : >> { %s4179_s10 = sld [smem:[#allocation51_spill]]  ;;  %v471_v7 = vstv %s4173_s12  ;;  %v454_v55 = vadd.f32 %v443_v46, %v413_v36  ;;  %v455_v56 = vadd.f32 %v445_v49, %v415_v37  ;;  %v470_v58 = vmul.f32 %v2471_v48, %v469_v6 }
 0x19c   : >> { %s4180_s20 = sld [smem:[#allocation52_spill]]  ;;  %v473_v8 = vstv %s4174_s17  ;;  %v456_v57 = vadd.f32 %v447_v50, %v417_v38  ;;  %v472_v59 = vmul.f32 %v2471_v48, %v471_v7 }
 0x19d   : >> { %s4181_s0 = sld [smem:[#allocation57_spill]]  ;;  %v475_v10 = vstv %s4175_s29  ;;  %v474_v60 = vmul.f32 %v2471_v48, %v473_v8  ;;  %v487_v3 = vadd.f32 %v470_v58, %v448_v54 }
 0x19e   : >> { %s4182_s2 = sld [smem:[#allocation58_spill]]  ;;  %v477_v11 = vstv %s4176_s30  ;;  %v476_v61 = vmul.f32 %v2471_v48, %v475_v10  ;;  %v488_v4 = vadd.f32 %v472_v59, %v449_v45  ;;  %v2473_v24 = vpop.eup %2472 }
 0x19f   : >> { %s4183_s6 = sld [smem:[#allocation59_spill]]  ;;  %v479_v15 = vstv %s4177_s19  ;;  %v478_v62 = vmul.f32 %v2471_v48, %v477_v11  ;;  %v489_v5 = vadd.f32 %v474_v60, %v450_v47 }
 0x1a0   : >> { %s4184_s4 = sld [smem:[#allocation60_spill]]  ;;  %v481_v16 = vstv %s4178_s21  ;;  %v480_v63 = vmul.f32 %v2471_v48, %v479_v15  ;;  %v490_v9 = vadd.f32 %v476_v61, %v451_v51 }
 0x1a1   : >> { %s4185_s5 = sld [smem:[#allocation61_spill]]  ;;  %v483_v17 = vstv %s4179_s10  ;;  %v482_v0 = vmul.f32 %v2471_v48, %v481_v16  ;;  %v491_v29 = vadd.f32 %v478_v62, %v452_v52 }
 0x1a2   : >> { %s4186_s7 = sld [smem:[#allocation62_spill]]  ;;  %v485_v18 = vstv %s4180_s20  ;;  %v484_v1 = vmul.f32 %v2471_v48, %v483_v17  ;;  %v492_v30 = vadd.f32 %v480_v63, %v453_v53 }
 0x1a3   : >> { %s4187_s8 = sld [smem:[#allocation63_spill]]  ;;  %v508_v19 = vstv %s4181_s0  ;;  %v486_v2 = vmul.f32 %v2471_v48, %v485_v18  ;;  %v493_v31 = vadd.f32 %v482_v0, %v454_v55 }
 0x1a4   : >> { %s4188_s9 = sld [smem:[#allocation64_spill]]  ;;  %v510_v20 = vstv %s4182_s2  ;;  %v494_v32 = vadd.f32 %v484_v1, %v455_v56  ;;  %v509_v34 = vmul.f32 %v2473_v24, %v508_v19 }
 0x1a5   : >> { %s4189_s11 = sld [smem:[#allocation65_spill]]  ;;  %v512_v21 = vstv %s4183_s6  ;;  %v495_v33 = vadd.f32 %v486_v2, %v456_v57  ;;  %v511_v6 = vmul.f32 %v2473_v24, %v510_v20 }
 0x1a6   : >> { %v514_v22 = vstv %s4184_s4  ;;  %v513_v7 = vmul.f32 %v2473_v24, %v512_v21  ;;  %v526_v18 = vadd.f32 %v509_v34, %v487_v3  ;;  %s4190_s24 = sld [smem:[#allocation66_spill]] }
 0x1a7   : >> { %v516_v23 = vstv %s4185_s5  ;;  %v515_v8 = vmul.f32 %v2473_v24, %v514_v22  ;;  %v527_v35 = vadd.f32 %v511_v6, %v488_v4  ;;  %s4191_s14 = sld [smem:[#allocation67_spill]] }
 0x1a8   : >> { %v518_v25 = vstv %s4186_s7  ;;  %v517_v10 = vmul.f32 %v2473_v24, %v516_v23  ;;  %v528_v36 = vadd.f32 %v513_v7, %v489_v5  ;;  %v535_v43 = vmul.f32 %v526_v18, %v2975_v12  ;;  %s4192_s15 = sld [smem:[#allocation68_spill]] }
 0x1a9   : >> { %v520_v26 = vstv %s4187_s8  ;;  %v519_v11 = vmul.f32 %v2473_v24, %v518_v25  ;;  %v529_v37 = vadd.f32 %v515_v8, %v490_v9  ;;  %v536_v19 = vmul.f32 %v2977_v13, %v527_v35  ;;  %s4193_s16 = sld [smem:[#allocation79_spill]] }
 0x1aa   : >> { %v522_v27 = vstv %s4188_s9  ;;  %v521_v15 = vmul.f32 %v2473_v24, %v520_v26  ;;  %v530_v38 = vadd.f32 %v517_v10, %v491_v29  ;;  %v538_v20 = vmul.f32 %v2979_v14, %v528_v36  ;;  %s4194_s17 = sld [smem:[#allocation80_spill]] }
 0x1ab   : >> { %v524_v28 = vstv %s4189_s11  ;;  %v523_v16 = vmul.f32 %v2473_v24, %v522_v27  ;;  %v531_v39 = vadd.f32 %v519_v11, %v492_v30  ;;  %v776_v21 = vmul.f32 %v529_v37, %v2975_v12  ;;  %s4195_s19 = sld [smem:[#allocation69_spill]] }
 0x1ac   : >> { %v525_v17 = vmul.f32 %v2473_v24, %v524_v28  ;;  %v532_v40 = vadd.f32 %v521_v15, %v493_v31  ;;  %v783_v22 = vmul.f32 %v2977_v13, %v530_v38  ;;  %v537_v28 = vadd.f32 %v536_v19, %v535_v43  ;;  %s4196_s21 = sld [smem:[#allocation81_spill]] }
 0x1ad   : >> { %v533_v41 = vadd.f32 %v523_v16, %v494_v32  ;;  %v791_v48 = vmul.f32 %v2979_v14, %v531_v39  ;;  %s4197_s27 = sld [smem:[#allocation82_spill]] }
 0x1ae   : >> { %v534_v42 = vadd.f32 %v525_v17, %v495_v33  ;;  %v777_v23 = vmul.f32 %v2977_v13, %v532_v40  ;;  %v782_v26 = vmul.f32 %v532_v40, %v2975_v12  ;;  %v539_v54 = vadd.f32 %v538_v20, %v537_v28  ;;  %s4198_s28 = sld [smem:[#allocation92_spill]] }
 0x1af   : >> { %v779_v25 = vmul.f32 %v2979_v14, %v533_v41  ;;  %v788_v44 = vmul.f32 %v533_v41, %v2975_v12  ;;  %s4199_s29 = sld [smem:[#allocation93_spill]] }
 0x1b0   : >> { %v785_v27 = vmul.f32 %v2979_v14, %v534_v42  ;;  %v789_v46 = vmul.f32 %v2977_v13, %v534_v42  ;;  %v778_v49 = vadd.f32 %v777_v23, %v776_v21  ;;  %v784_v50 = vadd.f32 %v783_v22, %v782_v26  ;;  %s4200_s30 = sld [smem:[#allocation94_spill]] }
 0x1b1   : >> { %v540_v52 = vmul.f32 %v539_v54, %v2975_v12  ;;  %v542_v53 = vmul.f32 %v2977_v13, %v539_v54  ;;  %v544_v55 = vmul.f32 %v2979_v14, %v539_v54  ;;  %s4201_s6 = sld [smem:[#allocation95_spill]] }
 0x1b2   : >> { %v790_v45 = vadd.f32 %v789_v46, %v788_v44  ;;  %v780_v47 = vadd.f32 %v779_v25, %v778_v49  ;;  %v786_v51 = vadd.f32 %v785_v27, %v784_v50  ;;  %s4203_s10 = sld [smem:[#allocation105_spill]] }
 0x1b3   : >> { %v541_v59 = vsub.f32 %v526_v18, %v540_v52  ;;  %v543_v60 = vsub.f32 %v527_v35, %v542_v53  ;;  %v545_v61 = vsub.f32 %v528_v36, %v544_v55  ;;  %s4204_s20 = sld [smem:[#allocation106_spill]] }
 0x1b4   : >> { %v792_v56 = vadd.f32 %v791_v48, %v790_v45  ;;  %v781_v57 = vadd.f32 %v780_v47, %v526_v18  ;;  %v787_v58 = vadd.f32 %v786_v51, %v527_v35  ;;  %s4205_s0 = sld [smem:[#allocation107_spill]] }
 0x1b5   : >> { %v546_v3 = vmul.f32 %v541_v59, %v541_v59  ;;  %v547_v4 = vmul.f32 %v543_v60, %v543_v60  ;;  %v549_v5 = vmul.f32 %v545_v61, %v545_v61  ;;  %s4206_s2 = sld [smem:[#allocation108_spill]] }
 0x1b6   : >> { %v793_v62 = vadd.f32 %v792_v56, %v528_v36  ;;  %v794_v63 = vmul.f32 %v781_v57, %v2975_v12  ;;  %v797_v0 = vmul.f32 %v787_v58, %v2975_v12  ;;  %v801_v1 = vmul.f32 %v2977_v13, %v781_v57  ;;  %s4207_s4 = sld [smem:[#allocation70_spill]] }
 0x1b7   : >> { %v803_v2 = vmul.f32 %v2977_v13, %v787_v58  ;;  %v548_v32 = vadd.f32 %v547_v4, %v546_v3  ;;  %v808_v6 = vmul.f32 %v2979_v14, %v781_v57  ;;  %v810_v10 = vmul.f32 %v2979_v14, %v787_v58  ;;  %s4208_s5 = sld [smem:[#allocation71_spill]] }
 0x1b8   : >> { %v799_v9 = vmul.f32 %v793_v62, %v2975_v12  ;;  %v795_v24 = vsub.f32 %v529_v37, %v794_v63  ;;  %v798_v29 = vsub.f32 %v532_v40, %v797_v0  ;;  %v802_v30 = vsub.f32 %v532_v40, %v801_v1  ;;  %s4209_s7 = sld [smem:[#allocation72_spill]] }
 0x1b9   : >> { %v804_v31 = vsub.f32 %v530_v38, %v803_v2  ;;  %v806_v34 = vmul.f32 %v2977_v13, %v793_v62  ;;  %v812_v11 = vmul.f32 %v2979_v14, %v793_v62  ;;  %v3063_v15 = vadd.f32 %v549_v5, %v548_v32  ;;  %s4210_s8 = sld [smem:[#allocation83_spill]] }
 0x1ba   : >> { %v800_v33 = vsub.f32 %v533_v41, %v799_v9  ;;  %v796_v7 = vsub.f32 %v795_v24, %v539_v54  ;;  %v3065_v17 = vsub.f32 %v533_v41, %v808_v6  ;;  %v3067_v18 = vsub.f32 %v534_v42, %v810_v10  ;;  %s4211_s9 = sld [smem:[#allocation73_spill]] }
 0x1bb   : >> { %v805_v8 = vsub.f32 %v804_v31, %v539_v54  ;;  %v807_v16 = vsub.f32 %v534_v42, %v806_v34  ;;  %v813_v35 = vsub.f32 %v531_v39, %v812_v11  ;;  %v551_v36 = vmax.f32 %v3063_v15, 1e-30  ;;  %s4212_s11 = sld [smem:[#allocation84_spill]] }
 0x1bc   : >> { %v3968_v10 = vmov 683565275   ;;  %vm764_vm15 = vcmp.gt.f32.partialorder %v3063_v15, 1e-24  ;;  %s4223_s12 = sld [smem:[#allocation89_spill]] }
 0x1bd   : >> { %v3070_v37 = vsub.f32 %v813_v35, %v539_v54  ;;  %2474 = vrsqrt.f32 %v551_v36  ;;  %v3964_v36 = vmov 2131351028   ;;  %s4231_s23 = sld [smem:[#allocation102_spill]] }
 0x1ca   : >> { %v3072_v38 = vpop.eup %2474 }
 0x1cb   : >> { %v3076_v40 = vmul.f32 %v3072_v38, %v3063_v15  ;;  %v3079_v43 = vmul.f32 %v3072_v38, %v541_v59  ;;  %v3082_v41 = vmul.f32 %v3072_v38, %v543_v60  ;;  %v3085_v42 = vmul.f32 %v3072_v38, %v545_v61 }
 0x1cd   : >> { %v557_v39 = vand.u32 2147483647, %v3076_v40  ;;  %v560_v19 = vand.u32 2139095040, %v3076_v40  ;;  %v815_v20 = vmul.f32 %v2977_v13, %v3085_v42  ;;  %v816_v21 = vmul.f32 %v2979_v14, %v3082_v41 }
 0x1ce   : >> { %v818_v22 = vmul.f32 %v2979_v14, %v3079_v43  ;;  %v819_v23 = vmul.f32 %v3085_v42, %v2975_v12  ;;  %v821_v27 = vmul.f32 %v3082_v41, %v2975_v12  ;;  %v822_v46 = vmul.f32 %v2977_v13, %v3079_v43 }
 0x1cf   : >> { %v561_v25 = vshrl.u32 %v560_v19, 23  ;;  %v564_v26 = vand.u32 8388607, %v557_v39  ;;  %v3101_v28 = vsub.f32 %v815_v20, %v816_v21  ;;  %v825_v48 = vmul.f32 %v796_v7, %v3079_v43 }
 0x1d0   : >> { %v3103_v44 = vsub.f32 %v818_v22, %v819_v23  ;;  %v826_v54 = vmul.f32 %v798_v29, %v3082_v41  ;;  %v828_v45 = vmul.f32 %v800_v33, %v3085_v42  ;;  %v3110_v47 = vsub.f32 %v821_v27, %v822_v46 }
 0x1d1   : >> { %v2379_v49 = vadd.s32 4294967169, %v561_v25  ;;  %v565_v50 = vor.u32 8388608, %v564_v26  ;;  %v830_v51 = vmul.f32 %v802_v30, %v3079_v43  ;;  %v831_v52 = vmul.f32 %v805_v8, %v3082_v41 }
 0x1d2   : >> { %v833_v53 = vmul.f32 %v807_v16, %v3085_v42  ;;  %v827_v57 = vadd.f32 %v826_v54, %v825_v48  ;;  %v835_v58 = vmul.f32 %v3065_v17, %v3079_v43  ;;  %v836_v60 = vmul.f32 %v3067_v18, %v3082_v41 }
 0x1d3   : >> { %v567_v55 = vadd.s32 1, %v2379_v49  ;;  %v3115_v56 = vshll.u32 %v565_v50, 8  ;;  %v832_v59 = vadd.f32 %v831_v52, %v830_v51  ;;  %v838_v61 = vmul.f32 %v3070_v37, %v3085_v42 }
 0x1d4   : >> { %v868_v62 = vmul.f32 %v3101_v28, %v796_v7  ;;  %v3124_v63 = vadd.f32 %v828_v45, %v827_v57  ;;  %v869_v0 = vmul.f32 %v3103_v44, %v798_v29  ;;  %v871_v1 = vmul.f32 %v3110_v47, %v800_v33 }
 0x1d5   : >> { %vm568_vm0 = vcmp.gt.s32.totalorder %v567_v55, 0  ;;  %v3128_v3 = vadd.f32 %v833_v53, %v832_v59  ;;  %v837_v4 = vadd.f32 %v836_v60, %v835_v58  ;;  %v873_v5 = vmul.f32 %v3101_v28, %v802_v30 }
 0x1d6   : >> { %v569_v2 = vsel %vm568_vm0, %v567_v55, 0  ;;  %v840_v31 = vmul.f32 %v3124_v63, %v3079_v43  ;;  %v870_v32 = vadd.f32 %v869_v0, %v868_v62  ;;  %v874_v29 = vmul.f32 %v3103_v44, %v805_v8 }
 0x1d7   : >> { %v570_v9 = vshrl.u32 %v569_v2, 5  ;;  %v571_v24 = vand.u32 31, %v569_v2  ;;  %v3133_v34 = vadd.f32 %v838_v61, %v837_v4  ;;  %v841_v6 = vmul.f32 %v3128_v3, %v3082_v41 }
 0x1d8   : >> { %v876_v33 = vmul.f32 %v3110_v47, %v807_v16  ;;  %v3966_v30 = vmov 2475754826   ;;  %v3947_v20 = vmov 2102212464   ;;  %v3945_v22 = vmov 920167782  }
 0x1d9   : >> { %v572_v7 = vsub.s32 32, %v571_v24  ;;  %v574_v11 = vshll.u32 %v3968_v10, %v571_v24  ;;  %v577_v35 = vshll.u32 %v3966_v30, %v571_v24  ;;  %v580_v19 = vshll.u32 %v3964_v36, %v571_v24 }
 0x1da   : >> { %v583_v21 = vshll.u32 %v3947_v20, %v571_v24  ;;  %v586_v23 = vshll.u32 %v3945_v22, %v571_v24  ;;  %vm589_vm1 = vcmp.lt.s32.totalorder %v570_v9, 1  ;;  %vm590_vm2 = vcmp.lt.s32.totalorder %v570_v9, 2 }
 0x1db   : >> { %v573_v8 = vshrl.u32 %v3968_v10, %v572_v7  ;;  %v575_v16 = vshrl.u32 %v3966_v30, %v572_v7  ;;  %v578_v25 = vshrl.u32 %v3964_v36, %v572_v7  ;;  %v581_v26 = vshrl.u32 %v3947_v20, %v572_v7 }
 0x1dc   : >> { %v584_v27 = vshrl.u32 %v3945_v22, %v572_v7  ;;  %v3943_v46 = vmov 1326507024   ;;  %vm591_vm3 = vcmp.lt.s32.totalorder %v570_v9, 3  ;;  %vm592_vm4 = vcmp.lt.s32.totalorder %v570_v9, 4 }
 0x1dd   : >> { %v587_v48 = vshrl.u32 %v3943_v46, %v572_v7  ;;  %v576_v49 = vor.u32 %v575_v16, %v574_v11  ;;  %v579_v50 = vor.u32 %v578_v25, %v577_v35  ;;  %v582_v54 = vor.u32 %v581_v26, %v580_v19 }
 0x1de   : >> { %v842_v45 = vadd.f32 %v841_v6, %v840_v31  ;;  %v585_v51 = vor.u32 %v584_v27, %v583_v21  ;;  %v843_v53 = vmul.f32 %v3133_v34, %v3085_v42  ;;  %v3152_v55 = vadd.f32 %v871_v1, %v870_v32 }
 0x1df   : >> { %v588_v52 = vor.u32 %v587_v48, %v586_v23  ;;  %v593_v57 = vsel %vm589_vm1, %v573_v8, %v576_v49  ;;  %v594_v58 = vsel %vm592_vm4, %v582_v54, 2102212464  ;;  %v597_v59 = vsel %vm589_vm1, %v576_v49, %v579_v50 }
 0x1e0   : >> { %v601_v60 = vsel %vm589_vm1, %v579_v50, %v582_v54  ;;  %v595_v61 = vsel %vm591_vm3, %v579_v50, %v594_v58  ;;  %v598_v62 = vsel %vm592_vm4, %v585_v51, 920167782  ;;  %v3158_v2 = vadd.f32 %v843_v53, %v842_v45 }
 0x1e1   : >> { %v602_v0 = vsel %vm592_vm4, %v588_v52, 1326507024  ;;  %v599_v4 = vsel %vm591_vm3, %v582_v54, %v598_v62  ;;  %v875_v31 = vadd.f32 %v874_v29, %v873_v5  ;;  %v596_v1 = vsel %vm590_vm2, %v593_v57, %v595_v61 }
 0x1e2   : >> { %v603_v24 = vsel %vm591_vm3, %v585_v51, %v602_v0  ;;  %v600_v32 = vsel %vm590_vm2, %v597_v59, %v599_v4  ;;  %v878_v7 = vmul.f32 %v3101_v28, %v3065_v17  ;;  %v879_v5 = vmul.f32 %v3103_v44, %v3067_v18 }
 0x1e3   : >> { %v604_v6 = vsel %vm590_vm2, %v601_v60, %v603_v24  ;;  %v3172_v19 = vmul.u32.u64.low %v3115_v56, %v600_v32  ;;  %v3173_v21 = vmul.u32.u64.high %v3115_v56, %v600_v32, %v3172_v19  ;;  %v3175_v23 = vadd.f32 %v876_v33, %v875_v31 }
 0x1e4   : >> { %v3168_v11 = vmul.u32.u64.low %v3115_v56, %v604_v6  ;;  %v3169_v35 = vmul.u32.u64.high %v3115_v56, %v604_v6, %v3168_v11  ;;  %v881_v9 = vmul.f32 %v3110_v47, %v3070_v37  ;;  %v883_v29 = vmul.f32 %v3152_v55, %v3079_v43 }
 0x1e5   : >> { %v612_v17 = vmul.u32 %v3115_v56, %v596_v1  ;;  %v880_v8 = vadd.f32 %v879_v5, %v878_v7  ;;  %v884_v16 = vmul.f32 %v3175_v23, %v3082_v41  ;;  %v615_v33 = vadd.s32 1, %v3173_v21 }
 0x1e6   : >> { %vm614_vm5 = vc.u32 %v3169_v35, %v3172_v19  ;;  %v613_v57 = vadd.s32 %v3172_v19, %v3169_v35  ;;  %vm559_vm7 = vcmp.lt.s32.totalorder %v3076_v40, 0  ;;  %vm558_vm8 = vcmp.le.f32.partialorder %v557_v39, 0.7853982 }
 0x1e7   : >> { %v3188_v25 = vadd.f32 %v881_v9, %v880_v8  ;;  %v885_v26 = vadd.f32 %v884_v16, %v883_v29  ;;  %v616_v18 = vsel %vm614_vm5, %v615_v33, %v3173_v21  ;;  %v934_v8 = vstv %s4190_s24  ;;  %s4225_s24 = sld [smem:[#allocation91_spill]] }
 0x1e8   : >> { %v617_v27 = vadd.s32 %v616_v18, %v612_v17  ;;  %v936_v16 = vstv %s4191_s14  ;;  %v939_v33 = vstv %s4192_s15  ;;  %v966_v18 = vstv %s4194_s17  ;;  %s4216_s14 = sld [smem:[#allocation75_spill]] }
 0x1e9   : >> { %v886_v37 = vmul.f32 %v3188_v25, %v3085_v42  ;;  %vm649_vm0 = vweird.f32 %v3076_v40  ;;  %s4217_s15 = sld [smem:[#allocation76_spill]] }
 0x1ea   : >> { %v618_v48 = vadd.s32 536870912, %v617_v27  ;;  %s4219_s17 = sld [smem:[#allocation78_spill]] }
 0x1eb   : >> { %v3193_v49 = vadd.f32 %v886_v37, %v885_v26  ;;  %v964_v26 = vstv %s4193_s16  ;;  %v969_v37 = vstv %s4196_s21  ;;  %s4218_s16 = sld [smem:[#allocation77_spill]] }
 0x1ec   : >> { %v619_v56 = vshrl.u32 %v618_v48, 30  ;;  %s4224_s21 = sld [smem:[#allocation90_spill]] }
 0x1ee   : >> { %v620_v50 = vshll.u32 %v619_v56, 30  ;;  %v643_v7 = vsub.s32 4, %v619_v56 }
 0x1f0   : >> { %v621_v54 = vsub.s32 %v617_v27, %v620_v50  ;;  %v644_v19 = vsel %vm559_vm7, %v643_v7, %v619_v56  ;;  %v942_v27 = vstv %s4195_s19  ;;  %v972_v50 = vstv %s4197_s27  ;;  %s4220_s19 = sld [smem:[#allocation86_spill]] }
 0x1f1   : >> { %v646_v5 = vsel %vm558_vm8, 0, %v644_v19  ;;  %s4226_s27 = sld [smem:[#allocation97_spill]] }
 0x1f2   : >> { %v623_v45 = vsub.s32 0, %v621_v54  ;;  %v753_v9 = vadd.s32 3, %v646_v5  ;;  %v650_v29 = vand.u32 3, %v646_v5 }
 0x1f4   : >> { %v2380_v51 = vmin.u32 %v623_v45, %v621_v54  ;;  %v754_v17 = vand.u32 3, %v753_v9  ;;  %vm655_vm9 = vcmp.eq.s32.totalorder %v650_v29, 2  ;;  %vm652_vm11 = vcmp.eq.s32.totalorder %v650_v29, 0 }
 0x1f5   : >> { %vm651_vm13 = vcmp.lt.s32.totalorder %v650_v29, 2 }
 0x1f6   : >> { %v625_v52 = vclz %v2380_v51  ;;  %vm759_vm10 = vcmp.eq.s32.totalorder %v754_v17, 2  ;;  %vm756_vm12 = vcmp.eq.s32.totalorder %v754_v17, 0  ;;  %vm755_vm14 = vcmp.lt.s32.totalorder %v754_v17, 2 }
 0x1f8   : >> { %v2381_v53 = vadd.s32 4294967294, %v625_v52  ;;  %v1003_v52 = vstv %s4198_s28  ;;  %s4227_s28 = sld [smem:[#allocation98_spill]] }
 0x1fa   : >> { %vm2382_vm6 = vcmp.lt.s32.totalorder %v2381_v53, 0 }
 0x1fb   : >> { %v628_v58 = vsel %vm2382_vm6, 0, %v2381_v53 }
 0x1fc   : >> { %v629_v59 = vsub.s32 32, %v628_v58  ;;  %v630_v60 = vshll.u32 %v621_v54, %v628_v58  ;;  %v633_v61 = vsub.s32 4294967266, %v628_v58  ;;  %v1005_v58 = vstv %s4199_s29  ;;  %s4228_s29 = sld [smem:[#allocation99_spill]] }
 0x1fe   : >> { %v631_v62 = vshrl.u32 %v613_v57, %v629_v59  ;;  %v634_v0 = vadd.s32 127, %v633_v61  ;;  %v1008_v59 = vstv %s4200_s30  ;;  %s4229_s30 = sld [smem:[#allocation100_spill]] }
 0x200   : >> { %v632_v4 = vor.u32 %v631_v62, %v630_v60  ;;  %v635_v24 = vshll.u32 %v634_v0, 23  ;;  %v1011_v62 = vstv %s4201_s6  ;;  %v1042_v0 = vstv %s4203_s10  ;;  %s4213_s6 = sld [smem:[#allocation85_spill]] }
 0x201   : >> { %s4215_s10 = sld [smem:[#allocation74_spill]] }
 0x202   : >> { %v636_v31 = vor.u32 4788187, %v635_v24  ;;  %v639_v1 = vcvt.s32.f32 %v632_v4 }
 0x204   : >> { %v637_v32 = vand.u32 2147483647, %v636_v31  ;;  %v1044_v31 = vstv %s4204_s20  ;;  %s4222_s20 = sld [smem:[#allocation88_spill]] }
 0x206   : >> { %v640_v6 = vmul.f32 %v639_v1, %v637_v32  ;;  %v1047_v1 = vstv %s4205_s0  ;;  %s4214_s0 = sld [smem:[#allocation96_spill]] }
 0x208   : >> { %v641_v11 = vxor.u32 2147483648, %v640_v6 }
 0x20a   : >> { %v642_v35 = vsel %vm559_vm7, %v641_v11, %v640_v6 }
 0x20b   : >> { %v645_v21 = vsel %vm558_vm8, %v3076_v40, %v642_v35 }
 0x20c   : >> { %2476 = vcosq.f32 %v645_v21 }
 0x20d   : >> { %2478 = vsinq.f32 %v645_v21 }
 0x219   : >> { %v2477_v39 = vpop.eup %2476 }
 0x21a   : >> { %v2479_v48 = vpop.eup %2478  ;;  %v656_v56 = vxor.u32 2147483648, %v2477_v39 }
 0x21b   : >> { %v653_v54 = vxor.u32 2147483648, %v2479_v48 }
 0x21c   : >> { %v657_v45 = vsel %vm655_vm9, %v656_v56, %v2479_v48  ;;  %v761_v51 = vsel %vm759_vm10, %v656_v56, %v2479_v48 }
 0x21d   : >> { %v654_v53 = vsel %vm652_vm11, %v2477_v39, %v653_v54  ;;  %v758_v57 = vsel %vm756_vm12, %v2477_v39, %v653_v54 }
 0x21e   : >> { %v658_v60 = vsel %vm651_vm13, %v654_v53, %v657_v45  ;;  %v762_v61 = vsel %vm755_vm14, %v758_v57, %v761_v51 }
 0x21f   : >> { %v659_v4 = vsel %vm649_vm0, nan, %v658_v60  ;;  %v763_v24 = vsel %vm649_vm0, nan, %v762_v61 }
 0x220   : >> { %v765_v32 = vmul.f32 %v3072_v38, %v763_v24  ;;  %v767_v6 = vmul.f32 %v659_v4, %v2975_v12  ;;  %v768_v40 = vmul.f32 %v763_v24, %v3079_v43  ;;  %v770_v7 = vmul.f32 %v2977_v13, %v659_v4 }
 0x221   : >> { %v771_v11 = vmul.f32 %v763_v24, %v3082_v41  ;;  %v773_v35 = vmul.f32 %v2979_v14, %v659_v4  ;;  %v774_v19 = vmul.f32 %v763_v24, %v3085_v42  ;;  %v846_v21 = vmul.f32 %v3158_v2, %v763_v24 }
 0x222   : >> { %v766_v5 = vsel %vm764_vm15, %v765_v32, 1.0  ;;  %v3227_v9 = vadd.f32 %v768_v40, %v767_v6  ;;  %v847_v38 = vmul.f32 %v659_v4, %v3079_v43  ;;  %v854_v29 = vmul.f32 %v659_v4, %v3082_v41 }
 0x223   : >> { %v3231_v17 = vadd.f32 %v771_v11, %v770_v7  ;;  %v3233_v39 = vadd.f32 %v774_v19, %v773_v35  ;;  %v824_v48 = vsub.f32 %v659_v4, %v766_v5  ;;  %v848_v56 = vmul.f32 %v3124_v63, %v766_v5 }
 0x224   : >> { %v852_v54 = vmul.f32 %v846_v21, %v2975_v12  ;;  %v855_v45 = vmul.f32 %v3128_v3, %v766_v5  ;;  %v859_v15 = vmul.f32 %v2977_v13, %v846_v21  ;;  %v861_v51 = vmul.f32 %v659_v4, %v3085_v42 }
 0x225   : >> { %v845_v53 = vmul.f32 %v3158_v2, %v824_v48  ;;  %v849_v57 = vadd.f32 %v848_v56, %v847_v38  ;;  %v862_v60 = vmul.f32 %v3133_v34, %v766_v5  ;;  %v866_v61 = vmul.f32 %v2979_v14, %v846_v21 }
 0x226   : >> { %v856_v32 = vadd.f32 %v855_v45, %v854_v29  ;;  %v888_v6 = vmul.f32 %v3193_v49, %v824_v48  ;;  %v889_v63 = vmul.f32 %v3193_v49, %v763_v24  ;;  %v890_v40 = vmul.f32 %v3101_v28, %v659_v4 }
 0x227   : >> { %v850_v3 = vmul.f32 %v845_v53, %v3079_v43  ;;  %v857_v7 = vmul.f32 %v845_v53, %v3082_v41  ;;  %v863_v11 = vadd.f32 %v862_v60, %v861_v51  ;;  %v864_v35 = vmul.f32 %v845_v53, %v3085_v42 }
 0x228   : >> { %v891_v2 = vmul.f32 %v3152_v55, %v766_v5  ;;  %v893_v34 = vmul.f32 %v888_v6, %v3079_v43  ;;  %v895_v19 = vmul.f32 %v889_v63, %v2975_v12  ;;  %v897_v21 = vmul.f32 %v3103_v44, %v659_v4 }
 0x229   : >> { %v851_v38 = vadd.f32 %v850_v3, %v849_v57  ;;  %v858_v29 = vadd.f32 %v857_v7, %v856_v32  ;;  %v865_v49 = vadd.f32 %v864_v35, %v863_v11  ;;  %v898_v28 = vmul.f32 %v3175_v23, %v766_v5 }
 0x22a   : >> { %v892_v24 = vadd.f32 %v891_v2, %v890_v40  ;;  %v900_v48 = vmul.f32 %v888_v6, %v3082_v41  ;;  %v902_v56 = vmul.f32 %v2977_v13, %v889_v63  ;;  %v904_v45 = vmul.f32 %v3110_v47, %v659_v4 }
 0x22b   : >> { %v853_v55 = vsub.f32 %v851_v38, %v852_v54  ;;  %v860_v43 = vsub.f32 %v858_v29, %v859_v15  ;;  %v867_v51 = vsub.f32 %v865_v49, %v866_v61  ;;  %v899_v12 = vadd.f32 %v898_v28, %v897_v21 }
 0x22c   : >> { %v894_v44 = vadd.f32 %v893_v34, %v892_v24  ;;  %v905_v53 = vmul.f32 %v3188_v25, %v766_v5  ;;  %v907_v23 = vmul.f32 %v888_v6, %v3085_v42  ;;  %v909_v57 = vmul.f32 %v2979_v14, %v889_v63 }
 0x22d   : >> { %v901_v41 = vadd.f32 %v900_v48, %v899_v12  ;;  %v911_v60 = vmul.f32 %v853_v55, %v853_v55  ;;  %v912_v13 = vmul.f32 %v860_v43, %v860_v43  ;;  %v914_v32 = vmul.f32 %v867_v51, %v867_v51 }
 0x22e   : >> { %v896_v47 = vsub.f32 %v894_v44, %v895_v19  ;;  %v906_v4 = vadd.f32 %v905_v53, %v904_v45  ;;  %v935_v54 = vmul.f32 %v934_v8, %v3227_v9  ;;  %v937_v15 = vmul.f32 %v936_v16, %v3231_v17 }
 0x22f   : >> { %v903_v25 = vsub.f32 %v901_v41, %v902_v56  ;;  %v913_v5 = vadd.f32 %v912_v13, %v911_v60  ;;  %v940_v14 = vmul.f32 %v939_v33, %v3233_v39  ;;  %v965_v42 = vmul.f32 %v964_v26, %v3227_v9 }
 0x230   : >> { %v908_v61 = vadd.f32 %v907_v23, %v906_v4  ;;  %v916_v6 = vmul.f32 %v896_v47, %v853_v55  ;;  %v921_v63 = vmul.f32 %v896_v47, %v896_v47  ;;  %v938_v40 = vadd.f32 %v937_v15, %v935_v54 }
 0x231   : >> { %v915_v8 = vadd.f32 %v914_v32, %v913_v5  ;;  %v917_v3 = vmul.f32 %v903_v25, %v860_v43  ;;  %v922_v7 = vmul.f32 %v903_v25, %v903_v25  ;;  %v967_v16 = vmul.f32 %v966_v18, %v3231_v17 }
 0x232   : >> { %v910_v11 = vsub.f32 %v908_v61, %v909_v57  ;;  %v941_v33 = vadd.f32 %v940_v14, %v938_v40  ;;  %v970_v26 = vmul.f32 %v969_v37, %v3233_v39  ;;  %v1004_v35 = vmul.f32 %v1003_v52, %v3227_v9 }
 0x233   : >> { %v918_v2 = vadd.f32 %v917_v3, %v916_v6  ;;  %v923_v34 = vadd.f32 %v922_v7, %v921_v63  ;;  %v968_v19 = vadd.f32 %v967_v16, %v965_v42  ;;  %v1006_v21 = vmul.f32 %v1005_v58, %v3231_v17 }
 0x234   : >> { %v919_v38 = vmul.f32 %v910_v11, %v867_v51  ;;  %v924_v29 = vmul.f32 %v910_v11, %v910_v11  ;;  %v943_v18 = vsub.f32 %v941_v33, %v942_v27  ;;  %v1009_v49 = vmul.f32 %v1008_v59, %v3233_v39 }
 0x235   : >> { %v971_v37 = vadd.f32 %v970_v26, %v968_v19  ;;  %v1007_v28 = vadd.f32 %v1006_v21, %v1004_v35  ;;  %v1043_v52 = vmul.f32 %v1042_v0, %v3227_v9  ;;  %v1045_v24 = vmul.f32 %v1044_v31, %v3231_v17 }
 0x236   : >> { %v920_v48 = vadd.f32 %v919_v38, %v918_v2  ;;  %v925_v56 = vadd.f32 %v924_v29, %v923_v34  ;;  %v944_v58 = vmul.f32 1.442695, %v943_v18  ;;  %v1048_v27 = vmul.f32 %v1047_v1, %v3233_v39 }
 0x237   : >> { %v973_v45 = vsub.f32 %v971_v37, %v972_v50  ;;  %v1010_v59 = vadd.f32 %v1009_v49, %v1007_v28  ;;  %v1046_v55 = vadd.f32 %v1045_v24, %v1043_v52  ;;  %v1050_v31 = vstv %s4206_s2  ;;  %s4221_s2 = sld [smem:[#allocation87_spill]] }
 0x238   : >> { %v3300_v43 = vmul.f32 %v925_v56, %v915_v8  ;;  %v3302_v0 = vmul.f32 %v920_v48, %v920_v48  ;;  %2480 = vpow2.f32 %v944_v58  ;;  %v946_v23 = vstv %s4207_s4  ;;  %s4230_s4 = sld [smem:[#allocation101_spill]] }
 0x239   : >> { %v974_v51 = vmul.f32 1.442695, %v973_v45  ;;  %v1012_v1 = vsub.f32 %v1010_v59, %v1011_v62  ;;  %v1049_v50 = vadd.f32 %v1048_v27, %v1046_v55  ;;  %v948_v57 = vstv %s4208_s5  ;;  %s4232_s5 = sld [smem:[#allocation103_spill]] }
 0x23a   : >> { %v950_v62 = vstv %s4209_s7  ;;  %v976_v41 = vstv %s4210_s8  ;;  %v952_v13 = vstv %s4211_s9  ;;  %v978_v32 = vstv %s4212_s11  ;;  %s4233_s7 = sld [smem:[#allocation104_spill]] }
 0x23b   : >> { %2482 = vpow2.f32 %v974_v51  ;;  %v1013_v44 = vmul.f32 1.442695, %v1012_v1  ;;  %v1051_v53 = vsub.f32 %v1049_v50, %v1050_v31  ;;  %v980_v47 = vstv %s4213_s6  ;;  %s4234_s8 = sld [smem:[#allocation109_spill]] }
 0x23c   : >> { %v1015_v4 = vstv %s4214_s0  ;;  %v954_v54 = vstv %s4215_s10  ;;  %v956_v15 = vstv %s4216_s14  ;;  %v958_v25 = vstv %s4217_s15  ;;  %s4235_s9 = sld [smem:[#allocation110_spill]] }
 0x23d   : >> { %2484 = vpow2.f32 %v1013_v44  ;;  %v1052_v60 = vmul.f32 1.442695, %v1051_v53  ;;  %v960_v5 = vstv %s4218_s16  ;;  %v962_v14 = vstv %s4219_s17  ;;  %s4236_s11 = sld [smem:[#allocation111_spill]] }
 0x23e   : >> { %v982_v42 = vstv %s4220_s19  ;;  %v984_v61 = vstv %s4221_s2  ;;  %v986_v6 = vstv %s4222_s20  ;;  %v988_v63 = vstv %s4223_s12  ;;  %s4237_s6 = sld [smem:[#allocation112_spill]] }
 0x23f   : >> { %v990_v40 = vstv %s4224_s21  ;;  %v992_v8 = vstv %s4225_s24  ;;  %s4238_s0 = sld [smem:[#allocation113_spill]]  ;;  %2486 = vpow2.f32 %v1052_v60  ;;  %v1017_v3 = vstv %s4226_s27 }
 0x240   : >> { %s4239_s10 = sld [smem:[#allocation114_spill]]  ;;  %v1019_v7 = vstv %s4227_s28  ;;  %v1021_v16 = vstv %s4228_s29  ;;  %v1023_v11 = vstv %s4229_s30  ;;  %v1025_v33 = vstv %s4230_s4 }
 0x241   : >> { %s4240_s14 = sld [smem:[#allocation115_spill]]  ;;  %v1027_v26 = vstv %s4231_s23  ;;  %v1029_v35 = vstv %s4232_s5  ;;  %v1031_v2 = vstv %s4233_s7  ;;  %v1054_v19 = vstv %s4234_s8 }
 0x242   : >> { %v1056_v21 = vstv %s4235_s9  ;;  %s4241_s24 = sld [smem:[#allocation116_spill]] }
 0x243   : >> { %v1058_v38 = vstv %s4236_s11  ;;  %s4242_s23 = sld [smem:[#allocation117_spill]] }
 0x244   : >> { %v1060_v29 = vstv %s4237_s6  ;;  %s4246_s15 = sld [smem:[#allocation118_spill]] }
 0x245   : >> { %v2481_v34 = vpop.eup %2480  ;;  %v1062_v49 = vstv %s4238_s0  ;;  %s4247_s16 = sld [smem:[#allocation119_spill]] }
 0x246   : >> { %v947_v18 = vmul.f32 %v2481_v34, %v946_v23  ;;  %v1064_v37 = vstv %s4239_s10  ;;  %v949_v52 = vmul.f32 %v2481_v34, %v948_v57  ;;  %v951_v24 = vmul.f32 %v2481_v34, %v950_v62  ;;  %s4248_s17 = sld [smem:[#allocation120_spill]] }
 0x247   : >> { %v1066_v28 = vstv %s4240_s14  ;;  %v953_v48 = vmul.f32 %v2481_v34, %v952_v13  ;;  %v955_v56 = vmul.f32 %v2481_v34, %v954_v54  ;;  %v957_v27 = vmul.f32 %v2481_v34, %v956_v15  ;;  %s4249_s19 = sld [smem:[#allocation131_spill]] }
 0x248   : >> { %v2483_v58 = vpop.eup %2482  ;;  %v959_v45 = vmul.f32 %v2481_v34, %v958_v25  ;;  %v961_v59 = vmul.f32 %v2481_v34, %v960_v5  ;;  %v963_v55 = vmul.f32 %v2481_v34, %v962_v14  ;;  %v1068_v54 = vstv %s4241_s24  ;;  %s4250_s21 = sld [smem:[#allocation132_spill]] }
 0x249   : >> { %v977_v31 = vmul.f32 %v2483_v58, %v976_v41  ;;  %v979_v51 = vmul.f32 %v2483_v58, %v978_v32  ;;  %v981_v1 = vmul.f32 %v2483_v58, %v980_v47  ;;  %v983_v50 = vmul.f32 %v2483_v58, %v982_v42  ;;  %s4251_s27 = sld [smem:[#allocation121_spill]] }
 0x24a   : >> { %v2485_v44 = vpop.eup %2484  ;;  %v985_v53 = vmul.f32 %v2483_v58, %v984_v61  ;;  %v987_v23 = vmul.f32 %v2483_v58, %v986_v6  ;;  %v989_v60 = vmul.f32 %v2483_v58, %v988_v63  ;;  %v991_v12 = vmul.f32 %v2483_v58, %v990_v40  ;;  %s4252_s28 = sld [smem:[#allocation133_spill]] }
 0x24b   : >> { %v993_v57 = vmul.f32 %v2483_v58, %v992_v8  ;;  %v994_v62 = vadd.f32 %v977_v31, %v947_v18  ;;  %v995_v13 = vadd.f32 %v979_v51, %v949_v52  ;;  %v996_v46 = vadd.f32 %v981_v1, %v951_v24  ;;  %s4254_s29 = sld [smem:[#allocation134_spill]] }
 0x24c   : >> { %v997_v15 = vadd.f32 %v983_v50, %v953_v48  ;;  %v998_v22 = vadd.f32 %v985_v53, %v955_v56  ;;  %v999_v25 = vadd.f32 %v987_v23, %v957_v27  ;;  %v1000_v5 = vadd.f32 %v989_v60, %v959_v45  ;;  %v2487_v6 = vpop.eup %2486  ;;  %s4255_s30 = sld [smem:[#allocation144_spill]] }
 0x24d   : >> { %v1001_v14 = vadd.f32 %v991_v12, %v961_v59  ;;  %v1002_v41 = vadd.f32 %v993_v57, %v963_v55  ;;  %v1016_v32 = vmul.f32 %v2485_v44, %v1015_v4  ;;  %v1018_v47 = vmul.f32 %v2485_v44, %v1017_v3  ;;  %s4256_s12 = sld [smem:[#allocation145_spill]] }
 0x24e   : >> { %v1020_v42 = vmul.f32 %v2485_v44, %v1019_v7  ;;  %v1022_v34 = vmul.f32 %v2485_v44, %v1021_v16  ;;  %v1070_v61 = vstv %s4242_s23  ;;  %v1024_v63 = vmul.f32 %v2485_v44, %v1023_v11  ;;  %s4257_s20 = sld [smem:[#allocation146_spill]] }
 0x24f   : >> { %v1026_v40 = vmul.f32 %v2485_v44, %v1025_v33  ;;  %v1028_v20 = vmul.f32 %v2485_v44, %v1027_v26  ;;  %v1030_v8 = vmul.f32 %v2485_v44, %v1029_v35  ;;  %v1032_v18 = vmul.f32 %v2485_v44, %v1031_v2  ;;  %s4258_s2 = sld [smem:[#allocation147_spill]] }
 0x250   : >> { %v1033_v52 = vadd.f32 %v1016_v32, %v994_v62  ;;  %v1034_v58 = vadd.f32 %v1018_v47, %v995_v13  ;;  %v1035_v24 = vadd.f32 %v1020_v42, %v996_v46  ;;  %v1036_v48 = vadd.f32 %v1022_v34, %v997_v15  ;;  %s4259_s4 = sld [smem:[#allocation157_spill]] }
 0x251   : >> { %v1037_v56 = vadd.f32 %v1024_v63, %v998_v22  ;;  %v1038_v27 = vadd.f32 %v1026_v40, %v999_v25  ;;  %v1039_v45 = vadd.f32 %v1028_v20, %v1000_v5  ;;  %v1040_v12 = vadd.f32 %v1030_v8, %v1001_v14  ;;  %s4260_s5 = sld [smem:[#allocation158_spill]] }
 0x252   : >> { %v1041_v59 = vadd.f32 %v1032_v18, %v1002_v41  ;;  %v1055_v4 = vmul.f32 %v2487_v6, %v1054_v19  ;;  %v1057_v3 = vmul.f32 %v2487_v6, %v1056_v21  ;;  %v1059_v7 = vmul.f32 %v2487_v6, %v1058_v38  ;;  %s4261_s7 = sld [smem:[#allocation159_spill]] }
 0x253   : >> { %v1061_v16 = vmul.f32 %v2487_v6, %v1060_v29  ;;  %v1063_v55 = vmul.f32 %v2487_v6, %v1062_v49  ;;  %v1065_v31 = vmul.f32 %v2487_v6, %v1064_v37  ;;  %v1067_v11 = vmul.f32 %v2487_v6, %v1066_v28  ;;  %s4262_s8 = sld [smem:[#allocation160_spill]] }
 0x254   : >> { %v1069_v33 = vmul.f32 %v2487_v6, %v1068_v54  ;;  %v1071_v26 = vmul.f32 %v2487_v6, %v1070_v61  ;;  %v1072_v35 = vadd.f32 %v1055_v4, %v1033_v52  ;;  %v1073_v2 = vadd.f32 %v1057_v3, %v1034_v58  ;;  %s4263_s9 = sld [smem:[#allocation122_spill]] }
 0x255   : >> { %v1074_v51 = vadd.f32 %v1059_v7, %v1035_v24  ;;  %v1075_v1 = vadd.f32 %v1061_v16, %v1036_v48  ;;  %v1076_v46 = vadd.f32 %v1063_v55, %v1037_v56  ;;  %v1077_v50 = vadd.f32 %v1065_v31, %v1038_v27  ;;  %s4264_s11 = sld [smem:[#allocation123_spill]] }
 0x256   : >> { %v1078_v22 = vadd.f32 %v1067_v11, %v1039_v45  ;;  %v1079_v44 = vadd.f32 %v1069_v33, %v1040_v12  ;;  %v1080_v20 = vadd.f32 %v1071_v26, %v1041_v59  ;;  %v1081_v53 = vmul.f32 %v1072_v35, %v3227_v9  ;;  %s4265_s6 = sld [smem:[#allocation124_spill]] }
 0x257   : >> { %v1082_v19 = vmul.f32 %v1073_v2, %v3231_v17  ;;  %v1084_v21 = vmul.f32 %v1074_v51, %v3233_v39  ;;  %v1322_v38 = vmul.f32 %v1075_v1, %v3227_v9  ;;  %v1329_v28 = vmul.f32 %v1076_v46, %v3231_v17  ;;  %s4266_s0 = sld [smem:[#allocation135_spill]] }
 0x258   : >> { %v1323_v29 = vmul.f32 %v1078_v22, %v3231_v17  ;;  %v1325_v49 = vmul.f32 %v1079_v44, %v3233_v39  ;;  %v1328_v37 = vmul.f32 %v1078_v22, %v3227_v9  ;;  %v1331_v60 = vmul.f32 %v1080_v20, %v3233_v39  ;;  %s4267_s10 = sld [smem:[#allocation136_spill]] }
 0x259   : >> { %v1083_v23 = vadd.f32 %v1082_v19, %v1081_v53  ;;  %v1334_v57 = vmul.f32 %v1079_v44, %v3227_v9  ;;  %v1335_v62 = vmul.f32 %v1080_v20, %v3231_v17  ;;  %v1337_v15 = vmul.f32 %v1077_v50, %v3233_v39  ;;  %s4268_s14 = sld [smem:[#allocation137_spill]] }
 0x25a   : >> { %v1324_v13 = vadd.f32 %v1323_v29, %v1322_v38  ;;  %v1330_v54 = vadd.f32 %v1329_v28, %v1328_v37  ;;  %s4269_s24 = sld [smem:[#allocation125_spill]] }
 0x25b   : >> { %v1085_v25 = vadd.f32 %v1084_v21, %v1083_v23  ;;  %v1336_v5 = vadd.f32 %v1335_v62, %v1334_v57  ;;  %s4270_s23 = sld [smem:[#allocation126_spill]] }
 0x25c   : >> { %v1326_v14 = vadd.f32 %v1325_v49, %v1324_v13  ;;  %v1332_v41 = vadd.f32 %v1331_v60, %v1330_v54 }
 0x25d   : >> { %v1086_v32 = vmul.f32 %v1085_v25, %v3227_v9  ;;  %v1088_v47 = vmul.f32 %v1085_v25, %v3231_v17  ;;  %v1090_v42 = vmul.f32 %v1085_v25, %v3233_v39  ;;  %v1338_v34 = vadd.f32 %v1337_v15, %v1336_v5 }
 0x25e   : >> { %v1327_v61 = vadd.f32 %v1326_v14, %v1072_v35  ;;  %v1333_v6 = vadd.f32 %v1332_v41, %v1073_v2 }
 0x25f   : >> { %v1087_v63 = vsub.f32 %v1072_v35, %v1086_v32  ;;  %v1089_v40 = vsub.f32 %v1073_v2, %v1088_v47  ;;  %v1091_v8 = vsub.f32 %v1074_v51, %v1090_v42  ;;  %v1339_v18 = vadd.f32 %v1338_v34, %v1074_v51 }
 0x260   : >> { %v1340_v52 = vmul.f32 %v1327_v61, %v3227_v9  ;;  %v1343_v58 = vmul.f32 %v1333_v6, %v3227_v9  ;;  %v1347_v24 = vmul.f32 %v1327_v61, %v3231_v17  ;;  %v1349_v48 = vmul.f32 %v1333_v6, %v3231_v17 }
 0x261   : >> { %v1092_v56 = vmul.f32 %v1087_v63, %v1087_v63  ;;  %v1093_v27 = vmul.f32 %v1089_v40, %v1089_v40  ;;  %v1095_v45 = vmul.f32 %v1091_v8, %v1091_v8  ;;  %v1345_v12 = vmul.f32 %v1339_v18, %v3227_v9 }
 0x262   : >> { %v1341_v59 = vsub.f32 %v1075_v1, %v1340_v52  ;;  %v1344_v4 = vsub.f32 %v1078_v22, %v1343_v58  ;;  %v1348_v3 = vsub.f32 %v1078_v22, %v1347_v24  ;;  %v1350_v7 = vsub.f32 %v1076_v46, %v1349_v48 }
 0x263   : >> { %v1094_v16 = vadd.f32 %v1093_v27, %v1092_v56  ;;  %v1346_v55 = vsub.f32 %v1079_v44, %v1345_v12  ;;  %v1352_v31 = vmul.f32 %v1339_v18, %v3231_v17  ;;  %v1354_v11 = vmul.f32 %v1327_v61, %v3233_v39 }
 0x264   : >> { %v1342_v33 = vsub.f32 %v1341_v59, %v1085_v25  ;;  %v1351_v26 = vsub.f32 %v1350_v7, %v1085_v25  ;;  %v1356_v35 = vmul.f32 %v1333_v6, %v3233_v39  ;;  %v1358_v2 = vmul.f32 %v1339_v18, %v3233_v39 }
 0x265   : >> { %v3369_v51 = vadd.f32 %v1095_v45, %v1094_v16  ;;  %v1353_v53 = vsub.f32 %v1080_v20, %v1352_v31  ;;  %v3371_v19 = vsub.f32 %v1079_v44, %v1354_v11 }
 0x266   : >> { %v3373_v1 = vsub.f32 %v1080_v20, %v1356_v35  ;;  %v1359_v46 = vsub.f32 %v1077_v50, %v1358_v2 }
 0x267   : >> { %v1097_v22 = vmax.f32 %v3369_v51, 1e-30  ;;  %vm1310_vm0 = vcmp.gt.f32.partialorder %v3369_v51, 1e-24 }
 0x268   : >> { %v3376_v21 = vsub.f32 %v1359_v46, %v1085_v25 }
 0x269   : >> { %2488 = vrsqrt.f32 %v1097_v22 }
 0x276   : >> { %v3378_v38 = vpop.eup %2488 }
 0x277   : >> { %v3382_v29 = vmul.f32 %v3378_v38, %v3369_v51  ;;  %v3385_v49 = vmul.f32 %v3378_v38, %v1087_v63  ;;  %v3388_v44 = vmul.f32 %v3378_v38, %v1089_v40  ;;  %v3391_v20 = vmul.f32 %v3378_v38, %v1091_v8 }
 0x279   : >> { %v1103_v50 = vand.u32 2147483647, %v3382_v29  ;;  %v1106_v37 = vand.u32 2139095040, %v3382_v29  ;;  %v1361_v28 = vmul.f32 %v3391_v20, %v3231_v17  ;;  %v1362_v23 = vmul.f32 %v3388_v44, %v3233_v39 }
 0x27a   : >> { %v1364_v60 = vmul.f32 %v3385_v49, %v3233_v39  ;;  %v1365_v57 = vmul.f32 %v3391_v20, %v3227_v9  ;;  %v1367_v54 = vmul.f32 %v3388_v44, %v3227_v9  ;;  %v1368_v5 = vmul.f32 %v3385_v49, %v3231_v17 }
 0x27b   : >> { %v1107_v62 = vshrl.u32 %v1106_v37, 23  ;;  %v1110_v13 = vand.u32 8388607, %v1103_v50  ;;  %v3407_v15 = vsub.f32 %v1361_v28, %v1362_v23  ;;  %v1371_v14 = vmul.f32 %v1342_v33, %v3385_v49 }
 0x27c   : >> { %v3409_v25 = vsub.f32 %v1364_v60, %v1365_v57  ;;  %v1372_v47 = vmul.f32 %v1344_v4, %v3388_v44  ;;  %v1374_v42 = vmul.f32 %v1346_v55, %v3391_v20  ;;  %v3416_v34 = vsub.f32 %v1367_v54, %v1368_v5 }
 0x27d   : >> { %v2387_v41 = vadd.s32 4294967169, %v1107_v62  ;;  %v1111_v32 = vor.u32 8388608, %v1110_v13  ;;  %v1376_v61 = vmul.f32 %v1348_v3, %v3385_v49  ;;  %v1377_v6 = vmul.f32 %v1351_v26, %v3388_v44 }
 0x27e   : >> { %v1379_v63 = vmul.f32 %v1353_v53, %v3391_v20  ;;  %v1373_v18 = vadd.f32 %v1372_v47, %v1371_v14  ;;  %v1381_v52 = vmul.f32 %v3371_v19, %v3385_v49  ;;  %v1382_v24 = vmul.f32 %v3373_v1, %v3388_v44 }
 0x27f   : >> { %v1113_v40 = vadd.s32 1, %v2387_v41  ;;  %v3421_v8 = vshll.u32 %v1111_v32, 8  ;;  %v1378_v58 = vadd.f32 %v1377_v6, %v1376_v61  ;;  %v1384_v48 = vmul.f32 %v3376_v21, %v3391_v20 }
 0x280   : >> { %v1414_v56 = vmul.f32 %v3407_v15, %v1342_v33  ;;  %v3430_v27 = vadd.f32 %v1374_v42, %v1373_v18  ;;  %v1415_v45 = vmul.f32 %v3409_v25, %v1344_v4  ;;  %v1417_v12 = vmul.f32 %v3416_v34, %v1346_v55 }
 0x281   : >> { %vm1114_vm1 = vcmp.gt.s32.totalorder %v1113_v40, 0  ;;  %v3434_v7 = vadd.f32 %v1379_v63, %v1378_v58  ;;  %v1383_v16 = vadd.f32 %v1382_v24, %v1381_v52  ;;  %v1419_v31 = vmul.f32 %v3407_v15, %v1348_v3 }
 0x282   : >> { %v1115_v59 = vsel %vm1114_vm1, %v1113_v40, 0  ;;  %v1386_v2 = vmul.f32 %v3430_v27, %v3385_v49  ;;  %v1416_v46 = vadd.f32 %v1415_v45, %v1414_v56  ;;  %v1420_v4 = vmul.f32 %v3409_v25, %v1351_v26 }
 0x283   : >> { %v1116_v11 = vshrl.u32 %v1115_v59, 5  ;;  %v1117_v35 = vand.u32 31, %v1115_v59  ;;  %v3439_v33 = vadd.f32 %v1384_v48, %v1383_v16  ;;  %v1387_v22 = vmul.f32 %v3434_v7, %v3388_v44 }
 0x284   : >> { %v1422_v55 = vmul.f32 %v3416_v34, %v1353_v53  ;;  %v4243_v60 = vmov 2102212464   ;;  %v4244_v62 = vmov 920167782   ;;  %v4245_v41 = vmov 1326507024  }
 0x285   : >> { %v1118_v37 = vsub.s32 32, %v1117_v35  ;;  %v1120_v28 = vshll.u32 %v3968_v10, %v1117_v35  ;;  %v1123_v3 = vshll.u32 %v3966_v30, %v1117_v35  ;;  %v1126_v23 = vshll.u32 %v3964_v36, %v1117_v35 }
 0x286   : >> { %v1129_v57 = vshll.u32 %v4243_v60, %v1117_v35  ;;  %v1132_v13 = vshll.u32 %v4244_v62, %v1117_v35  ;;  %vm1135_vm2 = vcmp.lt.s32.totalorder %v1116_v11, 1  ;;  %vm1136_vm3 = vcmp.lt.s32.totalorder %v1116_v11, 2 }
 0x287   : >> { %v1119_v54 = vshrl.u32 %v3968_v10, %v1118_v37  ;;  %v1121_v5 = vshrl.u32 %v3966_v30, %v1118_v37  ;;  %v1124_v26 = vshrl.u32 %v3964_v36, %v1118_v37  ;;  %v1127_v53 = vshrl.u32 %v4243_v60, %v1118_v37 }
 0x288   : >> { %v1130_v14 = vshrl.u32 %v4244_v62, %v1118_v37  ;;  %v1133_v32 = vshrl.u32 %v4245_v41, %v1118_v37  ;;  %vm1137_vm4 = vcmp.lt.s32.totalorder %v1116_v11, 3  ;;  %vm1138_vm5 = vcmp.lt.s32.totalorder %v1116_v11, 4 }
 0x289   : >> { %v1122_v47 = vor.u32 %v1121_v5, %v1120_v28  ;;  %v1125_v42 = vor.u32 %v1124_v26, %v1123_v3  ;;  %v1128_v61 = vor.u32 %v1127_v53, %v1126_v23  ;;  %v1388_v6 = vadd.f32 %v1387_v22, %v1386_v2 }
 0x28a   : >> { %v1131_v63 = vor.u32 %v1130_v14, %v1129_v57  ;;  %v1134_v40 = vor.u32 %v1133_v32, %v1132_v13  ;;  %v1389_v18 = vmul.f32 %v3439_v33, %v3391_v20  ;;  %v3458_v52 = vadd.f32 %v1417_v12, %v1416_v46 }
 0x28b   : >> { %v1139_v58 = vsel %vm1135_vm2, %v1119_v54, %v1122_v47  ;;  %v1140_v24 = vsel %vm1138_vm5, %v1128_v61, 2102212464  ;;  %v1143_v48 = vsel %vm1135_vm2, %v1122_v47, %v1125_v42  ;;  %v1147_v56 = vsel %vm1135_vm2, %v1125_v42, %v1128_v61 }
 0x28c   : >> { %v1141_v45 = vsel %vm1137_vm4, %v1125_v42, %v1140_v24  ;;  %v1144_v59 = vsel %vm1138_vm5, %v1131_v63, 920167782  ;;  %v1148_v16 = vsel %vm1138_vm5, %v1134_v40, 1326507024  ;;  %v3464_v35 = vadd.f32 %v1389_v18, %v1388_v6 }
 0x28d   : >> { %v1145_v2 = vsel %vm1137_vm4, %v1128_v61, %v1144_v59  ;;  %v1149_v22 = vsel %vm1137_vm4, %v1131_v63, %v1148_v16  ;;  %v1421_v37 = vadd.f32 %v1420_v4, %v1419_v31  ;;  %v1142_v12 = vsel %vm1136_vm3, %v1139_v58, %v1141_v45 }
 0x28e   : >> { %v1146_v46 = vsel %vm1136_vm3, %v1143_v48, %v1145_v2  ;;  %v1150_v28 = vsel %vm1136_vm3, %v1147_v56, %v1149_v22  ;;  %v1424_v3 = vmul.f32 %v3407_v15, %v3371_v19  ;;  %v1425_v31 = vmul.f32 %v3409_v25, %v3373_v1 }
 0x28f   : >> { %v3474_v23 = vmul.u32.u64.low %v3421_v8, %v1150_v28  ;;  %v3475_v57 = vmul.u32.u64.high %v3421_v8, %v1150_v28, %v3474_v23  ;;  %v3478_v13 = vmul.u32.u64.low %v3421_v8, %v1146_v46  ;;  %v3479_v54 = vmul.u32.u64.high %v3421_v8, %v1146_v46, %v3478_v13 }
 0x290   : >> { %v3481_v5 = vadd.f32 %v1422_v55, %v1421_v37  ;;  %v1427_v11 = vmul.f32 %v3416_v34, %v3376_v21  ;;  %v1429_v4 = vmul.f32 %v3458_v52, %v3385_v49  ;;  %v1158_v19 = vmul.u32 %v3421_v8, %v1142_v12 }
 0x291   : >> { %v1426_v26 = vadd.f32 %v1425_v31, %v1424_v3  ;;  %vm1160_vm6 = vc.u32 %v3475_v57, %v3478_v13  ;;  %v1161_v55 = vadd.s32 1, %v3479_v54  ;;  %v1159_v48 = vadd.s32 %v3478_v13, %v3475_v57 }
 0x292   : >> { %v1430_v53 = vmul.f32 %v3481_v5, %v3388_v44  ;;  %vm1105_vm8 = vcmp.lt.s32.totalorder %v3382_v29, 0  ;;  %vm1104_vm9 = vcmp.le.f32.partialorder %v1103_v50, 0.7853982  ;;  %v1480_v50 = vstv %s4246_s15  ;;  %s4276_s15 = sld [smem:[#allocation138_spill]] }
 0x293   : >> { %v3494_v14 = vadd.f32 %v1427_v11, %v1426_v26  ;;  %v1162_v1 = vsel %vm1160_vm6, %v1161_v55, %v3479_v54  ;;  %v4253_v26 = vsub.f32 %v3300_v43, %v3302_v0  ;;  %v1518_v0 = vstv %s4254_s29  ;;  %s4289_s29 = sld [smem:[#allocation156_spill]] }
 0x294   : >> { %v1431_v32 = vadd.f32 %v1430_v53, %v1429_v4  ;;  %v1163_v47 = vadd.s32 %v1162_v1, %v1158_v19  ;;  %v1482_v1 = vstv %s4247_s16  ;;  %vm1195_vm1 = vweird.f32 %v3382_v29  ;;  %s4278_s16 = sld [smem:[#allocation140_spill]] }
 0x295   : >> { %v1432_v21 = vmul.f32 %v3494_v14, %v3391_v20  ;;  %v929_v53 = vand.u32 2147483647, %v4253_v26 }
 0x296   : >> { %v1164_v42 = vadd.s32 536870912, %v1163_v47 }
 0x297   : >> { %v3499_v61 = vadd.f32 %v1432_v21, %v1431_v32  ;;  %v1510_v21 = vstv %s4249_s19  ;;  %s4280_s19 = sld [smem:[#allocation142_spill]] }
 0x298   : >> { %v1165_v8 = vshrl.u32 %v1164_v42, 30  ;;  %v1512_v42 = vstv %s4250_s21  ;;  %s4282_s21 = sld [smem:[#allocation149_spill]] }
 0x29a   : >> { %v1166_v6 = vshll.u32 %v1165_v8, 30  ;;  %v1189_v54 = vsub.s32 4, %v1165_v8 }
 0x29c   : >> { %v1167_v63 = vsub.s32 %v1163_v47, %v1166_v6  ;;  %v1190_v31 = vsel %vm1105_vm8, %v1189_v54, %v1165_v8  ;;  %v1485_v47 = vstv %s4248_s17  ;;  %v1488_v6 = vstv %s4251_s27  ;;  %s4279_s17 = sld [smem:[#allocation141_spill]] }
 0x29d   : >> { %v1192_v4 = vsel %vm1104_vm9, 0, %v1190_v31  ;;  %s4283_s27 = sld [smem:[#allocation150_spill]] }
 0x29e   : >> { %v1169_v40 = vsub.s32 0, %v1167_v63  ;;  %v1299_v19 = vadd.s32 3, %v1192_v4  ;;  %v1196_v55 = vand.u32 3, %v1192_v4 }
 0x2a0   : >> { %v2388_v18 = vmin.u32 %v1169_v40, %v1167_v63  ;;  %v1300_v32 = vand.u32 3, %v1299_v19  ;;  %vm1201_vm10 = vcmp.eq.s32.totalorder %v1196_v55, 2  ;;  %vm1198_vm12 = vcmp.eq.s32.totalorder %v1196_v55, 0 }
 0x2a1   : >> { %vm1197_vm14 = vcmp.lt.s32.totalorder %v1196_v55, 2 }
 0x2a2   : >> { %v1171_v58 = vclz %v2388_v18  ;;  %vm1305_vm11 = vcmp.eq.s32.totalorder %v1300_v32, 2  ;;  %vm1302_vm13 = vcmp.eq.s32.totalorder %v1300_v32, 0  ;;  %vm1301_vm15 = vcmp.lt.s32.totalorder %v1300_v32, 2 }
 0x2a4   : >> { %v2389_v24 = vadd.s32 4294967294, %v1171_v58 }
 0x2a6   : >> { %vm2390_vm7 = vcmp.lt.s32.totalorder %v2389_v24, 0 }
 0x2a7   : >> { %v1174_v56 = vsel %vm2390_vm7, 0, %v2389_v24 }
 0x2a8   : >> { %v1175_v45 = vsub.s32 32, %v1174_v56  ;;  %v1176_v59 = vshll.u32 %v1167_v63, %v1174_v56  ;;  %v1179_v16 = vsub.s32 4294967266, %v1174_v56  ;;  %v1515_v63 = vstv %s4252_s28  ;;  %s4284_s28 = sld [smem:[#allocation151_spill]] }
 0x2aa   : >> { %v1177_v2 = vshrl.u32 %v1159_v48, %v1175_v45  ;;  %v1180_v22 = vadd.s32 127, %v1179_v16  ;;  %v1549_v48 = vstv %s4255_s30  ;;  %v1554_v16 = vstv %s4257_s20  ;;  %s4281_s20 = sld [smem:[#allocation143_spill]] }
 0x2ab   : >> { %s4290_s30 = sld [smem:[#allocation161_spill]] }
 0x2ac   : >> { %v1178_v37 = vor.u32 %v1177_v2, %v1176_v59  ;;  %v1181_v12 = vshll.u32 %v1180_v22, 23  ;;  %v1551_v59 = vstv %s4256_s12  ;;  %s4274_s12 = sld [smem:[#allocation129_spill]] }
 0x2ae   : >> { %v1182_v46 = vor.u32 4788187, %v1181_v12  ;;  %v1185_v28 = vcvt.s32.f32 %v1178_v37  ;;  %v1557_v37 = vstv %s4258_s2  ;;  %v1588_v12 = vstv %s4259_s4  ;;  %s4271_s4 = sld [smem:[#allocation127_spill]] }
 0x2af   : >> { %s4277_s2 = sld [smem:[#allocation139_spill]] }
 0x2b0   : >> { %v1183_v3 = vand.u32 2147483647, %v1182_v46 }
 0x2b2   : >> { %v1186_v23 = vmul.f32 %v1185_v28, %v1183_v3  ;;  %v1590_v3 = vstv %s4260_s5  ;;  %s4272_s5 = sld [smem:[#allocation148_spill]] }
 0x2b4   : >> { %v1187_v57 = vxor.u32 2147483648, %v1186_v23 }
 0x2b6   : >> { %v1188_v13 = vsel %vm1105_vm8, %v1187_v57, %v1186_v23  ;;  %v1593_v23 = vstv %s4261_s7  ;;  %s4273_s7 = sld [smem:[#allocation128_spill]] }
 0x2b7   : >> { %v1191_v11 = vsel %vm1104_vm9, %v3382_v29, %v1188_v13 }
 0x2b8   : >> { %2490 = vcosq.f32 %v1191_v11 }
 0x2b9   : >> { %2492 = vsinq.f32 %v1191_v11 }
 0x2ba   : >> { %2494 = vlog2.f32 %v929_v53 }
 0x2c5   : >> { %v2491_v8 = vpop.eup %2490 }
 0x2c6   : >> { %v2493_v40 = vpop.eup %2492  ;;  %v1202_v43 = vxor.u32 2147483648, %v2491_v8 }
 0x2c7   : >> { %v1199_v18 = vxor.u32 2147483648, %v2493_v40 }
 0x2c8   : >> { %v1203_v58 = vsel %vm1201_vm10, %v1202_v43, %v2493_v40  ;;  %v1307_v24 = vsel %vm1305_vm11, %v1202_v43, %v2493_v40 }
 0x2c9   : >> { %v1200_v56 = vsel %vm1198_vm12, %v2491_v8, %v1199_v18  ;;  %v1304_v45 = vsel %vm1302_vm13, %v2491_v8, %v1199_v18  ;;  %v3545_v18 = vpop.eup %2494 }
 0x2ca   : >> { %v1204_v2 = vsel %vm1197_vm14, %v1200_v56, %v1203_v58  ;;  %v1308_v22 = vsel %vm1301_vm15, %v1304_v45, %v1307_v24 }
 0x2cb   : >> { %v1205_v46 = vsel %vm1195_vm1, nan, %v1204_v2  ;;  %v1309_v28 = vsel %vm1195_vm1, nan, %v1308_v22 }
 0x2cc   : >> { %v1311_v54 = vmul.f32 %v3378_v38, %v1309_v28  ;;  %v1313_v57 = vmul.f32 %v1205_v46, %v3227_v9  ;;  %v1314_v29 = vmul.f32 %v1309_v28, %v3385_v49  ;;  %v1316_v13 = vmul.f32 %v1205_v46, %v3231_v17 }
 0x2cd   : >> { %v1317_v31 = vmul.f32 %v1309_v28, %v3388_v44  ;;  %v1319_v11 = vmul.f32 %v1205_v46, %v3233_v39  ;;  %v1320_v4 = vmul.f32 %v1309_v28, %v3391_v20  ;;  %v1392_v19 = vmul.f32 %v3464_v35, %v1309_v28 }
 0x2ce   : >> { %v1312_v26 = vsel %vm1310_vm0, %v1311_v54, 1.0  ;;  %v3536_v53 = vadd.f32 %v1314_v29, %v1313_v57  ;;  %v1393_v38 = vmul.f32 %v1205_v46, %v3385_v49  ;;  %v1400_v55 = vmul.f32 %v1205_v46, %v3388_v44 }
 0x2cf   : >> { %v3540_v32 = vadd.f32 %v1317_v31, %v1316_v13  ;;  %v3542_v8 = vadd.f32 %v1320_v4, %v1319_v11  ;;  %v1370_v40 = vsub.f32 %v1205_v46, %v1312_v26  ;;  %v1394_v43 = vmul.f32 %v3430_v27, %v1312_v26 }
 0x2d0   : >> { %v1398_v58 = vmul.f32 %v1392_v19, %v3227_v9  ;;  %v1401_v51 = vmul.f32 %v3434_v7, %v1312_v26  ;;  %v1405_v24 = vmul.f32 %v1392_v19, %v3231_v17  ;;  %v1407_v56 = vmul.f32 %v1205_v46, %v3391_v20 }
 0x2d1   : >> { %v1391_v45 = vmul.f32 %v3464_v35, %v1370_v40  ;;  %v1395_v2 = vadd.f32 %v1394_v43, %v1393_v38  ;;  %v1408_v22 = vmul.f32 %v3439_v33, %v1312_v26  ;;  %v1412_v54 = vmul.f32 %v1392_v19, %v3233_v39 }
 0x2d2   : >> { %v1402_v57 = vadd.f32 %v1401_v51, %v1400_v55  ;;  %v1434_v27 = vmul.f32 %v3499_v61, %v1370_v40  ;;  %v1435_v29 = vmul.f32 %v3499_v61, %v1309_v28  ;;  %v1436_v13 = vmul.f32 %v3407_v15, %v1205_v46 }
 0x2d3   : >> { %v1396_v7 = vmul.f32 %v1391_v45, %v3385_v49  ;;  %v1403_v31 = vmul.f32 %v1391_v45, %v3388_v44  ;;  %v1409_v11 = vadd.f32 %v1408_v22, %v1407_v56  ;;  %v1410_v4 = vmul.f32 %v1391_v45, %v3391_v20 }
 0x2d4   : >> { %v1437_v35 = vmul.f32 %v3458_v52, %v1312_v26  ;;  %v1439_v33 = vmul.f32 %v1434_v27, %v3385_v49  ;;  %v1441_v19 = vmul.f32 %v1435_v29, %v3227_v9  ;;  %v1443_v38 = vmul.f32 %v3409_v25, %v1205_v46 }
 0x2d5   : >> { %v1397_v55 = vadd.f32 %v1396_v7, %v1395_v2  ;;  %v1404_v40 = vadd.f32 %v1403_v31, %v1402_v57  ;;  %v1411_v61 = vadd.f32 %v1410_v4, %v1409_v11  ;;  %v1444_v15 = vmul.f32 %v3481_v5, %v1312_v26 }
 0x2d6   : >> { %v1438_v28 = vadd.f32 %v1437_v35, %v1436_v13  ;;  %v1446_v43 = vmul.f32 %v1434_v27, %v3388_v44  ;;  %v1448_v51 = vmul.f32 %v1435_v29, %v3231_v17  ;;  %v1450_v56 = vmul.f32 %v3416_v34, %v1205_v46 }
 0x2d7   : >> { %v1399_v52 = vsub.f32 %v1397_v55, %v1398_v58  ;;  %v1406_v49 = vsub.f32 %v1404_v40, %v1405_v24  ;;  %v1413_v45 = vsub.f32 %v1411_v61, %v1412_v54  ;;  %v1445_v9 = vadd.f32 %v1444_v15, %v1443_v38 }
 0x2d8   : >> { %v1440_v25 = vadd.f32 %v1439_v33, %v1438_v28  ;;  %v1451_v2 = vmul.f32 %v3494_v14, %v1312_v26  ;;  %v1453_v5 = vmul.f32 %v1434_v27, %v3391_v20  ;;  %v1455_v22 = vmul.f32 %v1435_v29, %v3233_v39 }
 0x2d9   : >> { %v1447_v44 = vadd.f32 %v1446_v43, %v1445_v9  ;;  %v1457_v57 = vmul.f32 %v1399_v52, %v1399_v52  ;;  %v1458_v17 = vmul.f32 %v1406_v49, %v1406_v49  ;;  %v1460_v13 = vmul.f32 %v1413_v45, %v1413_v45 }
 0x2da   : >> { %v1442_v34 = vsub.f32 %v1440_v25, %v1441_v19  ;;  %v1452_v46 = vadd.f32 %v1451_v2, %v1450_v56  ;;  %v1481_v58 = vmul.f32 %v1480_v50, %v3536_v53  ;;  %v1483_v24 = vmul.f32 %v1482_v1, %v3540_v32 }
 0x2db   : >> { %v1449_v14 = vsub.f32 %v1447_v44, %v1448_v51  ;;  %v1459_v26 = vadd.f32 %v1458_v17, %v1457_v57  ;;  %v1486_v39 = vmul.f32 %v1485_v47, %v3542_v8  ;;  %v1511_v20 = vmul.f32 %v1510_v21, %v3536_v53 }
 0x2dc   : >> { %v1454_v54 = vadd.f32 %v1453_v5, %v1452_v46  ;;  %v1462_v27 = vmul.f32 %v1442_v34, %v1399_v52  ;;  %v1467_v29 = vmul.f32 %v1442_v34, %v1442_v34  ;;  %v1484_v7 = vadd.f32 %v1483_v24, %v1481_v58 }
 0x2dd   : >> { %v1461_v50 = vadd.f32 %v1460_v13, %v1459_v26  ;;  %v1463_v31 = vmul.f32 %v1449_v14, %v1406_v49  ;;  %v1468_v11 = vmul.f32 %v1449_v14, %v1449_v14  ;;  %v1513_v1 = vmul.f32 %v1512_v42, %v3540_v32 }
 0x2de   : >> { %v1456_v4 = vsub.f32 %v1454_v54, %v1455_v22  ;;  %v1487_v47 = vadd.f32 %v1486_v39, %v1484_v7  ;;  %v1516_v21 = vmul.f32 %v1515_v63, %v3542_v8  ;;  %v1550_v35 = vmul.f32 %v1549_v48, %v3536_v53 }
 0x2df   : >> { %v1464_v33 = vadd.f32 %v1463_v31, %v1462_v27  ;;  %v1469_v19 = vadd.f32 %v1468_v11, %v1467_v29  ;;  %v1514_v38 = vadd.f32 %v1513_v1, %v1511_v20  ;;  %v1552_v55 = vmul.f32 %v1551_v59, %v3540_v32 }
 0x2e0   : >> { %v1465_v40 = vmul.f32 %v1456_v4, %v1413_v45  ;;  %v1470_v61 = vmul.f32 %v1456_v4, %v1456_v4  ;;  %v1489_v42 = vsub.f32 %v1487_v47, %v1488_v6  ;;  %v1555_v15 = vmul.f32 %v1554_v16, %v3542_v8 }
 0x2e1   : >> { %v1517_v63 = vadd.f32 %v1516_v21, %v1514_v38  ;;  %v1553_v28 = vadd.f32 %v1552_v55, %v1550_v35  ;;  %v1589_v48 = vmul.f32 %v1588_v12, %v3536_v53  ;;  %v1591_v43 = vmul.f32 %v1590_v3, %v3540_v32 }
 0x2e2   : >> { %v1466_v51 = vadd.f32 %v1465_v40, %v1464_v33  ;;  %v1471_v56 = vadd.f32 %v1470_v61, %v1469_v19  ;;  %v1490_v59 = vmul.f32 1.442695, %v1489_v42  ;;  %v1594_v52 = vmul.f32 %v1593_v23, %v3542_v8 }
 0x2e3   : >> { %v931_v6 = vmul.f32 0.6931472, %v3545_v18  ;;  %v1519_v16 = vsub.f32 %v1517_v63, %v1518_v0  ;;  %v1556_v49 = vadd.f32 %v1555_v15, %v1553_v28  ;;  %v1592_v45 = vadd.f32 %v1591_v43, %v1589_v48 }
 0x2e4   : >> { %v1472_v9 = vmul.f32 %v1471_v56, %v1461_v50  ;;  %v1473_v12 = vmul.f32 %v1466_v51, %v1466_v51  ;;  %2496 = vpow2.f32 %v1490_v59  ;;  %v1596_v3 = vstv %s4262_s8  ;;  %s4275_s8 = sld [smem:[#allocation130_spill]] }
 0x2e5   : >> { %v1520_v25 = vmul.f32 1.442695, %v1519_v16  ;;  %v1558_v2 = vsub.f32 %v1556_v49, %v1557_v37  ;;  %v1595_v23 = vadd.f32 %v1594_v52, %v1592_v45  ;;  %v3615_v22 = vmul.f32 0.5, %v931_v6 }
 0x2e6   : >> { %v1474_v18 = vsub.f32 %v1472_v9, %v1473_v12  ;;  %v1492_v57 = vstv %s4263_s9  ;;  %v1494_v17 = vstv %s4264_s11  ;;  %v1496_v37 = vstv %s4265_s6  ;;  %s4285_s9 = sld [smem:[#allocation152_spill]] }
 0x2e7   : >> { %2498 = vpow2.f32 %v1520_v25  ;;  %v1559_v0 = vmul.f32 1.442695, %v1558_v2  ;;  %v1597_v5 = vsub.f32 %v1595_v23, %v1596_v3  ;;  %v1522_v13 = vstv %s4266_s0  ;;  %s4286_s11 = sld [smem:[#allocation153_spill]] }
 0x2e8   : >> { %v1475_v44 = vand.u32 2147483647, %v1474_v18  ;;  %v1524_v34 = vstv %s4267_s10  ;;  %v1526_v46 = vstv %s4268_s14  ;;  %v1498_v24 = vstv %s4269_s24  ;;  %s4287_s6 = sld [smem:[#allocation154_spill]] }
 0x2e9   : >> { %2500 = vpow2.f32 %v1559_v0  ;;  %v1598_v58 = vmul.f32 1.442695, %v1597_v5  ;;  %v1500_v14 = vstv %s4270_s23  ;;  %v1502_v26 = vstv %s4271_s4  ;;  %s4288_s0 = sld [smem:[#allocation155_spill]] }
 0x2ea   : >> { %2502 = vlog2.f32 %v1475_v44  ;;  %v1561_v39 = vstv %s4272_s5  ;;  %v1504_v20 = vstv %s4273_s7  ;;  %v1506_v54 = vstv %s4274_s12  ;;  %s4291_s4 = sld [smem:[#allocation162_spill]] }
 0x2eb   : >> { %v1508_v27 = vstv %s4275_s8  ;;  %v1528_v29 = vstv %s4276_s15  ;;  %v1530_v7 = vstv %s4277_s2  ;;  %v1532_v50 = vstv %s4278_s16  ;;  %s4297_s15 = sld [smem:[#allocation165_spill]] }
 0x2ec   : >> { %v1534_v31 = vstv %s4279_s17  ;;  %v1536_v11 = vstv %s4280_s19  ;;  %v1538_v1 = vstv %s4281_s20  ;;  %v1563_v4 = vstv %s4282_s21  ;;  %s4298_s16 = sld [smem:[#allocation163_spill]] }
 0x2ed   : >> { %v1565_v47 = vstv %s4283_s27  ;;  %2504 = vpow2.f32 %v1598_v58  ;;  %v1567_v21 = vstv %s4284_s28  ;;  %v1569_v35 = vstv %s4285_s9  ;;  %s4299_s19 = sld [smem:[#allocation16_spill]] }
 0x2ee   : >> { %v1571_v33 = vstv %s4286_s11  ;;  %v1573_v19 = vstv %s4287_s6  ;;  %v1577_v55 = vstv %s4289_s29  ;;  %v1600_v40 = vstv %s4290_s30  ;;  %s4300_s27 = sld [smem:[#allocation164_spill]] }
 0x2ef   : >> { %v1575_v38 = vstv %s4288_s0  ;;  %v1602_v61 = vstv %s2938_s26  ;;  %v1604_v15 = vstv %s2940_s25  ;;  %v1606_v63 = vstv %s2942_s22 }
 0x2f0   : >> { %v1608_v28 = vstv %s2944_s1  ;;  %v1610_v48 = vstv %s2946_s13  ;;  %v1612_v51 = vstv %s2948_s3  ;;  %v1614_v56 = vstv %s4291_s4 }
 0x2f1   : >> { %v2497_v42 = vpop.eup %2496  ;;  %v1616_v59 = vstv %s2952_s18 }
 0x2f2   : >> { %v1493_v43 = vmul.f32 %v2497_v42, %v1492_v57  ;;  %v1495_v52 = vmul.f32 %v2497_v42, %v1494_v17  ;;  %v1497_v6 = vmul.f32 %v2497_v42, %v1496_v37  ;;  %v1499_v16 = vmul.f32 %v2497_v42, %v1498_v24  ;;  %s2026_s17 = scalar_lea.vmem %s4298_s16, %s4297_s15 }
 0x2f3   : >> { %v1501_v49 = vmul.f32 %v2497_v42, %v1500_v14  ;;  %v1503_v9 = vmul.f32 %v2497_v42, %v1502_v26  ;;  %v1505_v12 = vmul.f32 %v2497_v42, %v1504_v20  ;;  %v1507_v3 = vmul.f32 %v2497_v42, %v1506_v54  ;;  %s2032_s21 = scalar_lea.vmem %s4299_s19, %s4297_s15 }
 0x2f4   : >> { %v2499_v45 = vpop.eup %2498  ;;  %v1509_v25 = vmul.f32 %v2497_v42, %v1508_v27  ;;  %s378_s6 = sadd.s32 1, %s4300_s27  }
 0x2f5   : >> { %v1523_v2 = vmul.f32 %v2499_v45, %v1522_v13  ;;  %v1525_v23 = vmul.f32 %v2499_v45, %v1524_v34  ;;  %v1527_v18 = vmul.f32 %v2499_v45, %v1526_v46  ;;  %v1529_v0 = vmul.f32 %v2499_v45, %v1528_v29  ;;  %p375_p2 = scmp.ge.s32.totalorder %s378_s6, 2  }
 0x2f6   : >> { %v2501_v5 = vpop.eup %2500  ;;  %v1531_v44 = vmul.f32 %v2499_v45, %v1530_v7  ;;  %v1533_v58 = vmul.f32 %v2499_v45, %v1532_v50  ;;  %v1535_v57 = vmul.f32 %v2499_v45, %v1534_v31  ;;  %v1537_v36 = vmul.f32 %v2499_v45, %v1536_v11 }
 0x2f7   : >> { %v2503_v30 = vpop.eup %2502  ;;  %v1539_v10 = vmul.f32 %v2499_v45, %v1538_v1  ;;  %v1540_v17 = vadd.f32 %v1523_v2, %v1493_v43  ;;  %v1541_v37 = vadd.f32 %v1525_v23, %v1495_v52  ;;  %v1542_v24 = vadd.f32 %v1527_v18, %v1497_v6 }
 0x2f8   : >> { %v1477_v14 = vmul.f32 0.6931472, %v2503_v30  ;;  %v1543_v41 = vadd.f32 %v1529_v0, %v1499_v16  ;;  %v1544_v26 = vadd.f32 %v1531_v44, %v1501_v49  ;;  %v1545_v20 = vadd.f32 %v1533_v58, %v1503_v9 }
 0x2f9   : >> { %v1546_v54 = vadd.f32 %v1535_v57, %v1505_v12  ;;  %v1547_v27 = vadd.f32 %v1537_v36, %v1507_v3  ;;  %v1548_v13 = vadd.f32 %v1539_v10, %v1509_v25  ;;  %v1562_v34 = vmul.f32 %v2501_v5, %v1561_v39 }
 0x2fa   : >> { %v1478_v46 = vmul.f32 0.5, %v1477_v14  ;;  %v1564_v29 = vmul.f32 %v2501_v5, %v1563_v4  ;;  %v1566_v42 = vmul.f32 %v2501_v5, %v1565_v47  ;;  %v1568_v7 = vmul.f32 %v2501_v5, %v1567_v21  ;;  %v2505_v50 = vpop.eup %2504 }
 0x2fb   : >> { %v1570_v31 = vmul.f32 %v2501_v5, %v1569_v35  ;;  %v1572_v11 = vmul.f32 %v2501_v5, %v1571_v33  ;;  %v1574_v62 = vmul.f32 %v2501_v5, %v1573_v19  ;;  %v1576_v1 = vmul.f32 %v2501_v5, %v1575_v38 }
 0x2fc   : >> { %v3654_v43 = vadd.f32 %v1478_v46, %v3615_v22  ;;  %v1578_v30 = vmul.f32 %v2501_v5, %v1577_v55  ;;  %v1579_v52 = vadd.f32 %v1562_v34, %v1540_v17  ;;  %v1580_v6 = vadd.f32 %v1564_v29, %v1541_v37 }
 0x2fd   : >> { %v1581_v16 = vadd.f32 %v1566_v42, %v1542_v24  ;;  %v1582_v49 = vadd.f32 %v1568_v7, %v1543_v41  ;;  %v1583_v36 = vadd.f32 %v1570_v31, %v1544_v26  ;;  %v1584_v10 = vadd.f32 %v1572_v11, %v1545_v20 }
 0x2fe   : >> { %v1585_v39 = vadd.f32 %v1574_v62, %v1546_v54  ;;  %v1586_v45 = vadd.f32 %v1576_v1, %v1547_v27  ;;  %v1587_v4 = vadd.f32 %v1578_v30, %v1548_v13  ;;  %v1601_v47 = vmul.f32 %v2505_v50, %v1600_v40 }
 0x2ff   : >> { %v1603_v21 = vmul.f32 %v2505_v50, %v1602_v61  ;;  %v1605_v9 = vmul.f32 %v2505_v50, %v1604_v15  ;;  %v1607_v35 = vmul.f32 %v2505_v50, %v1606_v63  ;;  %v1609_v33 = vmul.f32 %v2505_v50, %v1608_v28 }
 0x300   : >> { %v1611_v19 = vmul.f32 %v2505_v50, %v1610_v48  ;;  %v1613_v38 = vmul.f32 %v2505_v50, %v1612_v51  ;;  %v1615_v12 = vmul.f32 %v2505_v50, %v1614_v56  ;;  %v1617_v22 = vmul.f32 %v2505_v50, %v1616_v59 }
 0x301   : >> { %v1618_v3 = vadd.f32 %v1601_v47, %v1579_v52  ;;  %v1619_v55 = vadd.f32 %v1603_v21, %v1580_v6  ;;  %v1620_v25 = vadd.f32 %v1605_v9, %v1581_v16  ;;  %v1621_v2 = vadd.f32 %v1607_v35, %v1582_v49 }
 0x302   : >> { %v1622_v23 = vadd.f32 %v1609_v33, %v1583_v36  ;;  %v1623_v41 = vadd.f32 %v1611_v19, %v1584_v10  ;;  %v1624_v18 = vadd.f32 %v1613_v38, %v1585_v39  ;;  %v1625_v0 = vadd.f32 %v1615_v12, %v1586_v45 }
 0x303   : >> { %v1626_v62 = vadd.f32 %v1617_v22, %v1587_v4  ;;  %v1627_v5 = vmul.f32 %v1618_v3, %v3536_v53  ;;  %v1628_v40 = vmul.f32 %v1619_v55, %v3540_v32  ;;  %v1630_v61 = vmul.f32 %v1620_v25, %v3542_v8 }
 0x304   : >> { %v1868_v15 = vmul.f32 %v1621_v2, %v3536_v53  ;;  %v1869_v63 = vmul.f32 %v1624_v18, %v3540_v32  ;;  %v1871_v28 = vmul.f32 %v1625_v0, %v3542_v8  ;;  %v1874_v48 = vmul.f32 %v1624_v18, %v3536_v53 }
 0x305   : >> { %v1629_v51 = vadd.f32 %v1628_v40, %v1627_v5  ;;  %v1875_v56 = vmul.f32 %v1622_v23, %v3540_v32  ;;  %v1877_v59 = vmul.f32 %v1626_v62, %v3542_v8  ;;  %v1880_v44 = vmul.f32 %v1625_v0, %v3536_v53 }
 0x306   : >> { %v1870_v58 = vadd.f32 %v1869_v63, %v1868_v15  ;;  %v1881_v57 = vmul.f32 %v1626_v62, %v3540_v32  ;;  %v1883_v17 = vmul.f32 %v1623_v41, %v3542_v8 }
 0x307   : >> { %v1631_v37 = vadd.f32 %v1630_v61, %v1629_v51  ;;  %v1876_v24 = vadd.f32 %v1875_v56, %v1874_v48 }
 0x308   : >> { %v1872_v14 = vadd.f32 %v1871_v28, %v1870_v58  ;;  %v1882_v26 = vadd.f32 %v1881_v57, %v1880_v44 }
 0x309   : >> { %v1632_v20 = vmul.f32 %v1631_v37, %v3536_v53  ;;  %v1634_v54 = vmul.f32 %v1631_v37, %v3540_v32  ;;  %v1636_v27 = vmul.f32 %v1631_v37, %v3542_v8  ;;  %v1878_v13 = vadd.f32 %v1877_v59, %v1876_v24 }
 0x30a   : >> { %v1873_v34 = vadd.f32 %v1872_v14, %v1618_v3  ;;  %v1884_v46 = vadd.f32 %v1883_v17, %v1882_v26 }
 0x30b   : >> { %v1633_v29 = vsub.f32 %v1618_v3, %v1632_v20  ;;  %v1635_v42 = vsub.f32 %v1619_v55, %v1634_v54  ;;  %v1637_v7 = vsub.f32 %v1620_v25, %v1636_v27  ;;  %v1879_v50 = vadd.f32 %v1878_v13, %v1619_v55 }
 0x30c   : >> { %v1885_v31 = vadd.f32 %v1884_v46, %v1620_v25  ;;  %v1886_v11 = vmul.f32 %v1873_v34, %v3536_v53  ;;  %v1893_v1 = vmul.f32 %v1873_v34, %v3540_v32  ;;  %v1900_v30 = vmul.f32 %v1873_v34, %v3542_v8 }
 0x30d   : >> { %v1638_v52 = vmul.f32 %v1633_v29, %v1633_v29  ;;  %v1639_v6 = vmul.f32 %v1635_v42, %v1635_v42  ;;  %v1641_v16 = vmul.f32 %v1637_v7, %v1637_v7  ;;  %v1889_v49 = vmul.f32 %v1879_v50, %v3536_v53 }
 0x30e   : >> { %v1887_v36 = vsub.f32 %v1621_v2, %v1886_v11  ;;  %v1891_v10 = vmul.f32 %v1885_v31, %v3536_v53  ;;  %v1894_v39 = vsub.f32 %v1624_v18, %v1893_v1  ;;  %v1895_v45 = vmul.f32 %v1879_v50, %v3540_v32 }
 0x30f   : >> { %v1640_v4 = vadd.f32 %v1639_v6, %v1638_v52  ;;  %v1890_v47 = vsub.f32 %v1624_v18, %v1889_v49  ;;  %v1898_v21 = vmul.f32 %v1885_v31, %v3540_v32  ;;  %v3678_v9 = vsub.f32 %v1625_v0, %v1900_v30 }
 0x310   : >> { %v1888_v35 = vsub.f32 %v1887_v36, %v1631_v37  ;;  %v1892_v33 = vsub.f32 %v1625_v0, %v1891_v10  ;;  %v1896_v19 = vsub.f32 %v1622_v23, %v1895_v45  ;;  %v1902_v38 = vmul.f32 %v1879_v50, %v3542_v8 }
 0x311   : >> { %v3681_v12 = vadd.f32 %v1641_v16, %v1640_v4  ;;  %v1899_v22 = vsub.f32 %v1626_v62, %v1898_v21  ;;  %v1904_v3 = vmul.f32 %v1885_v31, %v3542_v8 }
 0x312   : >> { %v1897_v55 = vsub.f32 %v1896_v19, %v1631_v37  ;;  %v3684_v25 = vsub.f32 %v1626_v62, %v1902_v38 }
 0x313   : >> { %v1643_v2 = vmax.f32 %v3681_v12, 1e-30  ;;  %v1905_v18 = vsub.f32 %v1623_v41, %v1904_v3 }
 0x315   : >> { %2506 = vrsqrt.f32 %v1643_v2  ;;  %v3687_v5 = vsub.f32 %v1905_v18, %v1631_v37  ;;  %v4292_v2 = vmov 683565275  }
 0x322   : >> { %v3689_v40 = vpop.eup %2506 }
 0x323   : >> { %v3693_v23 = vmul.f32 %v3689_v40, %v3681_v12  ;;  %v3696_v0 = vmul.f32 %v3689_v40, %v1633_v29  ;;  %v3699_v61 = vmul.f32 %v3689_v40, %v1635_v42  ;;  %v3702_v62 = vmul.f32 %v3689_v40, %v1637_v7 }
 0x325   : >> { %v1649_v41 = vand.u32 2147483647, %v3693_v23  ;;  %v1652_v15 = vand.u32 2139095040, %v3693_v23  ;;  %v1907_v63 = vmul.f32 %v3702_v62, %v3540_v32  ;;  %v1908_v28 = vmul.f32 %v3699_v61, %v3542_v8 }
 0x326   : >> { %v1910_v48 = vmul.f32 %v3696_v0, %v3542_v8  ;;  %v1911_v51 = vmul.f32 %v3702_v62, %v3536_v53  ;;  %v1913_v44 = vmul.f32 %v3699_v61, %v3536_v53  ;;  %v1914_v17 = vmul.f32 %v3696_v0, %v3540_v32 }
 0x327   : >> { %v1653_v56 = vshrl.u32 %v1652_v15, 23  ;;  %v1656_v59 = vand.u32 8388607, %v1649_v41  ;;  %v3718_v58 = vsub.f32 %v1907_v63, %v1908_v28  ;;  %v1917_v37 = vmul.f32 %v1888_v35, %v3696_v0 }
 0x328   : >> { %v3720_v57 = vsub.f32 %v1910_v48, %v1911_v51  ;;  %v1918_v26 = vmul.f32 %v1890_v47, %v3699_v61  ;;  %v1920_v20 = vmul.f32 %v1892_v33, %v3702_v62  ;;  %v3727_v54 = vsub.f32 %v1913_v44, %v1914_v17 }
 0x329   : >> { %v2395_v24 = vadd.s32 4294967169, %v1653_v56  ;;  %v1657_v14 = vor.u32 8388608, %v1656_v59  ;;  %v1922_v27 = vmul.f32 %v1894_v39, %v3696_v0  ;;  %v1923_v13 = vmul.f32 %v1897_v55, %v3699_v61 }
 0x32a   : >> { %v1925_v34 = vmul.f32 %v1899_v22, %v3702_v62  ;;  %v1919_v42 = vadd.f32 %v1918_v26, %v1917_v37  ;;  %v1927_v7 = vmul.f32 %v3678_v9, %v3696_v0  ;;  %v1928_v31 = vmul.f32 %v3684_v25, %v3699_v61 }
 0x32b   : >> { %v1659_v46 = vadd.s32 1, %v2395_v24  ;;  %v3732_v29 = vshll.u32 %v1657_v14, 8  ;;  %v1924_v50 = vadd.f32 %v1923_v13, %v1922_v27  ;;  %v1930_v11 = vmul.f32 %v3687_v5, %v3702_v62 }
 0x32c   : >> { %v1960_v1 = vmul.f32 %v3718_v58, %v1888_v35  ;;  %v3741_v30 = vadd.f32 %v1920_v20, %v1919_v42  ;;  %v1961_v52 = vmul.f32 %v3720_v57, %v1890_v47  ;;  %v1963_v6 = vmul.f32 %v3727_v54, %v1892_v33 }
 0x32d   : >> { %vm1660_vm2 = vcmp.gt.s32.totalorder %v1659_v46, 0  ;;  %v3745_v49 = vadd.f32 %v1925_v34, %v1924_v50  ;;  %v1929_v36 = vadd.f32 %v1928_v31, %v1927_v7  ;;  %v1965_v10 = vmul.f32 %v3718_v58, %v1894_v39 }
 0x32e   : >> { %v1661_v16 = vsel %vm1660_vm2, %v1659_v46, 0  ;;  %v1932_v21 = vmul.f32 %v3741_v30, %v3696_v0  ;;  %v1962_v19 = vadd.f32 %v1961_v52, %v1960_v1  ;;  %v1966_v47 = vmul.f32 %v3720_v57, %v1897_v55 }
 0x32f   : >> { %v1662_v45 = vshrl.u32 %v1661_v16, 5  ;;  %v1663_v4 = vand.u32 31, %v1661_v16  ;;  %v3750_v35 = vadd.f32 %v1930_v11, %v1929_v36  ;;  %v1933_v38 = vmul.f32 %v3745_v49, %v3699_v61 }
 0x330   : >> { %v1968_v33 = vmul.f32 %v3727_v54, %v1899_v22  ;;  %v4293_v15 = vmov 2475754826   ;;  %v4294_v63 = vmov 2131351028   ;;  %v4295_v51 = vmov 920167782  }
 0x331   : >> { %v1664_v3 = vsub.s32 32, %v1663_v4  ;;  %v1666_v18 = vshll.u32 %v4292_v2, %v1663_v4  ;;  %v1669_v39 = vshll.u32 %v4293_v15, %v1663_v4  ;;  %v1672_v28 = vshll.u32 %v4294_v63, %v1663_v4 }
 0x332   : >> { %v1675_v48 = vshll.u32 %v4243_v60, %v1663_v4  ;;  %v1678_v56 = vshll.u32 %v4295_v51, %v1663_v4  ;;  %vm1681_vm3 = vcmp.lt.s32.totalorder %v1662_v45, 1  ;;  %vm1682_vm4 = vcmp.lt.s32.totalorder %v1662_v45, 2 }
 0x333   : >> { %v1665_v59 = vshrl.u32 %v4292_v2, %v1664_v3  ;;  %v1667_v44 = vshrl.u32 %v4293_v15, %v1664_v3  ;;  %v1670_v55 = vshrl.u32 %v4294_v63, %v1664_v3  ;;  %v1673_v22 = vshrl.u32 %v4243_v60, %v1664_v3 }
 0x334   : >> { %v1676_v17 = vshrl.u32 %v4295_v51, %v1664_v3  ;;  %v4296_v37 = vmov 1326507024   ;;  %vm1683_vm5 = vcmp.lt.s32.totalorder %v1662_v45, 3  ;;  %vm1684_vm6 = vcmp.lt.s32.totalorder %v1662_v45, 4 }
 0x335   : >> { %v1679_v24 = vshrl.u32 %v4296_v37, %v1664_v3  ;;  %v1668_v14 = vor.u32 %v1667_v44, %v1666_v18  ;;  %v1671_v26 = vor.u32 %v1670_v55, %v1669_v39  ;;  %v1674_v20 = vor.u32 %v1673_v22, %v1672_v28 }
 0x336   : >> { %v1934_v27 = vadd.f32 %v1933_v38, %v1932_v21  ;;  %v1677_v13 = vor.u32 %v1676_v17, %v1675_v48  ;;  %v1935_v46 = vmul.f32 %v3750_v35, %v3702_v62  ;;  %v3769_v42 = vadd.f32 %v1963_v6, %v1962_v19 }
 0x337   : >> { %v1680_v34 = vor.u32 %v1679_v24, %v1678_v56  ;;  %v1685_v7 = vsel %vm1681_vm3, %v1665_v59, %v1668_v14  ;;  %v1686_v60 = vsel %vm1684_vm6, %v1674_v20, 2102212464  ;;  %v1689_v50 = vsel %vm1681_vm3, %v1668_v14, %v1671_v26 }
 0x338   : >> { %v1693_v31 = vsel %vm1681_vm3, %v1671_v26, %v1674_v20  ;;  %v1687_v11 = vsel %vm1683_vm5, %v1671_v26, %v1686_v60  ;;  %v1690_v1 = vsel %vm1684_vm6, %v1677_v13, 920167782  ;;  %v3775_v16 = vadd.f32 %v1935_v46, %v1934_v27 }
 0x339   : >> { %v1694_v52 = vsel %vm1684_vm6, %v1680_v34, 1326507024  ;;  %v1691_v36 = vsel %vm1683_vm5, %v1674_v20, %v1690_v1  ;;  %v1967_v21 = vadd.f32 %v1966_v47, %v1965_v10  ;;  %v1688_v6 = vsel %vm1682_vm4, %v1685_v7, %v1687_v11 }
 0x33a   : >> { %v1695_v4 = vsel %vm1683_vm5, %v1677_v13, %v1694_v52  ;;  %v1692_v19 = vsel %vm1682_vm4, %v1689_v50, %v1691_v36  ;;  %v1970_v3 = vmul.f32 %v3718_v58, %v3678_v9  ;;  %v1971_v10 = vmul.f32 %v3720_v57, %v3684_v25 }
 0x33b   : >> { %v1696_v38 = vsel %vm1682_vm4, %v1693_v31, %v1695_v4  ;;  %v3789_v15 = vmul.u32.u64.low %v3732_v29, %v1692_v19  ;;  %v3790_v39 = vmul.u32.u64.high %v3732_v29, %v1692_v19, %v3789_v15  ;;  %v3792_v63 = vadd.f32 %v1968_v33, %v1967_v21 }
 0x33c   : >> { %v3785_v2 = vmul.u32.u64.low %v3732_v29, %v1696_v38  ;;  %v3786_v18 = vmul.u32.u64.high %v3732_v29, %v1696_v38, %v3785_v2  ;;  %v1973_v45 = vmul.f32 %v3727_v54, %v3687_v5  ;;  %v1975_v47 = vmul.f32 %v3769_v42, %v3696_v0 }
 0x33d   : >> { %v1704_v9 = vmul.u32 %v3732_v29, %v1688_v6  ;;  %v1972_v28 = vadd.f32 %v1971_v10, %v1970_v3  ;;  %v1976_v48 = vmul.f32 %v3792_v63, %v3699_v61  ;;  %v1707_v33 = vadd.s32 1, %v3790_v39 }
 0x33e   : >> { %vm1706_vm7 = vc.u32 %v3786_v18, %v3789_v15  ;;  %v1705_v20 = vadd.s32 %v3789_v15, %v3786_v18  ;;  %vm1651_vm9 = vcmp.lt.s32.totalorder %v3693_v23, 0  ;;  %vm1650_vm10 = vcmp.le.f32.partialorder %v1649_v41, 0.7853982 }
 0x33f   : >> { %v3805_v51 = vadd.f32 %v1973_v45, %v1972_v28  ;;  %v1977_v56 = vadd.f32 %v1976_v48, %v1975_v47  ;;  %v1708_v25 = vsel %vm1706_vm7, %v1707_v33, %v3790_v39  ;;  %vm1741_vm1 = vweird.f32 %v3693_v23 }
 0x340   : >> { %v1709_v59 = vadd.s32 %v1708_v25, %v1704_v9  ;;  %vm1856_vm2 = vcmp.gt.f32.partialorder %v3681_v12, 1e-24 }
 0x341   : >> { %v1978_v5 = vmul.f32 %v3805_v51, %v3702_v62 }
 0x342   : >> { %v1710_v44 = vadd.s32 536870912, %v1709_v59 }
 0x343   : >> { %v3810_v55 = vadd.f32 %v1978_v5, %v1977_v56 }
 0x344   : >> { %v1711_v29 = vshrl.u32 %v1710_v44, 30 }
 0x346   : >> { %v1712_v22 = vshll.u32 %v1711_v29, 30  ;;  %v1735_v4 = vsub.s32 4, %v1711_v29 }
 0x348   : >> { %v1713_v17 = vsub.s32 %v1709_v59, %v1712_v22  ;;  %v1736_v19 = vsel %vm1651_vm9, %v1735_v4, %v1711_v29 }
 0x349   : >> { %v1738_v3 = vsel %vm1650_vm10, 0, %v1736_v19 }
 0x34a   : >> { %v1715_v37 = vsub.s32 0, %v1713_v17  ;;  %v1845_v2 = vadd.s32 3, %v1738_v3  ;;  %v1742_v18 = vand.u32 3, %v1738_v3 }
 0x34c   : >> { %v2396_v24 = vmin.u32 %v1715_v37, %v1713_v17  ;;  %v1846_v15 = vand.u32 3, %v1845_v2  ;;  %vm1747_vm11 = vcmp.eq.s32.totalorder %v1742_v18, 2  ;;  %vm1744_vm13 = vcmp.eq.s32.totalorder %v1742_v18, 0 }
 0x34d   : >> { %vm1743_vm15 = vcmp.lt.s32.totalorder %v1742_v18, 2 }
 0x34e   : >> { %v1717_v14 = vclz %v2396_v24  ;;  %vm1851_vm12 = vcmp.eq.s32.totalorder %v1846_v15, 2  ;;  %vm1848_vm14 = vcmp.eq.s32.totalorder %v1846_v15, 0  ;;  %vm1847_vm0 = vcmp.lt.s32.totalorder %v1846_v15, 2 }
 0x350   : >> { %v2397_v26 = vadd.s32 4294967294, %v1717_v14 }
 0x352   : >> { %vm2398_vm8 = vcmp.lt.s32.totalorder %v2397_v26, 0 }
 0x353   : >> { %v1720_v27 = vsel %vm2398_vm8, 0, %v2397_v26 }
 0x354   : >> { %v1721_v13 = vsub.s32 32, %v1720_v27  ;;  %v1722_v34 = vshll.u32 %v1713_v17, %v1720_v27  ;;  %v1725_v46 = vsub.s32 4294967266, %v1720_v27 }
 0x356   : >> { %v1723_v7 = vshrl.u32 %v1705_v20, %v1721_v13  ;;  %v1726_v60 = vadd.s32 127, %v1725_v46 }
 0x358   : >> { %v1724_v50 = vor.u32 %v1723_v7, %v1722_v34  ;;  %v1727_v31 = vshll.u32 %v1726_v60, 23 }
 0x35a   : >> { %v1728_v11 = vor.u32 4788187, %v1727_v31  ;;  %v1731_v1 = vcvt.s32.f32 %v1724_v50 }
 0x35c   : >> { %v1729_v52 = vand.u32 2147483647, %v1728_v11 }
 0x35e   : >> { %v1732_v36 = vmul.f32 %v1731_v1, %v1729_v52 }
 0x360   : >> { %v1733_v21 = vxor.u32 2147483648, %v1732_v36 }
 0x362   : >> { %v1734_v6 = vsel %vm1651_vm9, %v1733_v21, %v1732_v36 }
 0x363   : >> { %v1737_v38 = vsel %vm1650_vm10, %v3693_v23, %v1734_v6 }
 0x364   : >> { %2508 = vcosq.f32 %v1737_v38 }
 0x365   : >> { %2510 = vsinq.f32 %v1737_v38 }
 0x371   : >> { %v2509_v39 = vpop.eup %2508 }
 0x372   : >> { %v2511_v10 = vpop.eup %2510  ;;  %v1748_v45 = vxor.u32 2147483648, %v2509_v39 }
 0x373   : >> { %v1745_v41 = vxor.u32 2147483648, %v2511_v10 }
 0x374   : >> { %v1749_v47 = vsel %vm1747_vm11, %v1748_v45, %v2511_v10  ;;  %v1853_v9 = vsel %vm1851_vm12, %v1748_v45, %v2511_v10 }
 0x375   : >> { %v1746_v28 = vsel %vm1744_vm13, %v2509_v39, %v1745_v41  ;;  %v1850_v48 = vsel %vm1848_vm14, %v2509_v39, %v1745_v41 }
 0x376   : >> { %v1750_v33 = vsel %vm1743_vm15, %v1746_v28, %v1749_v47  ;;  %v1854_v56 = vsel %vm1847_vm0, %v1850_v48, %v1853_v9 }
 0x377   : >> { %v1751_v25 = vsel %vm1741_vm1, nan, %v1750_v33  ;;  %v1855_v59 = vsel %vm1741_vm1, nan, %v1854_v56 }
 0x378   : >> { %v1857_v5 = vmul.f32 %v3689_v40, %v1855_v59  ;;  %v1859_v44 = vmul.f32 %v1751_v25, %v3536_v53  ;;  %v1860_v29 = vmul.f32 %v1855_v59, %v3696_v0  ;;  %v1862_v23 = vmul.f32 %v1751_v25, %v3540_v32 }
 0x379   : >> { %v1863_v22 = vmul.f32 %v1855_v59, %v3699_v61  ;;  %v1865_v17 = vmul.f32 %v1751_v25, %v3542_v8  ;;  %v1866_v37 = vmul.f32 %v1855_v59, %v3702_v62  ;;  %v1938_v24 = vmul.f32 %v3775_v16, %v1855_v59 }
 0x37a   : >> { %v1858_v14 = vsel %vm1856_vm2, %v1857_v5, 1.0  ;;  %v1861_v26 = vadd.f32 %v1860_v29, %v1859_v44  ;;  %v1939_v12 = vmul.f32 %v1751_v25, %v3696_v0  ;;  %v1946_v40 = vmul.f32 %v1751_v25, %v3699_v61 }
 0x37b   : >> { %v1864_v20 = vadd.f32 %v1863_v22, %v1862_v23  ;;  %v1867_v27 = vadd.f32 %v1866_v37, %v1865_v17  ;;  %v1916_v13 = vsub.f32 %v1751_v25, %v1858_v14  ;;  %v1940_v34 = vmul.f32 %v3741_v30, %v1858_v14 }
 0x37c   : >> { %v1944_v46 = vmul.f32 %v1938_v24, %v3536_v53  ;;  %v1947_v7 = vmul.f32 %v3745_v49, %v1858_v14  ;;  %v1951_v60 = vmul.f32 %v1938_v24, %v3540_v32  ;;  %v1953_v50 = vmul.f32 %v1751_v25, %v3702_v62  ;;  %2027 = vst [vmem:[%s2026_s17] sm:$0xff] %v1861_v26 }
 0x37d   : >> { %v1937_v31 = vmul.f32 %v3775_v16, %v1916_v13  ;;  %v1941_v11 = vadd.f32 %v1940_v34, %v1939_v12  ;;  %v1954_v1 = vmul.f32 %v3750_v35, %v1858_v14  ;;  %v1958_v52 = vmul.f32 %v1938_v24, %v3542_v8  ;;  %2404 = vst [vmem:[%s2026_s17 + $0x10] sm:$0xff] %v1864_v20 }
 0x37e   : >> { %2406 = vst [vmem:[%s2026_s17 + $0x20] sm:$0xff] %v1867_v27  ;;  %v1948_v36 = vadd.f32 %v1947_v7, %v1946_v40  ;;  %v1980_v30 = vmul.f32 %v3810_v55, %v1916_v13  ;;  %v1981_v4 = vmul.f32 %v3810_v55, %v1855_v59  ;;  %v1982_v49 = vmul.f32 %v3718_v58, %v1751_v25 }
 0x37f   : >> { %v1942_v21 = vmul.f32 %v1937_v31, %v3696_v0  ;;  %v1949_v6 = vmul.f32 %v1937_v31, %v3699_v61  ;;  %v1955_v19 = vadd.f32 %v1954_v1, %v1953_v50  ;;  %v1956_v16 = vmul.f32 %v1937_v31, %v3702_v62 }
 0x380   : >> { %v1983_v35 = vmul.f32 %v3769_v42, %v1858_v14  ;;  %v1985_v38 = vmul.f32 %v1980_v30, %v3696_v0  ;;  %v1987_v3 = vmul.f32 %v1981_v4, %v3536_v53  ;;  %v1989_v2 = vmul.f32 %v3720_v57, %v1751_v25 }
 0x381   : >> { %v1943_v18 = vadd.f32 %v1942_v21, %v1941_v11  ;;  %v1950_v15 = vadd.f32 %v1949_v6, %v1948_v36  ;;  %v1957_v55 = vadd.f32 %v1956_v16, %v1955_v19  ;;  %v1990_v58 = vmul.f32 %v3792_v63, %v1858_v14 }
 0x382   : >> { %v1984_v39 = vadd.f32 %v1983_v35, %v1982_v49  ;;  %v1992_v10 = vmul.f32 %v1980_v30, %v3699_v61  ;;  %v1994_v45 = vmul.f32 %v1981_v4, %v3540_v32  ;;  %v1996_v41 = vmul.f32 %v3727_v54, %v1751_v25 }
 0x383   : >> { %v1945_v47 = vsub.f32 %v1943_v18, %v1944_v46  ;;  %v1952_v42 = vsub.f32 %v1950_v15, %v1951_v60  ;;  %v1959_v9 = vsub.f32 %v1957_v55, %v1958_v52  ;;  %v1991_v0 = vadd.f32 %v1990_v58, %v1989_v2 }
 0x384   : >> { %v1986_v28 = vadd.f32 %v1985_v38, %v1984_v39  ;;  %v1997_v53 = vmul.f32 %v3805_v51, %v1858_v14  ;;  %v1999_v57 = vmul.f32 %v1980_v30, %v3702_v62  ;;  %v2001_v61 = vmul.f32 %v1981_v4, %v3542_v8 }
 0x385   : >> { %v1993_v48 = vadd.f32 %v1992_v10, %v1991_v0  ;;  %v2003_v33 = vmul.f32 %v1945_v47, %v1945_v47  ;;  %v2004_v56 = vmul.f32 %v1952_v42, %v1952_v42  ;;  %v2006_v63 = vmul.f32 %v1959_v9, %v1959_v9 }
 0x386   : >> { %v1988_v59 = vsub.f32 %v1986_v28, %v1987_v3  ;;  %v1998_v5 = vadd.f32 %v1997_v53, %v1996_v41 }
 0x387   : >> { %v1995_v32 = vsub.f32 %v1993_v48, %v1994_v45  ;;  %v2005_v44 = vadd.f32 %v2004_v56, %v2003_v33 }
 0x388   : >> { %v2000_v54 = vadd.f32 %v1999_v57, %v1998_v5  ;;  %v2008_v25 = vmul.f32 %v1988_v59, %v1945_v47  ;;  %v2013_v29 = vmul.f32 %v1988_v59, %v1988_v59 }
 0x389   : >> { %v2007_v23 = vadd.f32 %v2006_v63, %v2005_v44  ;;  %v2009_v22 = vmul.f32 %v1995_v32, %v1952_v42  ;;  %v2014_v17 = vmul.f32 %v1995_v32, %v1995_v32 }
 0x38a   : >> { %v2002_v51 = vsub.f32 %v2000_v54, %v2001_v61 }
 0x38b   : >> { %v2010_v62 = vadd.f32 %v2009_v22, %v2008_v25  ;;  %v2015_v37 = vadd.f32 %v2014_v17, %v2013_v29 }
 0x38c   : >> { %v2011_v24 = vmul.f32 %v2002_v51, %v1959_v9  ;;  %v2016_v14 = vmul.f32 %v2002_v51, %v2002_v51 }
 0x38e   : >> { %v2012_v26 = vadd.f32 %v2011_v24, %v2010_v62  ;;  %v2017_v12 = vadd.f32 %v2016_v14, %v2015_v37 }
 0x390   : >> { %v2018_v40 = vmul.f32 %v2017_v12, %v2007_v23  ;;  %v2019_v20 = vmul.f32 %v2012_v26, %v2012_v26 }
 0x392   : >> { %v2020_v8 = vsub.f32 %v2018_v40, %v2019_v20 }
 0x394   : >> { %v2021_v27 = vand.u32 2147483647, %v2020_v8 }
 0x396   : >> { %2512 = vlog2.f32 %v2021_v27 }
 0x3a3   : >> { %v2513_v13 = vpop.eup %2512 }
 0x3a4   : >> { %v2023_v34 = vmul.f32 0.6931472, %v2513_v13 }
 0x3a6   : >> { %v2024_v46 = vmul.f32 0.5, %v2023_v34  ;;  %377 = sbr.rel (!%p375_p2) target bundleno = 367 (0x16f), region = 161 }
 0x3a8   : >> { %v2025_v7 = vadd.f32 %v2024_v46, %v3654_v43 }
 0x3aa   : >> { %2033 = vst [vmem:[%s2032_s21] sm:$0xff] %v2025_v7 }
 0x3ab   : > { %2045 = sbr.rel (!%p2621_p10) target bundleno = 951 (0x3b7), region = 73  ;;  %s4302_s29 = sld [smem:[#allocation8_spill]] (%p2621_p10) }
 0x3ac   : > { %s4303_s30 = sld [smem:[#allocation163_spill]] (%p2621_p10) }
 0x3ad   : > { %s4304_s5 = sld [smem:[#allocation167_spill]] (%p2621_p10) }
 0x3b1   : > { %s2412_s12 = sshll.u32 %s4302_s29, 4 }
 0x3b2   : > { %v2087_v60 = vld [vmem:[%s4303_s30] sm:$0xff]  ;;  %v2089_v43 = vld [vmem:[%s4303_s30 + $0x8] sm:$0xff]  ;;  %v2091_v50 = vld [vmem:[%s4303_s30 + $0x10] sm:$0xff] }
 0x3b3   : > { %s2048_s7 = scalar_lea.vmem %s4304_s5, %s2412_s12  ;;  %v2093_v31 = vld [vmem:[%s4303_s30 + $0x18] sm:$0xff]  ;;  %v2095_v11 = vld [vmem:[%s4303_s30 + $0x20] sm:$0xff]  ;;  %v2097_v1 = vld [vmem:[%s4303_s30 + $0x28] sm:$0xff] }
 0x3b4   : > { %2088 = vst [vmem:[%s2048_s7] sm:$0xff] %v2087_v60  ;;  %2090 = vst [vmem:[%s2048_s7 + $0x8] sm:$0xff] %v2089_v43 }
 0x3b5   : > { %2092 = vst [vmem:[%s2048_s7 + $0x20] sm:$0xff] %v2091_v50  ;;  %2094 = vst [vmem:[%s2048_s7 + $0x28] sm:$0xff] %v2093_v31 }
 0x3b6   : > { %2096 = vst [vmem:[%s2048_s7 + $0x40] sm:$0xff] %v2095_v11  ;;  %2098 = vst [vmem:[%s2048_s7 + $0x48] sm:$0xff] %v2097_v1 }
 0x3b7 PF: > { %s4305_s19 = sld [smem:[#allocation9_spill]] }
 0x3b8   : > { %s4306_s17 = sld [smem:[#allocation7_spill]] }
 0x3b9   : > { %s4307_s18 = sld [smem:[#allocation10_spill]] }
 0x3bd   : > { %p17_p3 = scmp.ge.s32.totalorder %s4305_s19, 4  }
 0x3bf   :  { %19 = sbr.rel (!%p17_p3) target bundleno = 18 (0x12), region = 172 }

</bundles_post_ra>
